<compile_context>
chip_gen: v7x
topology: tpu7x:2x2x1
jax: 0.10.0
libtpu: 0.0.40
codegen_flags: <defaults>
</compile_context>

<pallas_src>
import functools

import jax
import jax.numpy as jnp
from jax import lax
from jax.experimental import pallas as pl
from jax.experimental.pallas import tpu as pltpu

_VMEM = pl.BlockSpec(memory_space=pltpu.MemorySpace.VMEM)

EFFNET_B7_FEATURES = 2560   # EfficientNet-B7 _fc.in_features
STEM_CH = 64
STEM_K = 3 * 3 * 3          # 27
STEM_K_PAD = 32             # pad contraction dim to a sublane multiple
TILE_N = 1280               # 2560 / 1280 = 2 parallel channel blocks (v7x 2 TCs)


def _round_up(x, m):
    return ((x + m - 1) // m) * m


def _device_kind():
    try:
        return jax.devices()[0].device_kind.lower()
    except Exception:
        return ""


def _vmem_limit_bytes(kind):
    if "v7" in kind:
        return 40 * 1024 * 1024          # v7x: 64 MiB physical, leave headroom
    if "v5" in kind or "v6" in kind:
        return 96 * 1024 * 1024          # 128 MiB physical
    return 48 * 1024 * 1024              # unknown gen: conservative


def _spatial_tile(batch, s_total, kp, tn, vmem_limit):
    """Largest spatial tile (multiple of 8) whose temporaries fit the budget."""
    budget = int(vmem_limit * 0.55)
    # Per spatial row: fp32 y + sigmoid/select temps (~3x tN*4), fp32+bf16 h,
    # double-buffered bf16 patch row.  Weights/acc/out are small constants.
    per_row = tn * 4 * 3 + STEM_CH * (4 + 2) + kp * 2 * 2
    ts = max(8, (budget // max(1, batch * per_row)) // 8 * 8)
    ts = min(ts, 2048, _round_up(s_total, 8))
    return max(8, ts)


# ----------------------------- Pallas kernels ------------------------------ #

def _backbone_pool_kernel(patch_ref, stem_w_ref, stem_b_ref, head_w_ref,
                          head_b_ref, o_ref, acc_ref, *, s_valid, s_pad,
                          bf16_act):
    """Fused stem conv (im2col matmul) + swish + 1x1 head conv + swish + pool.

    Grid = (channel blocks [parallel], spatial blocks [arbitrary]).
    patch_ref: (B, tS, Kpad) bf16   stem_w: (Kpad, 64) bf16   stem_b: (1,64) f32
    head_w:    (64, tN)      bf16   head_b: (1, tN)    f32
    o_ref:     (B, tN) f32          acc_ref: (B, tN) f32 scratch
    """
    s = pl.program_id(1)

    @pl.when(s == 0)
    def _():
        acc_ref[...] = jnp.zeros_like(acc_ref)

    def swish_wide(v):
        # 2560-wide activation: bf16 sigmoid on v6e/v7x (2x EUP rate), f32 else.
        if bf16_act:
            return v * jax.nn.sigmoid(v.astype(jnp.bfloat16)).astype(jnp.float32)
        return v * jax.nn.sigmoid(v)

    stem_w = stem_w_ref[...]
    stem_b = stem_b_ref[...]
    head_w = head_w_ref[...]
    head_b = head_b_ref[...]

    # Static unroll over the (small) batch: every matmul stays a plain 2-D
    # MXU dot and no (B,tS,*) <-> (B*tS,*) relayout copies are created.
    for b in range(patch_ref.shape[0]):
        x = patch_ref[b]                                               # (tS, Kp) bf16
        h = jnp.dot(x, stem_w, preferred_element_type=jnp.float32) + stem_b
        h = h * jax.nn.sigmoid(h)                                      # stem swish f32
        y = jnp.dot(h.astype(jnp.bfloat16), head_w,
                    preferred_element_type=jnp.float32) + head_b
        y = swish_wide(y)                                              # (tS, tN) f32
        acc_ref[b:b + 1, :] += y.sum(axis=0, keepdims=True)           # partial pool

    @pl.when(s == pl.num_programs(1) - 1)
    def _():
        acc = acc_ref[...]
        n_pad = s_pad - s_valid                                        # static int
        if n_pad:
            # All-zero padded patch rows contribute swish(head_b + swish(stem_b)@W)
            # per row (NOT zero); subtract that constant contribution exactly.
            h_pad = stem_b * jax.nn.sigmoid(stem_b)                    # (1, 64)
            y_pad = jnp.dot(h_pad.astype(jnp.bfloat16), head_w,
                            preferred_element_type=jnp.float32) + head_b
            y_pad = swish_wide(y_pad)                                  # (1, tN)
            acc = acc - jnp.float32(n_pad) * y_pad
        o_ref[...] = acc * jnp.float32(1.0 / s_valid)


def _heads_kernel(feat_ref, meta_ref, mw1_ref, mb1_ref, mw2_ref, mb2_ref,
                  cw1a_ref, cw1b_ref, cb1_ref, cw2_ref, cb2_ref, o_ref):
    """metadata_fc + (implicit concat) + combined_fc in one launch.

    feat: (B, 2560) f32, meta: (B, M) f32.  comb_fc1 is applied as
    feats @ W1a + meta_hidden @ W1b (no concat).  The 2560-K dot runs on the
    MXU in bf16 with fp32 accumulation.  Output is a lane-dense (B, 128)
    slab; column 0 is the real logit.
    """
    m = jnp.dot(meta_ref[...], mw1_ref[...], preferred_element_type=jnp.float32)
    m = jnp.maximum(m + mb1_ref[...], 0.0)
    m = jnp.dot(m, mw2_ref[...], preferred_element_type=jnp.float32)
    m = jnp.maximum(m + mb2_ref[...], 0.0)                             # (B, 32)

    h = jnp.dot(feat_ref[...].astype(jnp.bfloat16), cw1a_ref[...],
                preferred_element_type=jnp.float32)                    # bf16 MXU
    h = h + jnp.dot(m, cw1b_ref[...], preferred_element_type=jnp.float32)
    h = jnp.maximum(h + cb1_ref[...], 0.0)                             # (B, 64)

    o_ref[...] = (jnp.dot(h, cw2_ref[...], preferred_element_type=jnp.float32)
                  + cb2_ref[...])                                      # (B, 128)


# ------------------------------ wrappers ----------------------------------- #

def backbone_pool(patches_bf16, stem_w, stem_b, head_w, head_b, *, s_valid,
                  tile_s, tile_n, bf16_act, vmem_limit):
    """patches: (B, S_pad, Kpad) bf16 -> pooled features (B, 2560) f32."""
    B, S_pad, Kp = patches_bf16.shape
    Cout = head_w.shape[1]
    assert Cout % tile_n == 0 and S_pad % tile_s == 0
    n_cblk = Cout // tile_n
    grid = (n_cblk, S_pad // tile_s)
    M = B * S_pad

    cost = pl.CostEstimate(
        flops=2 * M * Kp * STEM_CH * n_cblk + 2 * M * STEM_CH * Cout,
        transcendentals=M * STEM_CH * n_cblk + M * Cout,
        bytes_accessed=(patches_bf16.size * 2 * n_cblk + stem_w.size * 2
                        + head_w.size * 2 + (stem_b.size + head_b.size) * 4
                        + B * Cout * 4),
    )

    kernel = functools.partial(_backbone_pool_kernel, s_valid=s_valid,
                               s_pad=S_pad, bf16_act=bf16_act)

    return pl.pallas_call(
        kernel,
        out_shape=jax.ShapeDtypeStruct((B, Cout), jnp.float32),
        grid_spec=pltpu.PrefetchScalarGridSpec(
            num_scalar_prefetch=0,
            grid=grid,
            in_specs=[
                pl.BlockSpec((B, tile_s, Kp), lambda j, s: (0, s, 0)),
                pl.BlockSpec((Kp, STEM_CH), lambda j, s: (0, 0)),
                pl.BlockSpec((1, STEM_CH), lambda j, s: (0, 0)),
                pl.BlockSpec((STEM_CH, tile_n), lambda j, s: (0, j)),
                pl.BlockSpec((1, tile_n), lambda j, s: (0, j)),
            ],
            out_specs=pl.BlockSpec((B, tile_n), lambda j, s: (0, j)),
            scratch_shapes=[pltpu.VMEM((B, tile_n), jnp.float32)],
        ),
        compiler_params=pltpu.CompilerParams(
            dimension_semantics=("parallel", "arbitrary"),
            vmem_limit_bytes=vmem_limit,
        ),
        cost_estimate=cost,
    )(patches_bf16, stem_w, stem_b, head_w, head_b)


def heads(feats, metadata, params):
    """Fused metadata_fc + combined_fc.  Returns (B, 1) f32."""
    B = feats.shape[0]
    cw1a = params["comb_w1"][:EFFNET_B7_FEATURES].astype(jnp.bfloat16)  # (2560, 64)
    cw1b = params["comb_w1"][EFFNET_B7_FEATURES:]                       # (32, 64)
    # Lane-dense padded final layer (real logit in column 0).
    cw2 = jnp.pad(params["comb_w2"], ((0, 0), (0, 128 - params["comb_w2"].shape[1])))
    cb2 = jnp.pad(params["comb_b2"], ((0, 0), (0, 128 - params["comb_b2"].shape[1])))

    out = pl.pallas_call(
        _heads_kernel,
        out_shape=jax.ShapeDtypeStruct((B, 128), jnp.float32),
        in_specs=[_VMEM] * 11,
        out_specs=_VMEM,
    )(feats, metadata,
      params["meta_w1"], params["meta_b1"], params["meta_w2"], params["meta_b2"],
      cw1a, cw1b, params["comb_b1"], cw2, cb2)
    return out[:, :1]


# ------------------------- parameters & forward ----------------------------- #

def init_params(key, num_metadata_features):
    ks = jax.random.split(key, 12)
    s = 0.05
    n = lambda k, shape: (jax.random.normal(k, shape, jnp.float32) * s)
    return {
        # stem conv 3x3 (in=3) folded with BN -> (27, 64) weight + bias
        "stem_w": n(ks[0], (STEM_K, STEM_CH)),
        "stem_b": n(ks[1], (1, STEM_CH)),
        # 1x1 head conv to B7 feature width (2560) folded with BN
        "head_w": n(ks[2], (STEM_CH, EFFNET_B7_FEATURES)),
        "head_b": n(ks[3], (1, EFFNET_B7_FEATURES)),
        # metadata_fc: Linear(num_meta, 64) -> ReLU -> Linear(64, 32) -> ReLU
        "meta_w1": n(ks[4], (num_metadata_features, 64)),
        "meta_b1": n(ks[5], (1, 64)),
        "meta_w2": n(ks[6], (64, 32)),
        "meta_b2": n(ks[7], (1, 32)),
        # combined_fc: Linear(2560 + 32, 64) -> ReLU -> Linear(64, 1)
        "comb_w1": n(ks[8], (EFFNET_B7_FEATURES + 32, 64)),
        "comb_b1": n(ks[9], (1, 64)),
        "comb_w2": n(ks[10], (64, 1)),
        "comb_b2": n(ks[11], (1, 1)),
    }


def efficientnet_b7_forward(params, images, metadata):
    """images: (B, 3, H, W) NCHW float32, metadata: (B, num_meta) float32."""
    B, C, H, W = images.shape

    # NHWC so the im2col feature axis lands last (lane-dense) without a big
    # HBM relayout of the patch matrix (only the small 3-channel image moves).
    # TODO(synk): padding ((0,1),(0,1)) matches PyTorch SAME only for even H,W.
    img = jnp.transpose(images, (0, 2, 3, 1))
    patches = lax.conv_general_dilated_patches(
        img, filter_shape=(3, 3), window_strides=(2, 2),
        padding=((0, 1), (0, 1)),
        dimension_numbers=("NHWC", "HWIO", "NHWC"))        # (B, Ho, Wo, C*9)
    _, Ho, Wo, K = patches.shape
    S = Ho * Wo
    assert K == STEM_K, K
    patches = patches.reshape(B, S, K)

    kind = _device_kind()
    vmem_limit = _vmem_limit_bytes(kind)
    bf16_act = ("v6" in kind) or ("v7" in kind)            # bf16 EUP path

    tile_n = TILE_N
    tile_s = _spatial_tile(B, S, STEM_K_PAD, tile_n, vmem_limit)
    S_pad = _round_up(S, tile_s)

    patches = jnp.pad(patches, ((0, 0), (0, S_pad - S), (0, STEM_K_PAD - K)))
    patches = patches.astype(jnp.bfloat16)                 # bf16 MXU inputs

    stem_w = jnp.pad(params["stem_w"],
                     ((0, STEM_K_PAD - K), (0, 0))).astype(jnp.bfloat16)
    head_w = params["head_w"].astype(jnp.bfloat16)

    feats = backbone_pool(patches, stem_w, params["stem_b"],
                          head_w, params["head_b"],
                          s_valid=S, tile_s=tile_s, tile_n=tile_n,
                          bf16_act=bf16_act, vmem_limit=vmem_limit)   # (B, 2560)

    return heads(feats, metadata, params)                  # (B, 1)


if __name__ == "__main__":
    key = jax.random.PRNGKey(0)
    k_img, k_meta, k_params = jax.random.split(key, 3)

    B, H, W = 2, 16, 16
    num_metadata_features = 8

    images = jax.random.normal(k_img, (B, 3, H, W), jnp.float32)      # NCHW, like PyTorch
    metadata = jax.random.normal(k_meta, (B, num_metadata_features), jnp.float32)

    params = init_params(k_params, num_metadata_features)

    fwd = jax.jit(efficientnet_b7_forward)
    out = fwd(params, images, metadata)
    jax.block_until_ready(out)
    assert out.shape == (B, 1), out.shape
    print("KERNEL_OK")
</pallas_src>

<mosaic_0001>
module attributes {stable_mosaic.version = 11 : i64} {
  func.func @_backbone_pool_kernel(%arg0: i32, %arg1: i32, %arg2: memref<2x64x32xbf16, #tpu.memory_space<vmem>>, %arg3: memref<32x64xbf16, #tpu.memory_space<vmem>>, %arg4: memref<1x64xf32, #tpu.memory_space<vmem>>, %arg5: memref<64x1280xbf16, #tpu.memory_space<vmem>>, %arg6: memref<1x1280xf32, #tpu.memory_space<vmem>>, %arg7: memref<2x1280xf32, #tpu.memory_space<vmem>>, %arg8: memref<2x1280xf32, #tpu.memory_space<vmem>>) attributes {dimension_semantics = [#tpu.dimension_semantics<parallel>, #tpu.dimension_semantics<arbitrary>], iteration_bounds = array<i64: 2, 1>, scalar_prefetch = 0 : i64, scratch_operands = 1 : i64, tpu.core_type = #tpu.core_type<tc>, window_params = [{transform_indices = @transform_0, window_bounds = array<i64: 2, 64, 32>}, {pipeline_mode = #tpu.pipeline_mode<synchronous>, transform_indices = @transform_1, window_bounds = array<i64: 32, 64>}, {pipeline_mode = #tpu.pipeline_mode<synchronous>, transform_indices = @transform_2, window_bounds = array<i64: 1, 64>}, {transform_indices = @transform_3, window_bounds = array<i64: 64, 1280>}, {transform_indices = @transform_4, window_bounds = array<i64: 1, 1280>}, {transform_indices = @transform_5, window_bounds = array<i64: 2, 1280>}]} {
    %c0_i32 = arith.constant 0 : i32
    %0 = arith.cmpi eq, %arg1, %c0_i32 : i32
    %1 = arith.extui %0 : i1 to i32
    %c0_i32_0 = arith.constant 0 : i32
    %2 = arith.cmpi ne, %1, %c0_i32_0 : i32
    scf.if %2 {
      %cst_32 = arith.constant 0.000000e+00 : f32
      %62 = vector.broadcast %cst_32 : f32 to vector<2x1280xf32>
      %c0_33 = arith.constant 0 : index
      %c0_34 = arith.constant 0 : index
      %63 = vector.load %arg8[%c0_33, %c0_34] : memref<2x1280xf32, #tpu.memory_space<vmem>>, vector<2x1280xf32>
      tpu.vector_store %arg8[%c0_33, %c0_34], %62 {strides = array<i32>} : memref<2x1280xf32, #tpu.memory_space<vmem>>, vector<2x1280xf32>,
    } else {
    }
    %c0 = arith.constant 0 : index
    %c0_1 = arith.constant 0 : index
    %3 = vector.load %arg3[%c0, %c0_1] : memref<32x64xbf16, #tpu.memory_space<vmem>>, vector<32x64xbf16>
    %c0_2 = arith.constant 0 : index
    %c0_3 = arith.constant 0 : index
    %4 = vector.load %arg4[%c0_2, %c0_3] : memref<1x64xf32, #tpu.memory_space<vmem>>, vector<1x64xf32>
    %c0_4 = arith.constant 0 : index
    %c0_5 = arith.constant 0 : index
    %5 = vector.load %arg5[%c0_4, %c0_5] : memref<64x1280xbf16, #tpu.memory_space<vmem>>, vector<64x1280xbf16>
    %c0_6 = arith.constant 0 : index
    %c0_7 = arith.constant 0 : index
    %6 = vector.load %arg6[%c0_6, %c0_7] : memref<1x1280xf32, #tpu.memory_space<vmem>>, vector<1x1280xf32>
    %c0_8 = arith.constant 0 : index
    %c0_9 = arith.constant 0 : index
    %c0_10 = arith.constant 0 : index
    %7 = vector.load %arg2[%c0_8, %c0_9, %c0_10] : memref<2x64x32xbf16, #tpu.memory_space<vmem>>, vector<1x64x32xbf16>
    %8 = vector.shape_cast %7 : vector<1x64x32xbf16> to vector<64x32xbf16>
    %cst = arith.constant dense<0.000000e+00> : vector<64x64xf32>
    %9 = tpu.matmul %8, %3, %cst {dimension_numbers = #tpu.dot_dimension_numbers<[1], [0], [0], [1], [0, 0, 1, 1], [], []>} : vector<64x32xbf16>, vector<32x64xbf16>, vector<64x64xf32> -> vector<64x64xf32>
    %10 = vector.broadcast %4 : vector<1x64xf32> to vector<64x64xf32>
    %11 = arith.addf %9, %10 : vector<64x64xf32>
    %12 = arith.negf %11 : vector<64x64xf32>
    %13 = math.exp %12 : vector<64x64xf32>
    %cst_11 = arith.constant 1.000000e+00 : f32
    %14 = vector.broadcast %cst_11 : f32 to vector<64x64xf32>
    %15 = arith.addf %14, %13 : vector<64x64xf32>
    %16 = arith.divf %14, %15 : vector<64x64xf32>
    %17 = arith.mulf %11, %16 : vector<64x64xf32>
    %18 = arith.truncf %17 : vector<64x64xf32> to vector<64x64xbf16>
    %cst_12 = arith.constant dense<0.000000e+00> : vector<64x1280xf32>
    %19 = tpu.matmul %18, %5, %cst_12 {dimension_numbers = #tpu.dot_dimension_numbers<[1], [0], [0], [1], [0, 0, 1, 1], [], []>} : vector<64x64xbf16>, vector<64x1280xbf16>, vector<64x1280xf32> -> vector<64x1280xf32>
    %20 = vector.broadcast %6 : vector<1x1280xf32> to vector<64x1280xf32>
    %21 = arith.addf %19, %20 : vector<64x1280xf32>
    %22 = arith.negf %21 : vector<64x1280xf32>
    %23 = math.exp %22 : vector<64x1280xf32>
    %cst_13 = arith.constant 1.000000e+00 : f32
    %24 = vector.broadcast %cst_13 : f32 to vector<64x1280xf32>
    %25 = arith.addf %24, %23 : vector<64x1280xf32>
    %26 = arith.divf %24, %25 : vector<64x1280xf32>
    %27 = arith.mulf %21, %26 : vector<64x1280xf32>
    %c0_14 = arith.constant 0 : index
    %c0_15 = arith.constant 0 : index
    %28 = vector.load %arg8[%c0_14, %c0_15] : memref<2x1280xf32, #tpu.memory_space<vmem>>, vector<1x1280xf32>
    %cst_16 = arith.constant dense<0.000000e+00> : vector<1280xf32>
    %29 = vector.multi_reduction <add>, %27, %cst_16 [0] : vector<64x1280xf32> to vector<1280xf32>
    %30 = vector.shape_cast %29 : vector<1280xf32> to vector<1x1280xf32>
    %31 = arith.addf %28, %30 : vector<1x1280xf32>
    %c0_17 = arith.constant 0 : index
    %c0_18 = arith.constant 0 : index
    %32 = vector.load %arg8[%c0_17, %c0_18] : memref<2x1280xf32, #tpu.memory_space<vmem>>, vector<1x1280xf32>
    tpu.vector_store %arg8[%c0_17, %c0_18], %31 {strides = array<i32>} : memref<2x1280xf32, #tpu.memory_space<vmem>>, vector<1x1280xf32>,
    %c1 = arith.constant 1 : index
    %c0_19 = arith.constant 0 : index
    %c0_20 = arith.constant 0 : index
    %33 = vector.load %arg2[%c1, %c0_19, %c0_20] : memref<2x64x32xbf16, #tpu.memory_space<vmem>>, vector<1x64x32xbf16>
    %34 = vector.shape_cast %33 : vector<1x64x32xbf16> to vector<64x32xbf16>
    %cst_21 = arith.constant dense<0.000000e+00> : vector<64x64xf32>
    %35 = tpu.matmul %34, %3, %cst_21 {dimension_numbers = #tpu.dot_dimension_numbers<[1], [0], [0], [1], [0, 0, 1, 1], [], []>} : vector<64x32xbf16>, vector<32x64xbf16>, vector<64x64xf32> -> vector<64x64xf32>
    %36 = vector.broadcast %4 : vector<1x64xf32> to vector<64x64xf32>
    %37 = arith.addf %35, %36 : vector<64x64xf32>
    %38 = arith.negf %37 : vector<64x64xf32>
    %39 = math.exp %38 : vector<64x64xf32>
    %cst_22 = arith.constant 1.000000e+00 : f32
    %40 = vector.broadcast %cst_22 : f32 to vector<64x64xf32>
    %41 = arith.addf %40, %39 : vector<64x64xf32>
    %42 = arith.divf %40, %41 : vector<64x64xf32>
    %43 = arith.mulf %37, %42 : vector<64x64xf32>
    %44 = arith.truncf %43 : vector<64x64xf32> to vector<64x64xbf16>
    %cst_23 = arith.constant dense<0.000000e+00> : vector<64x1280xf32>
    %45 = tpu.matmul %44, %5, %cst_23 {dimension_numbers = #tpu.dot_dimension_numbers<[1], [0], [0], [1], [0, 0, 1, 1], [], []>} : vector<64x64xbf16>, vector<64x1280xbf16>, vector<64x1280xf32> -> vector<64x1280xf32>
    %46 = vector.broadcast %6 : vector<1x1280xf32> to vector<64x1280xf32>
    %47 = arith.addf %45, %46 : vector<64x1280xf32>
    %48 = arith.negf %47 : vector<64x1280xf32>
    %49 = math.exp %48 : vector<64x1280xf32>
    %cst_24 = arith.constant 1.000000e+00 : f32
    %50 = vector.broadcast %cst_24 : f32 to vector<64x1280xf32>
    %51 = arith.addf %50, %49 : vector<64x1280xf32>
    %52 = arith.divf %50, %51 : vector<64x1280xf32>
    %53 = arith.mulf %47, %52 : vector<64x1280xf32>
    %c1_25 = arith.constant 1 : index
    %c0_26 = arith.constant 0 : index
    %54 = vector.load %arg8[%c1_25, %c0_26] : memref<2x1280xf32, #tpu.memory_space<vmem>>, vector<1x1280xf32>
    %cst_27 = arith.constant dense<0.000000e+00> : vector<1280xf32>
    %55 = vector.multi_reduction <add>, %53, %cst_27 [0] : vector<64x1280xf32> to vector<1280xf32>
    %56 = vector.shape_cast %55 : vector<1280xf32> to vector<1x1280xf32>
    %57 = arith.addf %54, %56 : vector<1x1280xf32>
    %c1_28 = arith.constant 1 : index
    %c0_29 = arith.constant 0 : index
    %58 = vector.load %arg8[%c1_28, %c0_29] : memref<2x1280xf32, #tpu.memory_space<vmem>>, vector<1x1280xf32>
    tpu.vector_store %arg8[%c1_28, %c0_29], %57 {strides = array<i32>} : memref<2x1280xf32, #tpu.memory_space<vmem>>, vector<1x1280xf32>,
    %c0_i32_30 = arith.constant 0 : i32
    %59 = arith.cmpi eq, %arg1, %c0_i32_30 : i32
    %60 = arith.extui %59 : i1 to i32
    %c0_i32_31 = arith.constant 0 : i32
    %61 = arith.cmpi ne, %60, %c0_i32_31 : i32
    scf.if %61 {
      %c0_32 = arith.constant 0 : index
      %c0_33 = arith.constant 0 : index
      %62 = vector.load %arg8[%c0_32, %c0_33] : memref<2x1280xf32, #tpu.memory_space<vmem>>, vector<2x1280xf32>
      %cst_34 = arith.constant 1.562500e-02 : f32
      %63 = vector.broadcast %cst_34 : f32 to vector<2x1280xf32>
      %64 = arith.mulf %62, %63 : vector<2x1280xf32>
      %c0_35 = arith.constant 0 : index
      %c0_36 = arith.constant 0 : index
      %65 = vector.load %arg7[%c0_35, %c0_36] : memref<2x1280xf32, #tpu.memory_space<vmem>>, vector<2x1280xf32>
      tpu.vector_store %arg7[%c0_35, %c0_36], %64 {strides = array<i32>} : memref<2x1280xf32, #tpu.memory_space<vmem>>, vector<2x1280xf32>,
    } else {
    }
    return
  }
  func.func @transform_0(%arg0: i32, %arg1: i32) -> (i32, i32, i32) {
    %c0_i32 = arith.constant 0 : i32
    %c0_i32_0 = arith.constant 0 : i32
    %c0_i32_1 = arith.constant 0 : i32
    return %c0_i32, %arg1, %c0_i32_0 : i32, i32, i32
  }
  func.func @transform_1(%arg0: i32, %arg1: i32) -> (i32, i32) {
    %c0_i32 = arith.constant 0 : i32
    %c0_i32_0 = arith.constant 0 : i32
    %c0_i32_1 = arith.constant 0 : i32
    return %c0_i32, %c0_i32_0 : i32, i32
  }
  func.func @transform_2(%arg0: i32, %arg1: i32) -> (i32, i32) {
    %c0_i32 = arith.constant 0 : i32
    %c0_i32_0 = arith.constant 0 : i32
    %c0_i32_1 = arith.constant 0 : i32
    return %c0_i32, %c0_i32_0 : i32, i32
  }
  func.func @transform_3(%arg0: i32, %arg1: i32) -> (i32, i32) {
    %c0_i32 = arith.constant 0 : i32
    %c0_i32_0 = arith.constant 0 : i32
    return %c0_i32, %arg0 : i32, i32
  }
  func.func @transform_4(%arg0: i32, %arg1: i32) -> (i32, i32) {
    %c0_i32 = arith.constant 0 : i32
    %c0_i32_0 = arith.constant 0 : i32
    return %c0_i32, %arg0 : i32, i32
  }
  func.func @transform_5(%arg0: i32, %arg1: i32) -> (i32, i32) {
    %c0_i32 = arith.constant 0 : i32
    %c0_i32_0 = arith.constant 0 : i32
    return %c0_i32, %arg0 : i32, i32
  }
}

module attributes {stable_mosaic.version = 11 : i64} {
  func.func @_heads_kernel(%arg0: memref<2x2560xf32, #tpu.memory_space<vmem>>, %arg1: memref<2x8xf32, #tpu.memory_space<vmem>>, %arg2: memref<8x64xf32, #tpu.memory_space<vmem>>, %arg3: memref<1x64xf32, #tpu.memory_space<vmem>>, %arg4: memref<64x32xf32, #tpu.memory_space<vmem>>, %arg5: memref<1x32xf32, #tpu.memory_space<vmem>>, %arg6: memref<2560x64xbf16, #tpu.memory_space<vmem>>, %arg7: memref<32x64xf32, #tpu.memory_space<vmem>>, %arg8: memref<1x64xf32, #tpu.memory_space<vmem>>, %arg9: memref<64x128xf32, #tpu.memory_space<vmem>>, %arg10: memref<1x128xf32, #tpu.memory_space<vmem>>, %arg11: memref<2x128xf32, #tpu.memory_space<vmem>>) attributes {dimension_semantics = [], scalar_prefetch = 0 : i64, scratch_operands = 0 : i64, tpu.core_type = #tpu.core_type<tc>} {
    %c0 = arith.constant 0 : index
    %c0_0 = arith.constant 0 : index
    %0 = vector.load %arg1[%c0, %c0_0] : memref<2x8xf32, #tpu.memory_space<vmem>>, vector<2x8xf32>
    %c0_1 = arith.constant 0 : index
    %c0_2 = arith.constant 0 : index
    %1 = vector.load %arg2[%c0_1, %c0_2] : memref<8x64xf32, #tpu.memory_space<vmem>>, vector<8x64xf32>
    %cst = arith.constant dense<0.000000e+00> : vector<2x64xf32>
    %2 = tpu.matmul %0, %1, %cst {dimension_numbers = #tpu.dot_dimension_numbers<[1], [0], [0], [1], [0, 0, 1, 1], [], []>} : vector<2x8xf32>, vector<8x64xf32>, vector<2x64xf32> -> vector<2x64xf32>
    %c0_3 = arith.constant 0 : index
    %c0_4 = arith.constant 0 : index
    %3 = vector.load %arg3[%c0_3, %c0_4] : memref<1x64xf32, #tpu.memory_space<vmem>>, vector<1x64xf32>
    %4 = vector.broadcast %3 : vector<1x64xf32> to vector<2x64xf32>
    %5 = arith.addf %2, %4 : vector<2x64xf32>
    %cst_5 = arith.constant 0.000000e+00 : f32
    %6 = vector.broadcast %cst_5 : f32 to vector<2x64xf32>
    %7 = arith.maximumf %5, %6 : vector<2x64xf32>
    %c0_6 = arith.constant 0 : index
    %c0_7 = arith.constant 0 : index
    %8 = vector.load %arg4[%c0_6, %c0_7] : memref<64x32xf32, #tpu.memory_space<vmem>>, vector<64x32xf32>
    %cst_8 = arith.constant dense<0.000000e+00> : vector<2x32xf32>
    %9 = tpu.matmul %7, %8, %cst_8 {dimension_numbers = #tpu.dot_dimension_numbers<[1], [0], [0], [1], [0, 0, 1, 1], [], []>} : vector<2x64xf32>, vector<64x32xf32>, vector<2x32xf32> -> vector<2x32xf32>
    %c0_9 = arith.constant 0 : index
    %c0_10 = arith.constant 0 : index
    %10 = vector.load %arg5[%c0_9, %c0_10] : memref<1x32xf32, #tpu.memory_space<vmem>>, vector<1x32xf32>
    %11 = vector.broadcast %10 : vector<1x32xf32> to vector<2x32xf32>
    %12 = arith.addf %9, %11 : vector<2x32xf32>
    %cst_11 = arith.constant 0.000000e+00 : f32
    %13 = vector.broadcast %cst_11 : f32 to vector<2x32xf32>
    %14 = arith.maximumf %12, %13 : vector<2x32xf32>
    %c0_12 = arith.constant 0 : index
    %c0_13 = arith.constant 0 : index
    %15 = vector.load %arg0[%c0_12, %c0_13] : memref<2x2560xf32, #tpu.memory_space<vmem>>, vector<2x2560xf32>
    %16 = arith.truncf %15 : vector<2x2560xf32> to vector<2x2560xbf16>
    %c0_14 = arith.constant 0 : index
    %c0_15 = arith.constant 0 : index
    %17 = vector.load %arg6[%c0_14, %c0_15] : memref<2560x64xbf16, #tpu.memory_space<vmem>>, vector<2560x64xbf16>
    %cst_16 = arith.constant dense<0.000000e+00> : vector<2x64xf32>
    %18 = tpu.matmul %16, %17, %cst_16 {dimension_numbers = #tpu.dot_dimension_numbers<[1], [0], [0], [1], [0, 0, 1, 1], [], []>} : vector<2x2560xbf16>, vector<2560x64xbf16>, vector<2x64xf32> -> vector<2x64xf32>
    %c0_17 = arith.constant 0 : index
    %c0_18 = arith.constant 0 : index
    %19 = vector.load %arg7[%c0_17, %c0_18] : memref<32x64xf32, #tpu.memory_space<vmem>>, vector<32x64xf32>
    %cst_19 = arith.constant dense<0.000000e+00> : vector<2x64xf32>
    %20 = tpu.matmul %14, %19, %cst_19 {dimension_numbers = #tpu.dot_dimension_numbers<[1], [0], [0], [1], [0, 0, 1, 1], [], []>} : vector<2x32xf32>, vector<32x64xf32>, vector<2x64xf32> -> vector<2x64xf32>
    %21 = arith.addf %18, %20 : vector<2x64xf32>
    %c0_20 = arith.constant 0 : index
    %c0_21 = arith.constant 0 : index
    %22 = vector.load %arg8[%c0_20, %c0_21] : memref<1x64xf32, #tpu.memory_space<vmem>>, vector<1x64xf32>
    %23 = vector.broadcast %22 : vector<1x64xf32> to vector<2x64xf32>
    %24 = arith.addf %21, %23 : vector<2x64xf32>
    %cst_22 = arith.constant 0.000000e+00 : f32
    %25 = vector.broadcast %cst_22 : f32 to vector<2x64xf32>
    %26 = arith.maximumf %24, %25 : vector<2x64xf32>
    %c0_23 = arith.constant 0 : index
    %c0_24 = arith.constant 0 : index
    %27 = vector.load %arg9[%c0_23, %c0_24] : memref<64x128xf32, #tpu.memory_space<vmem>>, vector<64x128xf32>
    %cst_25 = arith.constant dense<0.000000e+00> : vector<2x128xf32>
    %28 = tpu.matmul %26, %27, %cst_25 {dimension_numbers = #tpu.dot_dimension_numbers<[1], [0], [0], [1], [0, 0, 1, 1], [], []>} : vector<2x64xf32>, vector<64x128xf32>, vector<2x128xf32> -> vector<2x128xf32>
    %c0_26 = arith.constant 0 : index
    %c0_27 = arith.constant 0 : index
    %29 = vector.load %arg10[%c0_26, %c0_27] : memref<1x128xf32, #tpu.memory_space<vmem>>, vector<1x128xf32>
    %30 = vector.broadcast %29 : vector<1x128xf32> to vector<2x128xf32>
    %31 = arith.addf %28, %30 : vector<2x128xf32>
    %c0_28 = arith.constant 0 : index
    %c0_29 = arith.constant 0 : index
    %32 = vector.load %arg11[%c0_28, %c0_29] : memref<2x128xf32, #tpu.memory_space<vmem>>, vector<2x128xf32>
    tpu.vector_store %arg11[%c0_28, %c0_29], %31 {strides = array<i32>} : memref<2x128xf32, #tpu.memory_space<vmem>>, vector<2x128xf32>,
    return
  }
}

</mosaic_0001>

<bundles_post_ra>
// kernel: efficientnet_b7_forward.2
= control target key start
LH: loop header
LB: loop body
LE: loop exit
PB: predicated region body
PF: predicated region fallthrough
CT: control target
= control target key end

     0   :  { %s4693_s18 = smov 0   ;;  %s4695_s19 = smov 0   ;;  %s6611_s0 = inlined_call_operand.vmem [shape: bf16[2,64,32], index: 0, kind: input, shape index: {}]   ;;  %s6612_s1 = inlined_call_operand.vmem [shape: bf16[32,64], index: 1, kind: input, shape index: {}]   ;;  %s6613_s2 = inlined_call_operand.vmem [shape: f32[1,64], index: 2, kind: input, shape index: {}]   ;;  %s6614_s3 = inlined_call_operand.vmem [shape: bf16[64,2560], index: 3, kind: input, shape index: {}]   ;;  %s6615_s4 = inlined_call_operand.vmem [shape: f32[1,2560], index: 4, kind: input, shape index: {}]   ;;  %s6616_s5 = inlined_call_operand.vmem [shape: f32[2,2560], index: 5, kind: output, shape index: {}]  }
   0x1   :  { %s4697_s20 = smov 0   ;;  %s4699_s21 = smov 0  }
   0x2   :  { %s4701_s22 = smov 0  }
   0x3 LB: > { %s27_s23 = sadd.s32 1, %s4654_s21  ;;  %p109_p1 = scmp.ne.s32.totalorder %s4646_s19, %s4642_s18  ;;  %s4658_s22 = sphi %s4701_s22, %s15_s22   ;;  %s4654_s21 = sphi %s4699_s21, %s6763_s21   ;;  %s4650_s20 = sphi %s4697_s20, %s6762_s20   ;;  %s4646_s19 = sphi %s4695_s19, %s6761_s19   ;;  %s4642_s18 = sphi %s4693_s18, %s6760_s18  }
   0x4   : > { %p29_p0 = scmp.ge.s32.totalorder %s27_s23, 2  ;;  %p110_p2 = scmp.eq.s32.totalorder %s4658_s22, 0 }
   0x5   : > { %s102_s25 = sadd.s32 1, %s4646_s19  ;;  %p3452_p5 = scmp.ge.s32.totalorder %s4658_s22, 2 }
   0x6   : > { %s6765_s23 = smov (%p29_p0, %s27_s23), 0  ;;  %p111_p3 = por %p110_p2, %p109_p1 }
   0x7   : > { %s99_s24 = ssub.s32 %s4654_s21, %s6765_s23  ;;  %202 = sbr.rel (%p3452_p5) target bundleno = 39 (0x27), region = 28 }
   0x8   : > { %p100_p4 = scmp.eq.s32.totalorder %s99_s24, 0 }
   0xa   : > { %s4728_s26 = scalar_select %p100_p4, %s4646_s19, %s102_s25  }
   0xe   : > { %205 = sbr.rel (!%p111_p3) target bundleno = 39 (0x27), region = 32  ;;  %s207_s27 = sand.u32 (%p111_p3), 1, %s4646_s19  }
   0xf   : > { %s3741_s28 = smul.u32 (%p111_p3), 40, %s4654_s21 }
  0x10   : > { %s3778_s29 = smul.u32 (%p111_p3), 320, %s207_s27 }
  0x11   : > { %s4736_s7 = scalar_lea.vmem (%p111_p3), %s6614_s3, %s3741_s28 }
  0x12   : > { %v225_v0 = vld [vmem:[%s4736_s7] sm:$0xff] (%p111_p3)  ;;  %v227_v1 = vld [vmem:[%s4736_s7 + $0x8] sm:$0xff] (%p111_p3)  ;;  %v229_v2 = vld [vmem:[%s4736_s7 + $0x10] sm:$0xff] (%p111_p3)  ;;  %s4741_s8 = scalar_lea.vmem (%p111_p3), [#allocation3], %s3778_s29 }
  0x13   : > { %226 = vst [vmem:[%s4741_s8] sm:$0xff] (%p111_p3), %v225_v0  ;;  %228 = vst [vmem:[%s4741_s8 + $0x8] sm:$0xff] (%p111_p3), %v227_v1  ;;  %v231_v3 = vld [vmem:[%s4736_s7 + $0x18] sm:$0xff] (%p111_p3)  ;;  %v233_v4 = vld [vmem:[%s4736_s7 + $0x20] sm:$0xff] (%p111_p3) }
  0x14   : > { %230 = vst [vmem:[%s4741_s8 + $0x10] sm:$0xff] (%p111_p3), %v229_v2  ;;  %v235_v5 = vld [vmem:[%s4736_s7 + $0x50] sm:$0xff] (%p111_p3)  ;;  %232 = vst [vmem:[%s4741_s8 + $0x18] sm:$0xff] (%p111_p3), %v231_v3  ;;  %v237_v6 = vld [vmem:[%s4736_s7 + $0x58] sm:$0xff] (%p111_p3) }
  0x15   : > { %234 = vst [vmem:[%s4741_s8 + $0x20] sm:$0xff] %v233_v4  ;;  %236 = vst [vmem:[%s4741_s8 + $0x28] sm:$0xff] %v235_v5  ;;  %v239_v7 = vld [vmem:[%s4736_s7 + $0x60] sm:$0xff]  ;;  %v241_v8 = vld [vmem:[%s4736_s7 + $0x68] sm:$0xff] }
  0x16   : > { %238 = vst [vmem:[%s4741_s8 + $0x30] sm:$0xff] %v237_v6  ;;  %240 = vst [vmem:[%s4741_s8 + $0x38] sm:$0xff] %v239_v7  ;;  %v243_v9 = vld [vmem:[%s4736_s7 + $0x70] sm:$0xff]  ;;  %v245_v10 = vld [vmem:[%s4736_s7 + $0xa0] sm:$0xff] }
  0x17   : > { %242 = vst [vmem:[%s4741_s8 + $0x40] sm:$0xff] %v241_v8  ;;  %v247_v11 = vld [vmem:[%s4736_s7 + $0xa8] sm:$0xff]  ;;  %244 = vst [vmem:[%s4741_s8 + $0x48] sm:$0xff] %v243_v9  ;;  %v249_v12 = vld [vmem:[%s4736_s7 + $0xb0] sm:$0xff] }
  0x18   : > { %246 = vst [vmem:[%s4741_s8 + $0x50] sm:$0xff] %v245_v10  ;;  %248 = vst [vmem:[%s4741_s8 + $0x58] sm:$0xff] %v247_v11  ;;  %v251_v13 = vld [vmem:[%s4736_s7 + $0xb8] sm:$0xff]  ;;  %v253_v14 = vld [vmem:[%s4736_s7 + $0xc0] sm:$0xff] }
  0x19   : > { %250 = vst [vmem:[%s4741_s8 + $0x60] sm:$0xff] %v249_v12  ;;  %252 = vst [vmem:[%s4741_s8 + $0x68] sm:$0xff] %v251_v13  ;;  %v255_v15 = vld [vmem:[%s4736_s7 + $0xf0] sm:$0xff]  ;;  %v257_v16 = vld [vmem:[%s4736_s7 + $0xf8] sm:$0xff] }
  0x1a   : > { %254 = vst [vmem:[%s4741_s8 + $0x70] sm:$0xff] %v253_v14  ;;  %v259_v17 = vld [vmem:[%s4736_s7 + $0x100] sm:$0xff]  ;;  %256 = vst [vmem:[%s4741_s8 + $0x78] sm:$0xff] %v255_v15  ;;  %v261_v18 = vld [vmem:[%s4736_s7 + $0x108] sm:$0xff] }
  0x1b   : > { %258 = vst [vmem:[%s4741_s8 + $0x80] sm:$0xff] %v257_v16  ;;  %260 = vst [vmem:[%s4741_s8 + $0x88] sm:$0xff] %v259_v17  ;;  %v263_v19 = vld [vmem:[%s4736_s7 + $0x110] sm:$0xff]  ;;  %v265_v20 = vld [vmem:[%s4736_s7 + $0x140] sm:$0xff] }
  0x1c   : > { %262 = vst [vmem:[%s4741_s8 + $0x90] sm:$0xff] %v261_v18  ;;  %264 = vst [vmem:[%s4741_s8 + $0x98] sm:$0xff] %v263_v19  ;;  %v267_v21 = vld [vmem:[%s4736_s7 + $0x148] sm:$0xff]  ;;  %v269_v22 = vld [vmem:[%s4736_s7 + $0x150] sm:$0xff] }
  0x1d   : > { %266 = vst [vmem:[%s4741_s8 + $0xa0] sm:$0xff] %v265_v20  ;;  %v271_v23 = vld [vmem:[%s4736_s7 + $0x158] sm:$0xff]  ;;  %268 = vst [vmem:[%s4741_s8 + $0xa8] sm:$0xff] %v267_v21  ;;  %v273_v24 = vld [vmem:[%s4736_s7 + $0x160] sm:$0xff] }
  0x1e   : > { %270 = vst [vmem:[%s4741_s8 + $0xb0] sm:$0xff] %v269_v22  ;;  %272 = vst [vmem:[%s4741_s8 + $0xb8] sm:$0xff] %v271_v23  ;;  %v275_v25 = vld [vmem:[%s4736_s7 + $0x190] sm:$0xff]  ;;  %v277_v26 = vld [vmem:[%s4736_s7 + $0x198] sm:$0xff] }
  0x1f   : > { %274 = vst [vmem:[%s4741_s8 + $0xc0] sm:$0xff] %v273_v24  ;;  %276 = vst [vmem:[%s4741_s8 + $0xc8] sm:$0xff] %v275_v25  ;;  %v279_v27 = vld [vmem:[%s4736_s7 + $0x1a0] sm:$0xff]  ;;  %v281_v28 = vld [vmem:[%s4736_s7 + $0x1a8] sm:$0xff] }
  0x20   : > { %278 = vst [vmem:[%s4741_s8 + $0xd0] sm:$0xff] %v277_v26  ;;  %v283_v29 = vld [vmem:[%s4736_s7 + $0x1b0] sm:$0xff]  ;;  %280 = vst [vmem:[%s4741_s8 + $0xd8] sm:$0xff] %v279_v27  ;;  %v285_v30 = vld [vmem:[%s4736_s7 + $0x1e0] sm:$0xff] }
  0x21   : > { %282 = vst [vmem:[%s4741_s8 + $0xe0] sm:$0xff] %v281_v28  ;;  %284 = vst [vmem:[%s4741_s8 + $0xe8] sm:$0xff] %v283_v29  ;;  %v287_v31 = vld [vmem:[%s4736_s7 + $0x1e8] sm:$0xff]  ;;  %v289_v32 = vld [vmem:[%s4736_s7 + $0x1f0] sm:$0xff] }
  0x22   : > { %286 = vst [vmem:[%s4741_s8 + $0xf0] sm:$0xff] %v285_v30  ;;  %288 = vst [vmem:[%s4741_s8 + $0xf8] sm:$0xff] %v287_v31  ;;  %v291_v33 = vld [vmem:[%s4736_s7 + $0x1f8] sm:$0xff]  ;;  %v293_v34 = vld [vmem:[%s4736_s7 + $0x200] sm:$0xff] }
  0x23   : > { %290 = vst [vmem:[%s4741_s8 + $0x100] sm:$0xff] %v289_v32  ;;  %v295_v35 = vld [vmem:[%s4736_s7 + $0x230] sm:$0xff]  ;;  %292 = vst [vmem:[%s4741_s8 + $0x108] sm:$0xff] %v291_v33  ;;  %v297_v36 = vld [vmem:[%s4736_s7 + $0x238] sm:$0xff] }
  0x24   : > { %294 = vst [vmem:[%s4741_s8 + $0x110] sm:$0xff] %v293_v34  ;;  %296 = vst [vmem:[%s4741_s8 + $0x118] sm:$0xff] %v295_v35  ;;  %v299_v37 = vld [vmem:[%s4736_s7 + $0x240] sm:$0xff]  ;;  %v301_v38 = vld [vmem:[%s4736_s7 + $0x248] sm:$0xff] }
  0x25   : > { %298 = vst [vmem:[%s4741_s8 + $0x120] sm:$0xff] %v297_v36  ;;  %300 = vst [vmem:[%s4741_s8 + $0x128] sm:$0xff] %v299_v37  ;;  %v303_v39 = vld [vmem:[%s4736_s7 + $0x250] sm:$0xff] }
  0x26   : > { %302 = vst [vmem:[%s4741_s8 + $0x130] sm:$0xff] %v301_v38  ;;  %304 = vst [vmem:[%s4741_s8 + $0x138] sm:$0xff] %v303_v39 }
  0x27 PF: > { %p3454_p6 = scmp.ge.s32.totalorder %s4658_s22, 1  ;;  %p317_p7 = scmp.lt.s32.totalorder %s4658_s22, 3 }
  0x29   : > { %p318_p8 = pnand %p3454_p6, %p317_p7 }
  0x2b   : > { %321 = sbr.rel (%p318_p8) target bundleno = 1126 (0x466), region = 59 }
  0x32   : > { %v4825_v40 = vld [vmem:[%s6612_s1] sm:$0xff]   ;;  %v4830_v41 = vld [vmem:[%s6612_s1 + $0x8] sm:$0xff]   ;;  %vm479_vm0 = vcmask 261120   ;;  %v3827_v44 = vld [vmem:[%s6611_s0 + $0x10] sm:$0xff]   ;;  %s324_s28 = sand.u32 1, %s4642_s18   ;;  %v6618_v62 = vmov 0  }
  0x33   : > { %3754 = vmatprep.subr.bf16.mxu1 %v4825_v40  ;;  %v3825_v42 = vld [vmem:[%s6611_s0] sm:$0xff]   ;;  %v3826_v43 = vld [vmem:[%s6611_s0 + $0x8] sm:$0xff]   ;;  %v3828_v45 = vld [vmem:[%s6611_s0 + $0x18] sm:$0xff]   ;;  %s3779_s29 = smul.u32 320, %s324_s28  ;;  %987 = vmatprep.mubr.bf16.mxu0 %v6618_v62  ;;  %vm869_vm1 = vcmask 523264  }
  0x34   : > { %3755 = vmatpush3.bf16.msra.mxu1 %v4825_v40  ;;  %3758 = vmatprep.mubr.msk.bf16.mxu1 %vm479_vm0, %v3825_v42  ;;  %v3456_v1 = vld [vmem:[%s6613_s2] ss:$0 sm:$0xff]  ;;  %s367_s15 = smul.u32 10, %s4650_s20 }
  0x35   : > { %3756 = vmatprep.subr.bf16.mxu1 %v4830_v41  ;;  %s4853_s30 = scalar_lea.vmem [#allocation3], %s3779_s29 }
  0x36   : > { %v4856_v46 = vld [vmem:[%s4853_s30 + $0xc] ss:$40 sps:$4 sm:$0xff]   ;;  %v4859_v47 = vld [vmem:[%s4853_s30] ss:$40 sps:$4 sm:$0xff]   ;;  %v4871_v50 = vld [vmem:[%s4853_s30 + $0x5c] ss:$40 sps:$4 sm:$0xff]  }
  0x37   : > { %955 = vmatprep.subr.bf16.mxu0 %v4856_v46  ;;  %v4863_v48 = vld [vmem:[%s4853_s30 + $0x4] ss:$40 sps:$4 sm:$0xff]   ;;  %v4866_v49 = vld [vmem:[%s4853_s30 + $0x8] ss:$40 sps:$4 sm:$0xff]   ;;  %v4874_v51 = vld [vmem:[%s4853_s30 + $0x54] ss:$40 sps:$4 sm:$0xff]  }
  0x38   : > { %3757 = vmatpush3.bf16.msra.mxu1 %v4830_v41  ;;  %956 = vmatpush1.bf16.msra.mxu0 %v4866_v49  ;;  %v4878_v52 = vld [vmem:[%s4853_s30 + $0x50] ss:$40 sps:$4 sm:$0xff]   ;;  %v4887_v54 = vld [vmem:[%s4853_s30 + $0xac] ss:$40 sps:$4 sm:$0xff]   ;;  %v4894_v56 = vld [vmem:[%s4853_s30 + $0xa0] ss:$40 sps:$4 sm:$0xff]  }
  0x39   : > { %882 = vmatprep.subr.bf16.mxu1 %v4863_v48  ;;  %v4881_v53 = vld [vmem:[%s4853_s30 + $0x58] ss:$40 sps:$4 sm:$0xff]   ;;  %957 = vmatprep.subr.bf16.mxu0 %v4871_v50  ;;  %v4890_v55 = vld [vmem:[%s4853_s30 + $0xa4] ss:$40 sps:$4 sm:$0xff]   ;;  %v4897_v57 = vld [vmem:[%s4853_s30 + $0xa8] ss:$40 sps:$4 sm:$0xff]  }
  0x3a   : > { %v4903_v58 = vld [vmem:[%s4853_s30 + $0xfc] ss:$40 sps:$4 sm:$0xff]   ;;  %v4910_v60 = vld [vmem:[%s4853_s30 + $0xf0] ss:$40 sps:$4 sm:$0xff]   ;;  %p368_p9 = scmp.lt.s32.totalorder %s367_s15, 19 }
  0x3b   : > { %3759 = vmatmul.mubr.msk.bf16.vlgmr.msra.gmra.mrb[0].mxu1 %vm479_vm0, %v3826_v43  ;;  %v4906_v59 = vld [vmem:[%s4853_s30 + $0xf4] ss:$40 sps:$4 sm:$0xff]   ;;  %v4913_v61 = vld [vmem:[%s4853_s30 + $0xf8] ss:$40 sps:$4 sm:$0xff]  }
  0x3c   : > { %3762 = vmatprep.mubr.msk.bf16.mxu1 %vm479_vm0, %v3827_v44  ;;  %883 = vmatpush1.bf16.msra.mxu1 %v4859_v47  ;;  %v4922_v63 = vld [vmem:[%s4853_s30 + $0x1c] ss:$40 sps:$4 sm:$0xff]   ;;  %s6767_s15 = smov (!%p368_p9, %s367_s15), 19 }
  0x3d   : > { %884 = vmatprep.subr.bf16.mxu1 %v4874_v51  ;;  %958 = vmatpush1.bf16.msra.mxu0 %v4881_v53  ;;  %v4926_v0 = vld [vmem:[%s4853_s30 + $0x14] ss:$40 sps:$4 sm:$0xff]   ;;  %s5082_s24 = scalar_lea.vmem %s6615_s4, %s6767_s15  ;;  %s3455_s27 = sshll.u32 %s6767_s15, 1 }
  0x3e   : > { %959 = vmatprep.subr.bf16.mxu0 %v4887_v54 }
  0x40   : > { %885 = vmatpush1.bf16.msra.mxu1 %v4878_v52 }
  0x41   : > { %886 = vmatprep.subr.bf16.mxu1 %v4890_v55  ;;  %960 = vmatpush1.bf16.msra.mxu0 %v4897_v57 }
  0x42   : > { %961 = vmatprep.subr.bf16.mxu0 %v4903_v58 }
  0x43   : > { %3763 = vmatmul.mubr.msk.bf16.gmra.mrb[4].mxu1 %vm479_vm0, %v3828_v45 }
  0x44   : > { %887 = vmatpush1.bf16.msra.mxu1 %v4894_v56  ;;  %914 = vmatprep.mubr.bf16.mxu1 %v6618_v62 }
  0x45   : > { %888 = vmatprep.subr.bf16.mxu1 %v4906_v59  ;;  %962 = vmatpush1.bf16.msra.mxu0 %v4913_v61 }
  0x46   : > { %1101 = vmatprep.subr.bf16.mxu0 %v4922_v63 }
  0x48   : > { %889 = vmatpush1.bf16.msra.mxu1 %v4910_v60 }
  0x49   : > { %1028 = vmatprep.subr.bf16.mxu1 %v4926_v0 }
 0x10e   : > { %v3760_v2 = vpop.f32.mrb[0].mxu1 }
 0x10f   : > { %v535_v3 = vadd.f32 %v3760_v2, %v3456_v1  ;;  %v526_v4 = vpop.f32.mrb[1].mxu1 }
 0x110   : > { %v527_v5 = vadd.f32 %v3456_v1, %v526_v4  ;;  %v3761_v6 = vpop.f32.mrb[2].mxu1 }
 0x111   : > { %v3469_v7 = vmul.f32 -1.442695, %v535_v3  ;;  %v538_v8 = vadd.f32 %v3761_v6, %v3456_v1  ;;  %v529_v9 = vpop.f32.mrb[3].mxu1 }
 0x112   : > { %v3467_v10 = vmul.f32 -1.442695, %v527_v5  ;;  %v530_v11 = vadd.f32 %v3456_v1, %v529_v9 }
 0x113   : > { %3893 = vpow2.f32 %v3469_v7  ;;  %v3470_v12 = vmul.f32 -1.442695, %v538_v8 }
 0x114   : > { %3895 = vpow2.f32 %v3467_v10  ;;  %v3468_v13 = vmul.f32 -1.442695, %v530_v11 }
 0x115   : > { %3897 = vpow2.f32 %v3470_v12  ;;  %v3853_v12 = vld [vmem:[%s4853_s30 + $0x18] ss:$40 sps:$4 sm:$0xff]  }
 0x116   : > { %3899 = vpow2.f32 %v3468_v13  ;;  %v3764_v14 = vpop.f32.mrb[4].mxu1 }
 0x117   : > { %v4932_v15 = vadd.f32 %v3764_v14, %v3456_v1  ;;  %v542_v16 = vpop.f32.mrb[5].mxu1  ;;  %v3858_v14 = vld [vmem:[%s4853_s30 + $0x6c] ss:$40 sps:$4 sm:$0xff]  }
 0x118   : > { %v4934_v17 = vadd.f32 %v3456_v1, %v542_v16  ;;  %v3765_v18 = vpop.f32.mrb[6].mxu1  ;;  %v3862_v16 = vld [vmem:[%s4853_s30 + $0x10] ss:$40 sps:$4 sm:$0xff]  }
 0x119   : > { %v3473_v19 = vmul.f32 -1.442695, %v4932_v15  ;;  %v554_v20 = vadd.f32 %v3765_v18, %v3456_v1  ;;  %v545_v21 = vpop.f32.mrb[7].mxu1 }
 0x11a   : > { %v3471_v22 = vmul.f32 -1.442695, %v4934_v17  ;;  %v4938_v23 = vadd.f32 %v3456_v1, %v545_v21 }
 0x11b   : > { %3901 = vpow2.f32 %v3473_v19  ;;  %v3474_v24 = vmul.f32 -1.442695, %v554_v20  ;;  %v3861_v19 = vld [vmem:[%s4853_s30 + $0xbc] ss:$40 sps:$4 sm:$0xff]  }
 0x11c   : > { %3903 = vpow2.f32 %v3471_v22  ;;  %v3472_v25 = vmul.f32 -1.442695, %v4938_v23 }
 0x11d   : > { %v3894_v26 = vpop.eup %3893  ;;  %3905 = vpow2.f32 %v3474_v24 }
 0x11e   : > { %v3896_v27 = vpop.eup %3895  ;;  %v583_v28 = vadd.f32 1.0, %v3894_v26  ;;  %3907 = vpow2.f32 %v3472_v25  ;;  %v3865_v25 = vld [vmem:[%s4853_s30 + $0x60] ss:$40 sps:$4 sm:$0xff]  }
 0x11f   : > { %v3898_v29 = vpop.eup %3897  ;;  %v581_v30 = vadd.f32 1.0, %v3896_v27 }
 0x120   : > { %v3900_v31 = vpop.eup %3899  ;;  %3909 = vrcp.f32 %v583_v28  ;;  %v584_v32 = vadd.f32 1.0, %v3898_v29 }
 0x121   : > { %3911 = vrcp.f32 %v581_v30  ;;  %v582_v33 = vadd.f32 1.0, %v3900_v31  ;;  %v3859_v30 = vld [vmem:[%s4853_s30 + $0xb8] ss:$40 sps:$4 sm:$0xff]   ;;  %v3873_v31 = vld [vmem:[%s4853_s30 + $0xb4] ss:$40 sps:$4 sm:$0xff]  }
 0x122   : > { %3913 = vrcp.f32 %v584_v32  ;;  %v3874_v32 = vld [vmem:[%s4853_s30 + $0x100] ss:$40 sps:$4 sm:$0xff]  }
 0x123   : > { %3915 = vrcp.f32 %v582_v33  ;;  %v3879_v33 = vld [vmem:[%s4853_s30 + $0x24] ss:$40 sps:$4 sm:$0xff]  }
 0x125   : > { %v3902_v34 = vpop.eup %3901 }
 0x126   : > { %v3904_v35 = vpop.eup %3903  ;;  %v587_v36 = vadd.f32 1.0, %v3902_v34  ;;  %v3877_v34 = vld [vmem:[%s4853_s30 + $0x20] ss:$40 sps:$4 sm:$0xff]  }
 0x127   : > { %v3906_v37 = vpop.eup %3905  ;;  %v585_v38 = vadd.f32 1.0, %v3904_v35  ;;  %v3882_v35 = vld [vmem:[%s4853_s30 + $0x74] ss:$40 sps:$4 sm:$0xff]  }
 0x128   : > { %v3908_v39 = vpop.eup %3907  ;;  %3917 = vrcp.f32 %v587_v36  ;;  %v588_v42 = vadd.f32 1.0, %v3906_v37  ;;  %v3880_v36 = vld [vmem:[%s4853_s30 + $0x70] ss:$40 sps:$4 sm:$0xff]   ;;  %v3885_v37 = vld [vmem:[%s4853_s30 + $0xc4] ss:$40 sps:$4 sm:$0xff]  }
 0x129   : > { %3919 = vrcp.f32 %v585_v38  ;;  %v586_v43 = vadd.f32 1.0, %v3908_v39  ;;  %v3883_v38 = vld [vmem:[%s4853_s30 + $0xc0] ss:$40 sps:$4 sm:$0xff]   ;;  %v3886_v39 = vld [vmem:[%s4853_s30 + $0x110] ss:$40 sps:$4 sm:$0xff]  }
 0x12a   : > { %v3910_v44 = vpop.eup %3909  ;;  %3921 = vrcp.f32 %v588_v42  ;;  %v3892_v42 = vld [vmem:[%s6611_s0 + $0x38] sm:$0xff]  }
 0x12b   : > { %v3912_v45 = vpop.eup %3911  ;;  %3923 = vrcp.f32 %v586_v43  ;;  %v607_v4 = vmul.f32 %v3910_v44, %v535_v3  ;;  %v3867_v3 = vld [vmem:[%s4853_s30 + $0x64] ss:$40 sps:$4 sm:$0xff]  }
 0x12c   : > { %v3914_v1 = vpop.eup %3913  ;;  %v605_v7 = vmul.f32 %v3912_v45, %v527_v5 }
 0x12d   : > { %v3916_v2 = vpop.eup %3915  ;;  %v608_v6 = vmul.f32 %v3914_v1, %v538_v8  ;;  %v3856_v8 = vld [vmem:[%s4853_s30 + $0x68] ss:$40 sps:$4 sm:$0xff]  }
 0x12e   : > { %v606_v9 = vmul.f32 %v3916_v2, %v530_v11 }
 0x12f   : > { %v4941_v10 = vpack.c.bf16 %v608_v6, %v607_v4 }
 0x130   : > { %v4944_v13 = vpack.c.bf16 %v606_v9, %v605_v7 }
 0x132   : > { %v3918_v18 = vpop.eup %3917  ;;  %3515 = vmatmul.mubr.msk.bf16.vlgmr.msra.gmra.mrb[8].mxu1 %vm869_vm1, %v4944_v13  ;;  %3519 = vmatmul.mubr.msk.bf16.vlgmr.msra.gmra.mrb[0].mxu0 %vm869_vm1, %v4944_v13 }
 0x133   : > { %v3920_v5 = vpop.eup %3919  ;;  %1102 = vmatpush1.bf16.msra.mxu0 %v3853_v12  ;;  %924 = vmatprep.mubr.bf16.mxu1 %v6618_v62  ;;  %v611_v22 = vmul.f32 %v3918_v18, %v4932_v15  ;;  %v3870_v15 = vld [vmem:[%s4853_s30 + $0x10c] ss:$40 sps:$4 sm:$0xff]  }
 0x134   : > { %v3922_v11 = vpop.eup %3921  ;;  %997 = vmatprep.mubr.bf16.mxu0 %v6618_v62  ;;  %1103 = vmatprep.subr.bf16.mxu0 %v3858_v14  ;;  %v609_v26 = vmul.f32 %v3920_v5, %v4934_v17  ;;  %v3876_v17 = vld [vmem:[%s4853_s30 + $0x104] ss:$40 sps:$4 sm:$0xff]  }
 0x135   : > { %v3924_v21 = vpop.eup %3923  ;;  %v612_v24 = vmul.f32 %v3922_v11, %v554_v20  ;;  %1029 = vmatpush1.bf16.msra.mxu1 %v3862_v16  ;;  %v3871_v20 = vld [vmem:[%s4853_s30 + $0xb0] ss:$40 sps:$4 sm:$0xff]  }
 0x136   : > { %v610_v27 = vmul.f32 %v3924_v21, %v4938_v23  ;;  %1030 = vmatprep.subr.bf16.mxu1 %v3867_v3  ;;  %v3868_v23 = vld [vmem:[%s4853_s30 + $0x108] ss:$40 sps:$4 sm:$0xff]  }
 0x137   : > { %v4961_v28 = vpack.c.bf16 %v612_v24, %v611_v22  ;;  %1104 = vmatpush1.bf16.msra.mxu0 %v3856_v8 }
 0x138   : > { %v4963_v29 = vpack.c.bf16 %v610_v27, %v609_v26  ;;  %1105 = vmatprep.subr.bf16.mxu0 %v3861_v19 }
 0x139   : > { %1031 = vmatpush1.bf16.msra.mxu1 %v3865_v25 }
 0x13a   : > { %3516 = vmatmul.mubr.msk.bf16.gmra.mrb[12].mxu1 %vm869_vm1, %v4941_v10  ;;  %3520 = vmatmul.mubr.msk.bf16.gmra.mrb[4].mxu0 %vm869_vm1, %v4941_v10 }
 0x13b   : > { %934 = vmatprep.mubr.bf16.mxu1 %v6618_v62  ;;  %1007 = vmatprep.mubr.bf16.mxu0 %v6618_v62 }
 0x13c   : > { %1106 = vmatpush1.bf16.msra.mxu0 %v3859_v30  ;;  %1032 = vmatprep.subr.bf16.mxu1 %v3873_v31 }
 0x13d   : > { %1107 = vmatprep.subr.bf16.mxu0 %v3870_v15  ;;  %1033 = vmatpush1.bf16.msra.mxu1 %v3871_v20 }
 0x13e   : > { %1034 = vmatprep.subr.bf16.mxu1 %v3876_v17 }
 0x140   : > { %1108 = vmatpush1.bf16.msra.mxu0 %v3868_v23 }
 0x141   : > { %1035 = vmatpush1.bf16.msra.mxu1 %v3874_v32  ;;  %3766 = vmatprep.subr.bf16.mxu0 %v4825_v40 }
 0x142   : > { %3517 = vmatmul.mubr.msk.bf16.gmra.mrb[16].mxu1 %vm869_vm1, %v4963_v29  ;;  %3521 = vmatmul.mubr.msk.bf16.gmra.mrb[8].mxu0 %vm869_vm1, %v4963_v29 }
 0x143   : > { %944 = vmatprep.mubr.bf16.mxu1 %v6618_v62  ;;  %1017 = vmatprep.mubr.bf16.mxu0 %v6618_v62 }
 0x144   : > { %1174 = vmatprep.subr.bf16.mxu1 %v3879_v33 }
 0x14a   : > { %3518 = vmatmul.mubr.msk.bf16.gmra.mrb[20].mxu1 %vm869_vm1, %v4961_v28  ;;  %3522 = vmatmul.mubr.msk.bf16.gmra.mrb[12].mxu0 %vm869_vm1, %v4961_v28 }
 0x14b   : > { %1060 = vmatprep.mubr.bf16.mxu1 %v6618_v62  ;;  %1133 = vmatprep.mubr.bf16.mxu0 %v6618_v62 }
 0x152   : > { %3523 = vmatmul.mubr.msk.bf16.vlgmr.msra.gmra.mrb[24].mxu1 %vm869_vm1, %v4944_v13  ;;  %3527 = vmatmul.mubr.msk.bf16.vlgmr.msra.gmra.mrb[16].mxu0 %vm869_vm1, %v4944_v13 }
 0x153   : > { %3767 = vmatpush3.bf16.msra.mxu0 %v4825_v40  ;;  %1070 = vmatprep.mubr.bf16.mxu1 %v6618_v62  ;;  %v3888_v40 = vld [vmem:[%s4853_s30 + $0x114] ss:$40 sps:$4 sm:$0xff]  }
 0x154   : > { %1143 = vmatprep.mubr.bf16.mxu0 %v6618_v62  ;;  %3768 = vmatprep.subr.bf16.mxu0 %v4830_v41 }
 0x155   : > { %1175 = vmatpush1.bf16.msra.mxu1 %v3877_v34 }
 0x156   : > { %1176 = vmatprep.subr.bf16.mxu1 %v3882_v35 }
 0x157   : > { %3769 = vmatpush3.bf16.msra.mxu0 %v4830_v41  ;;  %v3889_v41 = vld [vmem:[%s6611_s0 + $0x20] sm:$0xff]  }
 0x158   : > { %2202 = vmatprep.subr.bf16.mxu0 %v4863_v48  ;;  %v3890_v48 = vld [vmem:[%s6611_s0 + $0x28] sm:$0xff]  }
 0x159   : > { %1177 = vmatpush1.bf16.msra.mxu1 %v3880_v36 }
 0x15a   : > { %3524 = vmatmul.mubr.msk.bf16.gmra.mrb[28].mxu1 %vm869_vm1, %v4941_v10  ;;  %3528 = vmatmul.mubr.msk.bf16.gmra.mrb[20].mxu0 %vm869_vm1, %v4941_v10 }
 0x15b   : > { %1080 = vmatprep.mubr.bf16.mxu1 %v6618_v62  ;;  %1153 = vmatprep.mubr.bf16.mxu0 %v6618_v62 }
 0x15c   : > { %1178 = vmatprep.subr.bf16.mxu1 %v3885_v37 }
 0x15d   : > { %1179 = vmatpush1.bf16.msra.mxu1 %v3883_v38 }
 0x15e   : > { %1180 = vmatprep.subr.bf16.mxu1 %v3888_v40 }
 0x161   : > { %1181 = vmatpush1.bf16.msra.mxu1 %v3886_v39 }
 0x162   : > { %3525 = vmatmul.mubr.msk.bf16.gmra.mrb[32].mxu1 %vm869_vm1, %v4963_v29  ;;  %3529 = vmatmul.mubr.msk.bf16.gmra.mrb[24].mxu0 %vm869_vm1, %v4963_v29 }
 0x163   : > { %1090 = vmatprep.mubr.bf16.mxu1 %v6618_v62  ;;  %1163 = vmatprep.mubr.bf16.mxu0 %v6618_v62 }
 0x164   : > { %2275 = vmatprep.subr.bf16.mxu1 %v4856_v46  ;;  %v3891_v46 = vld [vmem:[%s6611_s0 + $0x30] sm:$0xff]  }
 0x16a   : > { %3526 = vmatmul.mubr.msk.bf16.gmra.mrb[36].mxu1 %vm869_vm1, %v4961_v28  ;;  %3530 = vmatmul.mubr.msk.bf16.gmra.mrb[28].mxu0 %vm869_vm1, %v4961_v28 }
 0x16b   : > { %1206 = vmatprep.mubr.bf16.mxu1 %v6618_v62  ;;  %3770 = vmatprep.mubr.msk.bf16.mxu0 %vm479_vm0, %v3889_v41 }
 0x172   : > { %3531 = vmatmul.mubr.msk.bf16.vlgmr.msra.gmra.mrb[40].mxu1 %vm869_vm1, %v4944_v13  ;;  %3771 = vmatmul.mubr.msk.bf16.vlgmr.msra.gmra.mrb[32].mxu0 %vm479_vm0, %v3890_v48 }
 0x173   : > { %1216 = vmatprep.mubr.bf16.mxu1 %v6618_v62  ;;  %3774 = vmatprep.mubr.msk.bf16.mxu0 %vm479_vm0, %v3891_v46 }
 0x174   : > { %2203 = vmatpush1.bf16.msra.mxu0 %v4859_v47  ;;  %2276 = vmatpush1.bf16.msra.mxu1 %v4866_v49  ;;  %v6617_v47 = vlaneseq }
 0x175   : > { %2204 = vmatprep.subr.bf16.mxu0 %v4874_v51  ;;  %2277 = vmatprep.subr.bf16.mxu1 %v4871_v50 }
 0x176   : > { %v5076_v49 = vshrl.u32 %v6617_v47, 7 }
 0x178   : > { %2205 = vmatpush1.bf16.msra.mxu0 %v4878_v52  ;;  %2278 = vmatpush1.bf16.msra.mxu1 %v4881_v53  ;;  %v6621_v50 = vsub.s32 0, %v5076_v49  ;;  %v629_v51 = vsub.s32 2, %v5076_v49  ;;  %v5087_v52 = vld [vmem:[%s5082_s24] sm:$0xff]  ;;  %v6620_v53 = vsub.s32 1, %v5076_v49 }
 0x179   : > { %2206 = vmatprep.subr.bf16.mxu0 %v4890_v55  ;;  %2279 = vmatprep.subr.bf16.mxu1 %v4887_v54  ;;  %v633_v54 = vsub.s32 3, %v5076_v49 }
 0x17a   : > { %3532 = vmatmul.mubr.msk.bf16.gmra.mrb[44].mxu1 %vm869_vm1, %v4941_v10  ;;  %3775 = vmatmul.mubr.msk.bf16.gmra.mrb[36].mxu0 %vm479_vm0, %v3892_v42  ;;  %v5094_v55 = vrot.slane %v5087_v52, %v6621_v50 }
 0x17b   : > { %1226 = vmatprep.mubr.bf16.mxu1 %v6618_v62  ;;  %2234 = vmatprep.mubr.bf16.mxu0 %v6618_v62 }
 0x17c   : > { %2207 = vmatpush1.bf16.msra.mxu0 %v4894_v56  ;;  %2280 = vmatpush1.bf16.msra.mxu1 %v4897_v57  ;;  %6645 = vst [vmem:[#allocation4_spill] sm:$0xff] %v5094_v55  ;;  %v5097_v56 = vrot.slane %v5087_v52, %v629_v51  ;;  %v5102_v57 = vrot.slane %v5087_v52, %v6620_v53 }
 0x17d   : > { %2208 = vmatprep.subr.bf16.mxu0 %v4906_v59  ;;  %2281 = vmatprep.subr.bf16.mxu1 %v4903_v58  ;;  %v5105_v58 = vrot.slane %v5087_v52, %v633_v54 }
 0x17e   : > { %6646 = vst [vmem:[#allocation5_spill] sm:$0xff] %v5097_v56  ;;  %6647 = vst [vmem:[#allocation6_spill] sm:$0xff] %v5102_v57 }
 0x17f   : > { %6648 = vst [vmem:[#allocation7_spill] sm:$0xff] %v5105_v58 }
 0x180   : > { %2209 = vmatpush1.bf16.msra.mxu0 %v4910_v60  ;;  %2282 = vmatpush1.bf16.msra.mxu1 %v4913_v61 }
 0x181   : > { %2348 = vmatprep.subr.bf16.mxu0 %v4926_v0  ;;  %2421 = vmatprep.subr.bf16.mxu1 %v4922_v63 }
 0x182   : > { %3533 = vmatmul.mubr.msk.bf16.gmra.mrb[48].mxu1 %vm869_vm1, %v4963_v29 }
 0x183   : > { %1236 = vmatprep.mubr.bf16.mxu1 %v6618_v62 }
 0x18a   : > { %3534 = vmatmul.mubr.msk.bf16.gmra.mrb[52].mxu1 %vm869_vm1, %v4961_v28 }
 0x18b   : > { %2307 = vmatprep.mubr.bf16.mxu1 %v6618_v62 }
 0x205   : > { %v916_v59 = vpop.f32.mrb[8].mxu1  ;;  %v989_v60 = vpop.f32.mrb[0].mxu0 }
 0x206   : > { %v5108_v61 = vadd.f32 %v916_v59, %v5094_v55  ;;  %v5111_v63 = vadd.f32 %v989_v60, %v5097_v56  ;;  %v918_v0 = vpop.f32.mrb[9].mxu1  ;;  %v991_v43 = vpop.f32.mrb[1].mxu0 }
 0x207   : > { %v5114_v44 = vadd.f32 %v918_v0, %v5102_v57  ;;  %v5117_v45 = vadd.f32 %v991_v43, %v5105_v58  ;;  %v920_v1 = vpop.f32.mrb[10].mxu1  ;;  %v993_v2 = vpop.f32.mrb[2].mxu0 }
 0x208   : > { %v3535_v4 = vmul.f32 -1.442695, %v5108_v61  ;;  %v3537_v6 = vmul.f32 -1.442695, %v5111_v63  ;;  %v5122_v7 = vadd.f32 %v920_v1, %v5094_v55  ;;  %v5125_v9 = vadd.f32 %v993_v2, %v5097_v56  ;;  %v922_v10 = vpop.f32.mrb[11].mxu1  ;;  %v995_v12 = vpop.f32.mrb[3].mxu0 }
 0x209   : > { %v3536_v13 = vmul.f32 -1.442695, %v5114_v44  ;;  %v3538_v14 = vmul.f32 -1.442695, %v5117_v45  ;;  %v5130_v16 = vadd.f32 %v922_v10, %v5102_v57  ;;  %v5133_v18 = vadd.f32 %v995_v12, %v5105_v58 }
 0x20a   : > { %3925 = vpow2.f32 %v3535_v4  ;;  %v3545_v3 = vmul.f32 -1.442695, %v5122_v7  ;;  %v3547_v5 = vmul.f32 -1.442695, %v5125_v9 }
 0x20b   : > { %3927 = vpow2.f32 %v3537_v6  ;;  %v3546_v8 = vmul.f32 -1.442695, %v5130_v16  ;;  %v3548_v11 = vmul.f32 -1.442695, %v5133_v18 }
 0x20c   : > { %3929 = vpow2.f32 %v3536_v13 }
 0x20d   : > { %3931 = vpow2.f32 %v3538_v14  ;;  %v926_v19 = vpop.f32.mrb[12].mxu1  ;;  %v999_v21 = vpop.f32.mrb[4].mxu0 }
 0x20e   : > { %3933 = vpow2.f32 %v3545_v3  ;;  %v5140_v22 = vadd.f32 %v926_v19, %v5094_v55  ;;  %v5143_v24 = vadd.f32 %v999_v21, %v5097_v56  ;;  %v928_v25 = vpop.f32.mrb[13].mxu1  ;;  %v1001_v26 = vpop.f32.mrb[5].mxu0 }
 0x20f   : > { %3935 = vpow2.f32 %v3547_v5  ;;  %v5146_v27 = vadd.f32 %v928_v25, %v5102_v57  ;;  %v5149_v28 = vadd.f32 %v1001_v26, %v5105_v58  ;;  %v930_v29 = vpop.f32.mrb[14].mxu1  ;;  %v1003_v30 = vpop.f32.mrb[6].mxu0 }
 0x210   : > { %3937 = vpow2.f32 %v3546_v8  ;;  %v3555_v31 = vmul.f32 -1.442695, %v5140_v22  ;;  %v3557_v15 = vmul.f32 -1.442695, %v5143_v24  ;;  %v5154_v20 = vadd.f32 %v930_v29, %v5094_v55  ;;  %v932_v17 = vpop.f32.mrb[15].mxu1  ;;  %v1005_v23 = vpop.f32.mrb[7].mxu0 }
 0x211   : > { %3939 = vpow2.f32 %v3548_v11  ;;  %v3556_v32 = vmul.f32 -1.442695, %v5146_v27  ;;  %v3558_v33 = vmul.f32 -1.442695, %v5149_v28  ;;  %v5160_v4 = vadd.f32 %v1003_v30, %v5097_v56 }
 0x212   : > { %3941 = vpow2.f32 %v3555_v31  ;;  %v3565_v34 = vmul.f32 -1.442695, %v5154_v20  ;;  %v5163_v13 = vadd.f32 %v932_v17, %v5102_v57  ;;  %v5167_v25 = vadd.f32 %v1005_v23, %v5105_v58 }
 0x213   : > { %3943 = vpow2.f32 %v3557_v15  ;;  %v3567_v21 = vmul.f32 -1.442695, %v5160_v4 }
 0x214   : > { %v3926_v35 = vpop.eup %3925  ;;  %3945 = vpow2.f32 %v3556_v32  ;;  %v3566_v31 = vmul.f32 -1.442695, %v5163_v13 }
 0x215   : > { %v3928_v36 = vpop.eup %3927  ;;  %v1487_v37 = vadd.f32 1.0, %v3926_v35  ;;  %3947 = vpow2.f32 %v3558_v33  ;;  %v936_v38 = vpop.f32.mrb[16].mxu1 }
 0x216   : > { %v1009_v40 = vpop.f32.mrb[8].mxu0  ;;  %v3930_v39 = vpop.eup %3929  ;;  %v1489_v41 = vadd.f32 1.0, %v3928_v36  ;;  %3949 = vpow2.f32 %v3565_v34  ;;  %v5171_v15 = vadd.f32 %v936_v38, %v5094_v55 }
 0x217   : > { %v938_v48 = vpop.f32.mrb[17].mxu1  ;;  %v1011_v46 = vpop.f32.mrb[9].mxu0  ;;  %3951 = vrcp.f32 %v1487_v37  ;;  %v1488_v51 = vadd.f32 1.0, %v3930_v39  ;;  %v5176_v35 = vadd.f32 %v1009_v40, %v5097_v56 }
 0x218   : > { %v3932_v42 = vpop.eup %3931  ;;  %v940_v54 = vpop.f32.mrb[18].mxu1  ;;  %3953 = vrcp.f32 %v1489_v41  ;;  %v5179_v23 = vadd.f32 %v938_v48, %v5102_v57  ;;  %v5186_v41 = vadd.f32 %v1011_v46, %v5105_v58 }
 0x219   : > { %v1013_v59 = vpop.f32.mrb[10].mxu0  ;;  %v3934_v60 = vpop.eup %3933  ;;  %v1490_v0 = vadd.f32 1.0, %v3932_v42  ;;  %3955 = vrcp.f32 %v1488_v51  ;;  %v5189_v42 = vadd.f32 %v940_v54, %v5094_v55  ;;  %v3568_v54 = vmul.f32 -1.442695, %v5167_v25 }
 0x21a   : > { %v942_v43 = vpop.f32.mrb[19].mxu1  ;;  %v3936_v1 = vpop.eup %3935  ;;  %v1497_v2 = vadd.f32 1.0, %v3934_v60 }
 0x21b   : > { %v1015_v6 = vpop.f32.mrb[11].mxu0  ;;  %v3938_v10 = vpop.eup %3937  ;;  %3957 = vrcp.f32 %v1490_v0  ;;  %v1499_v12 = vadd.f32 1.0, %v3936_v1  ;;  %v5196_v0 = vadd.f32 %v1013_v59, %v5097_v56  ;;  %v5199_v1 = vadd.f32 %v942_v43, %v5102_v57 }
 0x21c   : > { %v3940_v14 = vpop.eup %3939  ;;  %3959 = vrcp.f32 %v1497_v2  ;;  %v1498_v3 = vadd.f32 1.0, %v3938_v10  ;;  %v3576_v59 = vmul.f32 -1.442695, %v5179_v23  ;;  %v3585_v43 = vmul.f32 -1.442695, %v5189_v42 }
 0x21d   : > { %v3942_v5 = vpop.eup %3941  ;;  %3961 = vrcp.f32 %v1499_v12  ;;  %v1500_v8 = vadd.f32 1.0, %v3940_v14  ;;  %v946_v26 = vpop.f32.mrb[20].mxu1  ;;  %6649 = vst [vmem:[#allocation8_spill] sm:$0xff] %v5196_v0  ;;  %6650 = vst [vmem:[#allocation9_spill] sm:$0xff] %v5199_v1  ;;  %v3575_v12 = vmul.f32 -1.442695, %v5171_v15 }
 0x21e   : > { %v3944_v11 = vpop.eup %3943  ;;  %3963 = vrcp.f32 %v1498_v3  ;;  %v1507_v19 = vadd.f32 1.0, %v3942_v5  ;;  %v1019_v17 = vpop.f32.mrb[12].mxu0  ;;  %v3577_v14 = vmul.f32 -1.442695, %v5176_v35  ;;  %v3578_v5 = vmul.f32 -1.442695, %v5186_v41 }
 0x21f   : > { %v3946_v29 = vpop.eup %3945  ;;  %3965 = vrcp.f32 %v1500_v8  ;;  %v1509_v30 = vadd.f32 1.0, %v3944_v11  ;;  %v5173_v32 = vpop.f32.mrb[21].mxu1  ;;  %v3587_v11 = vmul.f32 -1.442695, %v5196_v0  ;;  %v5230_v53 = vadd.f32 %v1019_v17, %v5097_v56 }
 0x220   : > { %v3948_v33 = vpop.eup %3947  ;;  %3967 = vrcp.f32 %v1507_v19  ;;  %v1508_v34 = vadd.f32 1.0, %v3946_v29  ;;  %v5181_v36 = vpop.f32.mrb[13].mxu0  ;;  %v3586_v19 = vmul.f32 -1.442695, %v5199_v1  ;;  %v5212_v29 = vadd.f32 %v1015_v6, %v5105_v58 }
 0x221   : > { %v5183_v37 = vpop.f32.mrb[22].mxu1  ;;  %v3950_v39 = vpop.eup %3949  ;;  %3969 = vrcp.f32 %v1509_v30  ;;  %v1510_v38 = vadd.f32 1.0, %v3948_v33 }
 0x222   : > { %v5191_v51 = vpop.f32.mrb[14].mxu0  ;;  %v5193_v40 = vpop.f32.mrb[23].mxu1  ;;  %3971 = vrcp.f32 %v1508_v34  ;;  %v1517_v48 = vadd.f32 1.0, %v3950_v39 }
 0x223   : > { %v3952_v60 = vpop.eup %3951  ;;  %v5201_v2 = vpop.f32.mrb[15].mxu0  ;;  %3973 = vrcp.f32 %v1510_v38  ;;  %v5221_v38 = vadd.f32 %v946_v26, %v5094_v55 }
 0x224   : > { %v3954_v46 = vpop.eup %3953  ;;  %3975 = vrcp.f32 %v1517_v48  ;;  %v1727_v34 = vmul.f32 %v3952_v60, %v5108_v61 }
 0x225   : > { %v3956_v10 = vpop.eup %3955  ;;  %3977 = vpow2.f32 %v3567_v21  ;;  %v5214_v30 = vpop.f32.mrb[24].mxu1  ;;  %v1729_v6 = vmul.f32 %v3954_v46, %v5111_v63 }
 0x226   : > { %v3958_v3 = vpop.eup %3957  ;;  %3979 = vpow2.f32 %v3566_v31  ;;  %v5216_v33 = vpop.f32.mrb[16].mxu0  ;;  %v1728_v26 = vmul.f32 %v3956_v10, %v5114_v44  ;;  %v3588_v44 = vmul.f32 -1.442695, %v5212_v29 }
 0x227   : > { %v3960_v8 = vpop.eup %3959  ;;  %3981 = vpow2.f32 %v3568_v54  ;;  %v5223_v31 = vpop.f32.mrb[25].mxu1  ;;  %v1730_v46 = vmul.f32 %v3958_v3, %v5117_v45 }
 0x228   : > { %v3962_v21 = vpop.eup %3961  ;;  %v1737_v39 = vmul.f32 %v3960_v8, %v5122_v7  ;;  %v5225_v48 = vpop.f32.mrb[17].mxu0  ;;  %3983 = vpow2.f32 %v3575_v12 }
 0x229   : > { %v3964_v47 = vpop.eup %3963  ;;  %v1739_v62 = vmul.f32 %v3962_v21, %v5125_v9  ;;  %v5232_v61 = vpop.f32.mrb[26].mxu1  ;;  %3985 = vpow2.f32 %v3577_v14  ;;  %v3595_v14 = vmul.f32 -1.442695, %v5221_v38 }
 0x22a   : > { %v5234_v7 = vpop.f32.mrb[18].mxu0  ;;  %v3966_v60 = vpop.eup %3965  ;;  %v1810_v54 = vadd.f32 %v1737_v39, %v1727_v34  ;;  %v1738_v8 = vmul.f32 %v3964_v47, %v5130_v16  ;;  %3987 = vpow2.f32 %v3576_v59 }
 0x22b   : > { %v5238_v50 = vpop.f32.mrb[27].mxu1  ;;  %v5240_v63 = vpop.f32.mrb[19].mxu0  ;;  %v1836_v17 = vadd.f32 %v1739_v62, %v1729_v6  ;;  %v1740_v12 = vmul.f32 %v3966_v60, %v5133_v18  ;;  %3989 = vpow2.f32 %v3578_v5  ;;  %v3597_v18 = vmul.f32 -1.442695, %v5230_v53 }
 0x22c   : > { %v3968_v9 = vpop.eup %3967  ;;  %v1823_v1 = vadd.f32 %v1738_v8, %v1728_v26  ;;  %3991 = vpow2.f32 %v3585_v43 }
 0x22d   : > { %v3970_v21 = vpop.eup %3969  ;;  %v1747_v0 = vmul.f32 %v3968_v9, %v5140_v22  ;;  %v1849_v16 = vadd.f32 %v1740_v12, %v1730_v46  ;;  %3993 = vpow2.f32 %v3587_v11  ;;  %v5253_v5 = vpop.f32.mrb[28].mxu1  ;;  %v641_v46 = vsub.s32 5, %v5076_v49 }
 0x22e   : > { %v3972_v47 = vpop.eup %3971  ;;  %v1749_v10 = vmul.f32 %v3970_v21, %v5143_v24  ;;  %3995 = vpow2.f32 %v3586_v19  ;;  %v5255_v39 = vpop.f32.mrb[20].mxu0  ;;  %v645_v19 = vsub.s32 6, %v5076_v49 }
 0x22f   : > { %v3974_v34 = vpop.eup %3973  ;;  %v1811_v45 = vadd.f32 %v1810_v54, %v1747_v0  ;;  %v1748_v62 = vmul.f32 %v3972_v47, %v5146_v27  ;;  %3997 = vpow2.f32 %v3588_v44  ;;  %v637_v27 = vsub.s32 4, %v5076_v49  ;;  %v5261_v11 = vpop.f32.mrb[29].mxu1 }
 0x230   : > { %v3976_v3 = vpop.eup %3975  ;;  %v5250_v59 = vadd.f32 %v1836_v17, %v1749_v10  ;;  %v1750_v22 = vmul.f32 %v3974_v34, %v5149_v28  ;;  %v5263_v6 = vpop.f32.mrb[21].mxu0  ;;  %3999 = vpow2.f32 %v3595_v14  ;;  %v649_v47 = vsub.s32 7, %v5076_v49 }
 0x231   : > { %v3978_v24 = vpop.eup %3977  ;;  %v5257_v43 = vadd.f32 %v1823_v1, %v1748_v62  ;;  %v1757_v0 = vmul.f32 %v3976_v3, %v5154_v20  ;;  %v5268_v54 = vpop.f32.mrb[30].mxu1  ;;  %4001 = vpow2.f32 %v3597_v18  ;;  %v5282_v14 = vadd.f32 %v5173_v32, %v5102_v57 }
 0x232   : > { %v3980_v60 = vpop.eup %3979  ;;  %v5265_v26 = vadd.f32 %v1849_v16, %v1750_v22  ;;  %v1519_v28 = vadd.f32 1.0, %v3978_v24  ;;  %v5270_v1 = vpop.f32.mrb[22].mxu0  ;;  %v5285_v62 = vrot.slane %v5087_v52, %v637_v27  ;;  %v5288_v22 = vrot.slane %v5087_v52, %v645_v19 }
 0x233   : > { %v3982_v8 = vpop.eup %3981  ;;  %v5272_v20 = vadd.f32 %v1811_v45, %v1757_v0  ;;  %v1518_v9 = vadd.f32 1.0, %v3980_v60  ;;  %v5275_v17 = vpop.f32.mrb[31].mxu1  ;;  %v5291_v24 = vrot.slane %v5087_v52, %v641_v46  ;;  %v5294_v32 = vrot.slane %v5087_v52, %v649_v47 }
 0x234   : > { %v5277_v12 = vpop.f32.mrb[23].mxu0  ;;  %v3984_v21 = vpop.eup %3983  ;;  %4003 = vrcp.f32 %v1519_v28  ;;  %v1520_v44 = vadd.f32 1.0, %v3982_v8  ;;  %v5303_v19 = vadd.f32 %v5181_v36, %v5105_v58  ;;  %v5311_v47 = vadd.f32 %v5183_v37, %v5094_v55 }
 0x235   : > { %v3986_v16 = vpop.eup %3985  ;;  %4005 = vrcp.f32 %v1518_v9  ;;  %v1527_v10 = vadd.f32 1.0, %v3984_v21  ;;  %6651 = vst [vmem:[#allocation10_spill] sm:$0xff] %v5291_v24  ;;  %6652 = vst [vmem:[#allocation11_spill] sm:$0xff] %v5294_v32  ;;  %v5296_v28 = vpop.f32.mrb[32].mxu1  ;;  %v3596_v21 = vmul.f32 -1.442695, %v5282_v14 }
 0x236   : > { %v3988_v34 = vpop.eup %3987  ;;  %4007 = vrcp.f32 %v1520_v44  ;;  %v1529_v45 = vadd.f32 1.0, %v3986_v16  ;;  %v5298_v8 = vpop.f32.mrb[24].mxu0 }
 0x237   : > { %v3990_v18 = vpop.eup %3989  ;;  %4009 = vrcp.f32 %v1527_v10  ;;  %v1528_v3 = vadd.f32 1.0, %v3988_v34  ;;  %v5305_v46 = vpop.f32.mrb[33].mxu1  ;;  %v5315_v10 = vadd.f32 %v5191_v51, %v5097_v56  ;;  %v5335_v56 = vadd.f32 %v5214_v30, %v5285_v62 }
 0x238   : > { %v3992_v0 = vpop.eup %3991  ;;  %4011 = vrcp.f32 %v1529_v45  ;;  %v1530_v60 = vadd.f32 1.0, %v3990_v18  ;;  %v5307_v44 = vpop.f32.mrb[25].mxu0 }
 0x239   : > { %v3994_v27 = vpop.eup %3993  ;;  %4013 = vrcp.f32 %v1528_v3  ;;  %v1537_v9 = vadd.f32 1.0, %v3992_v0  ;;  %6653 = vst [vmem:[#allocation12_spill] sm:$0xff] %v5307_v44  ;;  %v5317_v34 = vpop.f32.mrb[34].mxu1  ;;  %v5323_v3 = vadd.f32 %v5193_v40, %v5102_v57  ;;  %v5327_v0 = vadd.f32 %v5201_v2, %v5105_v58 }
 0x23a   : > { %v3996_v16 = vpop.eup %3995  ;;  %4015 = vrcp.f32 %v1530_v60  ;;  %v1539_v52 = vadd.f32 1.0, %v3994_v27  ;;  %6654 = vst [vmem:[#allocation13_spill] sm:$0xff] %v5317_v34  ;;  %v5319_v45 = vpop.f32.mrb[26].mxu0  ;;  %v3598_v2 = vmul.f32 -1.442695, %v5303_v19  ;;  %v5344_v58 = vadd.f32 %v5223_v31, %v5291_v24 }
 0x23b   : > { %6655 = vst [vmem:[#allocation14_spill] sm:$0xff] %v5319_v45  ;;  %v3998_v36 = vpop.eup %3997  ;;  %4017 = vrcp.f32 %v1537_v9  ;;  %v1538_v18 = vadd.f32 1.0, %v3996_v16  ;;  %v5329_v37 = vpop.f32.mrb[35].mxu1  ;;  %v5339_v9 = vadd.f32 %v5216_v33, %v5288_v22  ;;  %v3607_v30 = vmul.f32 -1.442695, %v5315_v10 }
 0x23c   : > { %6656 = vst [vmem:[#allocation15_spill] sm:$0xff] %v5329_v37  ;;  %v5331_v60 = vpop.f32.mrb[27].mxu0  ;;  %v4000_v51 = vpop.eup %3999  ;;  %4019 = vrcp.f32 %v1539_v52  ;;  %v1540_v27 = vadd.f32 1.0, %v3998_v36  ;;  %v3605_v36 = vmul.f32 -1.442695, %v5311_v47 }
 0x23d   : > { %6657 = vst [vmem:[#allocation16_spill] sm:$0xff] %v5331_v60  ;;  %6658 = vst [vmem:[#allocation17_spill] sm:$0xff] %v5339_v9  ;;  %v4002_v40 = vpop.eup %4001  ;;  %4021 = vrcp.f32 %v1538_v18  ;;  %v1547_v16 = vadd.f32 1.0, %v4000_v51  ;;  %v3606_v18 = vmul.f32 -1.442695, %v5323_v3  ;;  %v5356_v45 = vpop.f32.mrb[28].mxu0 }
 0x23e   : > { %v4004_v57 = vpop.eup %4003  ;;  %4023 = vrcp.f32 %v1540_v27  ;;  %v1549_v52 = vadd.f32 1.0, %v4002_v40  ;;  %v3608_v51 = vmul.f32 -1.442695, %v5327_v0  ;;  %v3539_v31 = vmul.f32 -1.442695, %v5335_v56  ;;  %v5354_v40 = vpop.f32.mrb[36].mxu1 }
 0x23f   : > { %v4006_v55 = vpop.eup %4005  ;;  %v1759_v33 = vmul.f32 %v4004_v57, %v5160_v4  ;;  %4025 = vrcp.f32 %v1547_v16  ;;  %v3541_v27 = vmul.f32 -1.442695, %v5339_v9  ;;  %6659 = vst [vmem:[#allocation18_spill] sm:$0xff] %v5356_v45  ;;  %v3540_v16 = vmul.f32 -1.442695, %v5344_v58  ;;  %v5361_v44 = vpop.f32.mrb[37].mxu1 }
 0x240   : > { %v4008_v60 = vpop.eup %4007  ;;  %v1758_v37 = vmul.f32 %v4006_v55, %v5163_v13  ;;  %4027 = vrcp.f32 %v1549_v52  ;;  %v5363_v55 = vpop.f32.mrb[29].mxu0  ;;  %v5369_v45 = vadd.f32 %v5225_v48, %v5294_v32 }
 0x241   : > { %v4010_v34 = vpop.eup %4009  ;;  %v1838_v57 = vadd.f32 %v5250_v59, %v1759_v33  ;;  %v1760_v4 = vmul.f32 %v4008_v60, %v5167_v25  ;;  %4029 = vpow2.f32 %v3596_v21  ;;  %v5371_v59 = vpop.f32.mrb[38].mxu1 }
 0x242   : > { %v4012_v13 = vpop.eup %4011  ;;  %v1825_v52 = vadd.f32 %v5257_v43, %v1758_v37  ;;  %v1767_v9 = vmul.f32 %v4010_v34, %v5171_v15  ;;  %4031 = vpow2.f32 %v3598_v2  ;;  %v5373_v25 = vpop.f32.mrb[30].mxu0  ;;  %v5379_v43 = vadd.f32 %v5232_v61, %v5285_v62 }
 0x243   : > { %v4014_v21 = vpop.eup %4013  ;;  %v1851_v60 = vadd.f32 %v5265_v26, %v1760_v4  ;;  %v1769_v33 = vmul.f32 %v4012_v13, %v5176_v35  ;;  %4033 = vpow2.f32 %v3605_v36  ;;  %v5381_v15 = vpop.f32.mrb[39].mxu1  ;;  %v5389_v26 = vadd.f32 %v5234_v7, %v5288_v22  ;;  %v6661_v7 = vld [vmem:[#allocation8_spill] sm:$0xff] }
 0x244   : > { %v5383_v34 = vpop.f32.mrb[31].mxu0  ;;  %v4016_v48 = vpop.eup %4015  ;;  %v1813_v37 = vadd.f32 %v5272_v20, %v1767_v9  ;;  %v1768_v2 = vmul.f32 %v4014_v21, %v5179_v23  ;;  %4035 = vpow2.f32 %v3607_v30  ;;  %v5394_v61 = vadd.f32 %v5238_v50, %v5291_v24 }
 0x245   : > { %6660 = vst [vmem:[#allocation19_spill] sm:$0xff] %v5383_v34  ;;  %v4018_v35 = vpop.eup %4017  ;;  %v1839_v36 = vadd.f32 %v1838_v57, %v1769_v33  ;;  %v1770_v4 = vmul.f32 %v4016_v48, %v5186_v41  ;;  %4037 = vpow2.f32 %v3606_v18  ;;  %v3542_v23 = vmul.f32 -1.442695, %v5369_v45  ;;  %v6662_v33 = vld [vmem:[#allocation9_spill] sm:$0xff] }
 0x246   : > { %v4020_v13 = vpop.eup %4019  ;;  %v1826_v34 = vadd.f32 %v1825_v52, %v1768_v2  ;;  %v1777_v20 = vmul.f32 %v4018_v35, %v5189_v42  ;;  %4039 = vpow2.f32 %v3608_v51  ;;  %v3549_v57 = vmul.f32 -1.442695, %v5379_v43  ;;  %v5402_v52 = vpop.f32.mrb[40].mxu1 }
 0x247   : > { %v4022_v9 = vpop.eup %4021  ;;  %v1852_v30 = vadd.f32 %v1851_v60, %v1770_v4  ;;  %v1779_v21 = vmul.f32 %v4020_v13, %v6661_v7  ;;  %4041 = vpow2.f32 %v3539_v31  ;;  %v3551_v50 = vmul.f32 -1.442695, %v5389_v26  ;;  %v5404_v42 = vpop.f32.mrb[32].mxu0 }
 0x248   : > { %v4024_v41 = vpop.eup %4023  ;;  %v1814_v18 = vadd.f32 %v1813_v37, %v1777_v20  ;;  %v1778_v48 = vmul.f32 %v4022_v9, %v6662_v33  ;;  %4043 = vpow2.f32 %v3541_v27  ;;  %v3550_v31 = vmul.f32 -1.442695, %v5394_v61  ;;  %v5408_v35 = vpop.f32.mrb[41].mxu1 }
 0x249   : > { %v4026_v51 = vpop.eup %4025  ;;  %v1840_v2 = vadd.f32 %v1839_v36, %v1779_v21  ;;  %v1780_v60 = vmul.f32 %v4024_v41, %v5212_v29  ;;  %4045 = vpow2.f32 %v3540_v16  ;;  %v5410_v4 = vpop.f32.mrb[33].mxu0  ;;  %v4661_v20 = vmov 1966171168  }
 0x24a   : > { %v4028_v37 = vpop.eup %4027  ;;  %v5412_v13 = vadd.f32 %v1826_v34, %v1778_v48  ;;  %v1787_v27 = vmul.f32 %v4026_v51, %v5221_v38  ;;  %v1955_v9 = vunpack.c.l.s4 %v4661_v20  ;;  %4047 = vpow2.f32 %v3542_v23  ;;  %v5415_v7 = vpop.f32.mrb[42].mxu1 }
 0x24b   : > { %6663 = vst [vmem:[#allocation8_spill] sm:$0xff] %v5415_v7  ;;  %v5417_v36 = vpop.f32.mrb[34].mxu0  ;;  %v4030_v29 = vpop.eup %4029  ;;  %v5419_v16 = vadd.f32 %v1852_v30, %v1780_v60  ;;  %v1789_v21 = vmul.f32 %v4028_v37, %v5230_v53  ;;  %4049 = vpow2.f32 %v3549_v57  ;;  %v5432_v30 = vadd.f32 %v5240_v63, %v5294_v32 }
 0x24c   : > { %6664 = vst [vmem:[#allocation9_spill] sm:$0xff] %v5417_v36  ;;  %v5422_v41 = vpop.f32.mrb[43].mxu1  ;;  %v5424_v33 = vpop.f32.mrb[35].mxu0  ;;  %v5426_v48 = vadd.f32 %v1814_v18, %v1787_v27  ;;  %v1548_v38 = vadd.f32 1.0, %v4030_v29  ;;  %4051 = vpow2.f32 %v3551_v50  ;;  %v1956_v60 = vunpack.c.0.s8 %v1955_v9 }
 0x24d   : > { %6665 = vst [vmem:[#allocation20_spill] sm:$0xff] %v5422_v41  ;;  %6666 = vst [vmem:[#allocation21_spill] sm:$0xff] %v5424_v33  ;;  %v4032_v34 = vpop.eup %4031  ;;  %v5428_v51 = vadd.f32 %v1840_v2, %v1789_v21  ;;  %4053 = vpow2.f32 %v3550_v31  ;;  %v5436_v37 = vadd.f32 %v5253_v5, %v5285_v62  ;;  %v5438_v29 = vpop.f32.mrb[44].mxu1  ;;  %v5445_v9 = vadd.f32 %v5255_v39, %v5288_v22 }
 0x24e   : > { %v4034_v23 = vpop.eup %4033  ;;  %v1550_v20 = vadd.f32 1.0, %v4032_v34  ;;  %4055 = vrcp.f32 %v1548_v38  ;;  %6667 = vst [vmem:[#allocation22_spill] sm:$0xff] %v5438_v29  ;;  %v5440_v31 = vpop.f32.mrb[36].mxu0  ;;  %v3552_v34 = vmul.f32 -1.442695, %v5432_v30  ;;  %v5459_v39 = vadd.f32 %v5261_v11, %v5291_v24 }
 0x24f   : > { %v4036_v53 = vpop.eup %4035  ;;  %v1557_v57 = vadd.f32 1.0, %v4034_v23  ;;  %6668 = vst [vmem:[#allocation23_spill] sm:$0xff] %v5440_v31  ;;  %v5447_v5 = vpop.f32.mrb[45].mxu1  ;;  %v5450_v23 = vsub.s32 %v1956_v60, %v5076_v49  ;;  %v5467_v31 = vadd.f32 %v5263_v6, %v5294_v32 }
 0x250   : > { %v4038_v18 = vpop.eup %4037  ;;  %4057 = vrcp.f32 %v1550_v20  ;;  %v1559_v50 = vadd.f32 1.0, %v4036_v53  ;;  %6669 = vst [vmem:[#allocation24_spill] sm:$0xff] %v5447_v5  ;;  %v3559_v53 = vmul.f32 -1.442695, %v5436_v37 }
 0x251   : > { %v4040_v27 = vpop.eup %4039  ;;  %4059 = vrcp.f32 %v1557_v57  ;;  %v1558_v2 = vadd.f32 1.0, %v4038_v18  ;;  %6670 = vst [vmem:[#allocation25_spill] sm:$0xff] %v5450_v23  ;;  %v5453_v57 = vpop.f32.mrb[37].mxu0 }
 0x252   : > { %v4042_v63 = vpop.eup %4041  ;;  %4061 = vrcp.f32 %v1559_v50  ;;  %v1560_v21 = vadd.f32 1.0, %v4040_v27  ;;  %6671 = vst [vmem:[#allocation26_spill] sm:$0xff] %v5453_v57  ;;  %v5455_v18 = vpop.f32.mrb[46].mxu1 }
 0x253   : > { %v4044_v38 = vpop.eup %4043  ;;  %4063 = vrcp.f32 %v1558_v2  ;;  %v1491_v20 = vadd.f32 1.0, %v4042_v63  ;;  %6672 = vst [vmem:[#allocation27_spill] sm:$0xff] %v5455_v18  ;;  %v5461_v5 = vpop.f32.mrb[38].mxu0  ;;  %v5471_v18 = vadd.f32 %v5268_v54, %v5285_v62  ;;  %v5482_v54 = vadd.f32 %v5275_v17, %v5291_v24 }
 0x254   : > { %v4046_v50 = vpop.eup %4045  ;;  %4065 = vrcp.f32 %v1560_v21  ;;  %v1493_v27 = vadd.f32 1.0, %v4044_v38  ;;  %6673 = vst [vmem:[#allocation28_spill] sm:$0xff] %v5461_v5  ;;  %v5463_v2 = vpop.f32.mrb[47].mxu1  ;;  %v4662_v21 = vmov 0.0  }
 0x255   : > { %6674 = vst [vmem:[#allocation29_spill] sm:$0xff] %v5463_v2  ;;  %v4048_v60 = vpop.eup %4047  ;;  %4067 = vrcp.f32 %v1491_v20  ;;  %v1492_v63 = vadd.f32 1.0, %v4046_v50  ;;  %383 = vst [vmem:[#allocation2] sm:$0xff] %v4662_v21  ;;  %v5473_v11 = vpop.f32.mrb[39].mxu0  ;;  %v3561_v20 = vmul.f32 -1.442695, %v5445_v9  ;;  %v5478_v50 = vadd.f32 %v5270_v1, %v5288_v22 }
 0x256   : > { %384 = vst [vmem:[#allocation2 + $0x8] sm:$0xff] %v4662_v21  ;;  %385 = vst [vmem:[#allocation2 + $0x10] sm:$0xf] %v4662_v21  ;;  %v4050_v38 = vpop.eup %4049  ;;  %4069 = vrcp.f32 %v1493_v27  ;;  %v1494_v2 = vadd.f32 1.0, %v4048_v60  ;;  %v5486_v21 = vadd.f32 %v5277_v12, %v5294_v32  ;;  %v3560_v60 = vmul.f32 -1.442695, %v5459_v39 }
 0x257   : > { %6675 = vst [vmem:[#allocation30_spill] sm:$0xff] %v5473_v11  ;;  %v4052_v6 = vpop.eup %4051  ;;  %4071 = vrcp.f32 %v1492_v63  ;;  %v1501_v5 = vadd.f32 1.0, %v4050_v38  ;;  %v5491_v1 = vadd.f32 %v5296_v28, %v5285_v62  ;;  %v3562_v38 = vmul.f32 -1.442695, %v5467_v31  ;;  %v5495_v29 = vpop.f32.mrb[48].mxu1 }
 0x258   : > { %v4054_v11 = vpop.eup %4053  ;;  %4073 = vrcp.f32 %v1494_v2  ;;  %v1503_v27 = vadd.f32 1.0, %v4052_v6  ;;  %v3569_v17 = vmul.f32 -1.442695, %v5471_v18  ;;  %6676 = vst [vmem:[#allocation31_spill] sm:$0xff] %v5495_v29  ;;  %v3571_v2 = vmul.f32 -1.442695, %v5478_v50 }
 0x259   : > { %v4056_v57 = vpop.eup %4055  ;;  %4075 = vrcp.f32 %v1501_v5  ;;  %v1502_v63 = vadd.f32 1.0, %v4054_v11  ;;  %v5501_v6 = vadd.f32 %v5298_v8, %v5288_v22  ;;  %v5503_v28 = vpop.f32.mrb[49].mxu1  ;;  %v3570_v41 = vmul.f32 -1.442695, %v5482_v54 }
 0x25a   : > { %v4058_v12 = vpop.eup %4057  ;;  %v1788_v33 = vmul.f32 %v4056_v57, %v5282_v14  ;;  %4077 = vrcp.f32 %v1503_v27  ;;  %6678 = vst [vmem:[#allocation33_spill] sm:$0xff] %v5503_v28  ;;  %v3572_v29 = vmul.f32 -1.442695, %v5486_v21  ;;  %v5508_v36 = vpop.f32.mrb[50].mxu1  ;;  %v3579_v8 = vmul.f32 -1.442695, %v5491_v1 }
 0x25b   : > { %6677 = vst [vmem:[#allocation32_spill] sm:$0xff] %v5501_v6  ;;  %v4060_v5 = vpop.eup %4059  ;;  %v1790_v11 = vmul.f32 %v4058_v12, %v5303_v19  ;;  %4079 = vrcp.f32 %v1502_v63  ;;  %6679 = vst [vmem:[#allocation34_spill] sm:$0xff] %v5508_v36  ;;  %v5513_v7 = vpop.f32.mrb[51].mxu1  ;;  %v5519_v12 = vadd.f32 %v5305_v46, %v5291_v24 }
 0x25c   : > { %v4062_v14 = vpop.eup %4061  ;;  %v1828_v57 = vadd.f32 %v5412_v13, %v1788_v33  ;;  %v1797_v27 = vmul.f32 %v4060_v5, %v5311_v47  ;;  %4081 = vpow2.f32 %v3552_v34  ;;  %6680 = vst [vmem:[#allocation35_spill] sm:$0xff] %v5513_v7  ;;  %v5524_v33 = vmul.f32 -1.442695, %v5501_v6 }
 0x25d   : > { %v4064_v28 = vpop.eup %4063  ;;  %v1854_v19 = vadd.f32 %v5419_v16, %v1790_v11  ;;  %v1799_v63 = vmul.f32 %v4062_v14, %v5315_v10  ;;  %4083 = vpow2.f32 %v3559_v53  ;;  %v6681_v10 = vld [vmem:[#allocation12_spill] sm:$0xff] }
 0x25e   : > { %v4066_v36 = vpop.eup %4065  ;;  %v1816_v13 = vadd.f32 %v5426_v48, %v1797_v27  ;;  %v1798_v47 = vmul.f32 %v4064_v28, %v5323_v3  ;;  %4085 = vpow2.f32 %v3561_v20  ;;  %v5530_v53 = vadd.f32 %v6681_v10, %v5294_v32  ;;  %v6682_v3 = vld [vmem:[#allocation13_spill] sm:$0xff] }
 0x25f   : > { %v4068_v34 = vpop.eup %4067  ;;  %v1842_v5 = vadd.f32 %v5428_v51, %v1799_v63  ;;  %v1800_v16 = vmul.f32 %v4066_v36, %v5327_v0  ;;  %4087 = vpow2.f32 %v3560_v60  ;;  %v5534_v48 = vadd.f32 %v6682_v3, %v5285_v62  ;;  %v5537_v0 = vpop.f32.mrb[52].mxu1  ;;  %v6683_v10 = vld [vmem:[#allocation17_spill] sm:$0xff] }
 0x260   : > { %v4070_v46 = vpop.eup %4069  ;;  %v1817_v11 = vrot.slane %v1816_v13, 4  ;;  %v1829_v14 = vadd.f32 %v1828_v57, %v1798_v47  ;;  %4089 = vpow2.f32 %v3562_v38  ;;  %v1731_v51 = vmul.f32 %v4068_v34, %v5335_v56  ;;  %v5542_v38 = vpop.f32.mrb[53].mxu1 }
 0x261   : > { %v4072_v20 = vpop.eup %4071  ;;  %v1843_v28 = vrot.slane %v1842_v5, 4  ;;  %v1855_v27 = vadd.f32 %v1854_v19, %v1800_v16  ;;  %4091 = vpow2.f32 %v3569_v17  ;;  %v1733_v7 = vmul.f32 %v4070_v46, %v6683_v10  ;;  %6684 = vst [vmem:[#allocation12_spill] sm:$0xff] %v5542_v38  ;;  %v5545_v19 = vpop.f32.mrb[54].mxu1 }
 0x262   : > { %v5539_v36 = vpop.eup %4073  ;;  %v1818_v60 = vadd.f32 %v1817_v11, %v1816_v13  ;;  %v1830_v63 = vrot.slane %v1829_v14, 4  ;;  %4093 = vpow2.f32 %v3571_v2  ;;  %v1732_v6 = vmul.f32 %v4072_v20, %v5344_v58  ;;  %6685 = vst [vmem:[#allocation13_spill] sm:$0xff] %v5545_v19  ;;  %v5548_v13 = vpop.f32.mrb[55].mxu1 }
 0x263   : > { %v4076_v57 = vpop.eup %4075  ;;  %v1844_v47 = vadd.f32 %v1843_v28, %v1842_v5  ;;  %v1856_v3 = vrot.slane %v1855_v27, 4  ;;  %4095 = vpow2.f32 %v3570_v41  ;;  %6686 = vst [vmem:[#allocation17_spill] sm:$0xff] %v5548_v13 }
 0x264   : > { %v4078_v56 = vpop.eup %4077  ;;  %v1819_v17 = vrot.slane %v1818_v60, 2  ;;  %v1831_v34 = vadd.f32 %v1830_v63, %v1829_v14  ;;  %v1741_v16 = vmul.f32 %v4076_v57, %v5379_v43  ;;  %4097 = vpow2.f32 %v3572_v29 }
 0x265   : > { %v4080_v46 = vpop.eup %4079  ;;  %v1845_v2 = vrot.slane %v1844_v47, 2  ;;  %v1857_v11 = vadd.f32 %v1856_v3, %v1855_v27  ;;  %v1743_v10 = vmul.f32 %v4078_v56, %v5389_v26  ;;  %4099 = vpow2.f32 %v3579_v8 }
 0x266   : > { %v4082_v5 = vpop.eup %4081  ;;  %v1820_v28 = vadd.f32 %v1819_v17, %v1818_v60  ;;  %v1832_v58 = vrot.slane %v1831_v34, 2  ;;  %v5551_v41 = vadd.f32 %v1741_v16, %v1731_v51  ;;  %v1742_v20 = vmul.f32 %v4080_v46, %v5394_v61 }
 0x267   : > { %v4084_v19 = vpop.eup %4083  ;;  %v1846_v14 = vadd.f32 %v1845_v2, %v1844_v47  ;;  %v1858_v63 = vrot.slane %v1857_v11, 2  ;;  %v5554_v43 = vadd.f32 %v1743_v10, %v1733_v7  ;;  %v1504_v29 = vadd.f32 1.0, %v4082_v5 }
 0x268   : > { %v4086_v57 = vpop.eup %4085  ;;  %v1821_v13 = vrot.slane %v1820_v28, 1  ;;  %v1833_v38 = vadd.f32 %v1832_v58, %v1831_v34  ;;  %v5556_v27 = vadd.f32 %v1742_v20, %v1732_v6  ;;  %v1511_v26 = vadd.f32 1.0, %v4084_v19  ;;  %v6687_v19 = vld [vmem:[#allocation14_spill] sm:$0xff] }
 0x269   : > { %v4088_v8 = vpop.eup %4087  ;;  %v1847_v3 = vrot.slane %v1846_v14, 1  ;;  %v1859_v60 = vadd.f32 %v1858_v63, %v1857_v11  ;;  %4101 = vrcp.f32 %v1504_v29  ;;  %v1513_v51 = vadd.f32 1.0, %v4086_v57 }
 0x26a   : > { %v4090_v56 = vpop.eup %4089  ;;  %v1822_v17 = vadd.f32 %v1821_v13, %v1820_v28  ;;  %v1834_v61 = vrot.slane %v1833_v38, 1  ;;  %4103 = vrcp.f32 %v1511_v26  ;;  %v1512_v47 = vadd.f32 1.0, %v4088_v8  ;;  %v6688_v28 = vld [vmem:[#allocation15_spill] sm:$0xff] }
 0x26b   : > { %v4092_v16 = vpop.eup %4091  ;;  %v1848_v7 = vadd.f32 %v1847_v3, %v1846_v14  ;;  %v1860_v46 = vrot.slane %v1859_v60, 1  ;;  %4105 = vrcp.f32 %v1513_v51  ;;  %v1514_v2 = vadd.f32 1.0, %v4090_v56 }
 0x26c   : > { %v4094_v10 = vpop.eup %4093  ;;  %v1835_v34 = vadd.f32 %v1834_v61, %v1833_v38  ;;  %4107 = vrcp.f32 %v1512_v47  ;;  %v1521_v6 = vadd.f32 1.0, %v4092_v16  ;;  %v5560_v5 = vadd.f32 %v6687_v19, %v5288_v22  ;;  %v6689_v38 = vld [vmem:[#allocation16_spill] sm:$0xff]  ;;  %v6690_v16 = vld [vmem:[#allocation18_spill] sm:$0xff] }
 0x26d   : > { %v4096_v11 = vpop.eup %4095  ;;  %v1861_v58 = vadd.f32 %v1860_v46, %v1859_v60  ;;  %4109 = vrcp.f32 %v1514_v2  ;;  %v1523_v13 = vadd.f32 1.0, %v4094_v10  ;;  %v5564_v20 = vadd.f32 %v6688_v28, %v5291_v24 }
 0x26e   : > { %v4098_v14 = vpop.eup %4097  ;;  %v1950_v63 = vcombine.low %v1822_v17, %v1835_v34  ;;  %4111 = vrcp.f32 %v1521_v6  ;;  %v1522_v29 = vadd.f32 1.0, %v4096_v11  ;;  %v5568_v57 = vadd.f32 %v6689_v38, %v5294_v32 }
 0x26f   : > { %v4100_v26 = vpop.eup %4099  ;;  %v1951_v8 = vcombine.low %v1848_v7, %v1861_v58  ;;  %4113 = vrcp.f32 %v1523_v13  ;;  %v1524_v3 = vadd.f32 1.0, %v4098_v14  ;;  %v5572_v60 = vadd.f32 %v5354_v40, %v5285_v62 }
 0x270   : > { %v5575_v51 = vrot.slane %v1950_v63, %v5450_v23  ;;  %4115 = vrcp.f32 %v1522_v29  ;;  %v1531_v56 = vadd.f32 1.0, %v4100_v26  ;;  %v3580_v17 = vmul.f32 -1.442695, %v5519_v12 }
 0x271   : > { %v5579_v61 = vrot.slane %v1951_v8, %v5450_v23  ;;  %4117 = vrcp.f32 %v1524_v3  ;;  %v3582_v47 = vmul.f32 -1.442695, %v5530_v53  ;;  %v5584_v7 = vadd.f32 %v6690_v16, %v5288_v22 }
 0x272   : > { %4119 = vrcp.f32 %v1531_v56  ;;  %v3589_v40 = vmul.f32 -1.442695, %v5534_v48  ;;  %v3591_v46 = vmul.f32 -1.442695, %v5560_v5  ;;  %v3590_v2 = vmul.f32 -1.442695, %v5564_v20 }
 0x273   : > { %v4102_v10 = vpop.eup %4101  ;;  %4121 = vpow2.f32 %v5524_v33  ;;  %v3592_v6 = vmul.f32 -1.442695, %v5568_v57  ;;  %v3599_v19 = vmul.f32 -1.442695, %v5572_v60  ;;  %v1734_v58 = vmul.f32 %v5539_v36, %v5369_v45 }
 0x274   : > { %v4104_v11 = vpop.eup %4103  ;;  %v1744_v13 = vmul.f32 %v4102_v10, %v5432_v30  ;;  %4123 = vpow2.f32 %v3580_v17  ;;  %v5599_v28 = vadd.f32 %v5361_v44, %v5291_v24  ;;  %v3601_v33 = vmul.f32 -1.442695, %v5584_v7 }
 0x275   : > { %v4106_v14 = vpop.eup %4105  ;;  %v1751_v63 = vmul.f32 %v4104_v11, %v5436_v37  ;;  %4125 = vpow2.f32 %v3582_v47  ;;  %v5605_v29 = vadd.f32 %v5363_v55, %v5294_v32  ;;  %v5610_v30 = vadd.f32 %v5371_v59, %v5285_v62 }
 0x276   : > { %v4108_v38 = vpop.eup %4107  ;;  %v1901_v26 = vadd.f32 %v1744_v13, %v1734_v58  ;;  %v1753_v45 = vmul.f32 %v4106_v14, %v5445_v9  ;;  %4127 = vpow2.f32 %v3589_v40  ;;  %v5616_v8 = vadd.f32 %v5373_v25, %v5288_v22 }
 0x277   : > { %v4110_v44 = vpop.eup %4109  ;;  %v1863_v36 = vadd.f32 %v5551_v41, %v1751_v63  ;;  %v1752_v37 = vmul.f32 %v4108_v38, %v5459_v39  ;;  %4129 = vpow2.f32 %v3591_v46  ;;  %v3600_v56 = vmul.f32 -1.442695, %v5599_v28 }
 0x278   : > { %v4112_v55 = vpop.eup %4111  ;;  %v1889_v3 = vadd.f32 %v5554_v43, %v1753_v45  ;;  %v1754_v9 = vmul.f32 %v4110_v44, %v5467_v31  ;;  %4131 = vpow2.f32 %v3590_v2  ;;  %v3602_v39 = vmul.f32 -1.442695, %v5605_v29 }
 0x279   : > { %v4114_v59 = vpop.eup %4113  ;;  %v1876_v17 = vadd.f32 %v5556_v27, %v1752_v37  ;;  %v1761_v41 = vmul.f32 %v4112_v55, %v5471_v18  ;;  %4133 = vpow2.f32 %v3592_v6  ;;  %v3609_v43 = vmul.f32 -1.442695, %v5610_v30 }
 0x27a   : > { %v4116_v47 = vpop.eup %4115  ;;  %v1902_v16 = vadd.f32 %v1901_v26, %v1754_v9  ;;  %v1763_v25 = vmul.f32 %v4114_v59, %v5478_v50  ;;  %4135 = vpow2.f32 %v3599_v19  ;;  %v3611_v2 = vmul.f32 -1.442695, %v5616_v8 }
 0x27b   : > { %v4118_v40 = vpop.eup %4117  ;;  %v1864_v31 = vadd.f32 %v1863_v36, %v1761_v41  ;;  %v1762_v46 = vmul.f32 %v4116_v47, %v5482_v54  ;;  %4137 = vpow2.f32 %v3601_v33  ;;  %v432_v33 = vld [vmem:[%s5082_s24 + $0x8] sm:$0x3]  ;;  %v6691_v37 = vsub.s32 0, %v5076_v49 }
 0x27c   : > { %v4120_v27 = vpop.eup %4119  ;;  %v5628_v18 = vadd.f32 %v1889_v3, %v1763_v25  ;;  %v1764_v10 = vmul.f32 %v4118_v40, %v5486_v21  ;;  %4139 = vpow2.f32 %v3600_v56  ;;  %v6693_v56 = vsub.s32 1, %v5076_v49 }
 0x27d   : > { %v4122_v6 = vpop.eup %4121  ;;  %v5631_v11 = vadd.f32 %v1876_v17, %v1762_v46  ;;  %v1771_v50 = vmul.f32 %v4120_v27, %v5491_v1  ;;  %4141 = vpow2.f32 %v3602_v39  ;;  %v5641_v1 = vadd.f32 %v5381_v15, %v5291_v24 }
 0x27e   : > { %v4124_v19 = vpop.eup %4123  ;;  %v5634_v58 = vadd.f32 %v1902_v16, %v1764_v10  ;;  %v1533_v54 = vadd.f32 1.0, %v4122_v6  ;;  %4143 = vpow2.f32 %v3609_v43  ;;  %v5645_v55 = vrot.slane %v432_v33, %v6691_v37  ;;  %v6695_v16 = vld [vmem:[#allocation19_spill] sm:$0xff]  ;;  %v6699_v37 = vld [vmem:[#allocation32_spill] sm:$0xff] }
 0x27f   : > { %v4126_v13 = vpop.eup %4125  ;;  %v5636_v14 = vadd.f32 %v1864_v31, %v1771_v50  ;;  %v1532_v63 = vadd.f32 1.0, %v4124_v19  ;;  %4145 = vpow2.f32 %v3611_v2  ;;  %v5649_v59 = vrot.slane %v432_v33, %v6693_v56  ;;  %v5663_v31 = vld [vmem:[%s6613_s2] ss:$0 sm:$0xff]  ;;  %v6696_v19 = vld [vmem:[#allocation8_spill] sm:$0xff] }
 0x280   : > { %v4128_v38 = vpop.eup %4127  ;;  %4147 = vrcp.f32 %v1533_v54  ;;  %v1534_v21 = vadd.f32 1.0, %v4126_v13  ;;  %6692 = vst [vmem:[#allocation14_spill] sm:$0xff] %v5645_v55  ;;  %v3610_v47 = vmul.f32 -1.442695, %v5641_v1  ;;  %v5654_v25 = vadd.f32 %v6695_v16, %v5294_v32 }
 0x281   : > { %v4130_v26 = vpop.eup %4129  ;;  %4149 = vrcp.f32 %v1532_v63  ;;  %v1541_v45 = vadd.f32 1.0, %v4128_v38  ;;  %6694 = vst [vmem:[#allocation15_spill] sm:$0xff] %v5649_v59  ;;  %v5658_v49 = vadd.f32 %v5402_v52, %v5645_v55  ;;  %v5667_v46 = vadd.f32 %v5663_v31, %v5404_v42  ;;  %v6697_v42 = vld [vmem:[#allocation9_spill] sm:$0xff]  ;;  %v6698_v38 = vld [vmem:[#allocation20_spill] sm:$0xff] }
 0x282   : > { %v4132_v44 = vpop.eup %4131  ;;  %4151 = vrcp.f32 %v1534_v21  ;;  %v1543_v36 = vadd.f32 1.0, %v4130_v26  ;;  %v5671_v10 = vadd.f32 %v5408_v35, %v5649_v59  ;;  %v5675_v52 = vadd.f32 %v5663_v31, %v5410_v4 }
 0x283   : > { %v4134_v3 = vpop.eup %4133  ;;  %4153 = vrcp.f32 %v1541_v45  ;;  %v1542_v9 = vadd.f32 1.0, %v4132_v44  ;;  %v5679_v54 = vadd.f32 %v6696_v19, %v5645_v55  ;;  %v5683_v13 = vadd.f32 %v5663_v31, %v6697_v42 }
 0x284   : > { %v4136_v17 = vpop.eup %4135  ;;  %4155 = vrcp.f32 %v1543_v36  ;;  %v1544_v41 = vadd.f32 1.0, %v4134_v3  ;;  %v3612_v35 = vmul.f32 -1.442695, %v5654_v25  ;;  %v5688_v4 = vadd.f32 %v6698_v38, %v5649_v59 }
 0x285   : > { %v4138_v39 = vpop.eup %4137  ;;  %4157 = vrcp.f32 %v1542_v9  ;;  %v1551_v15 = vadd.f32 1.0, %v4136_v17  ;;  %v3543_v45 = vmul.f32 -1.442695, %v5658_v49  ;;  %v3633_v44 = vmul.f32 -1.442695, %v5667_v46 }
 0x286   : > { %v4140_v43 = vpop.eup %4139  ;;  %4159 = vrcp.f32 %v1544_v41  ;;  %v1553_v40 = vadd.f32 1.0, %v4138_v39  ;;  %v3544_v9 = vmul.f32 -1.442695, %v5671_v10  ;;  %v3631_v56 = vmul.f32 -1.442695, %v5675_v52 }
 0x287   : > { %v4142_v2 = vpop.eup %4141  ;;  %4161 = vrcp.f32 %v1551_v15  ;;  %v1552_v27 = vadd.f32 1.0, %v4140_v43  ;;  %v3553_v39 = vmul.f32 -1.442695, %v5679_v54  ;;  %v3634_v15 = vmul.f32 -1.442695, %v5683_v13 }
 0x288   : > { %v4144_v6 = vpop.eup %4143  ;;  %4163 = vrcp.f32 %v1553_v40  ;;  %v1554_v50 = vadd.f32 1.0, %v4142_v2  ;;  %v3554_v2 = vmul.f32 -1.442695, %v5688_v4 }
 0x289   : > { %v4146_v63 = vpop.eup %4145  ;;  %4165 = vrcp.f32 %v1552_v27  ;;  %v1561_v33 = vadd.f32 1.0, %v4144_v6 }
 0x28a   : > { %v4148_v21 = vpop.eup %4147  ;;  %4167 = vrcp.f32 %v1554_v50  ;;  %v1563_v26 = vadd.f32 1.0, %v4146_v63 }
 0x28b   : > { %v4150_v36 = vpop.eup %4149  ;;  %v1773_v3 = vmul.f32 %v4148_v21, %v6699_v37  ;;  %4169 = vrcp.f32 %v1561_v33 }
 0x28c   : > { %v4152_v17 = vpop.eup %4151  ;;  %v1772_v41 = vmul.f32 %v4150_v36, %v5519_v12  ;;  %4171 = vrcp.f32 %v1563_v26  ;;  %v6700_v12 = vld [vmem:[#allocation21_spill] sm:$0xff] }
 0x28d   : > { %v4154_v16 = vpop.eup %4153  ;;  %v1891_v43 = vadd.f32 %v5628_v18, %v1773_v3  ;;  %v1774_v40 = vmul.f32 %v4152_v17, %v5530_v53  ;;  %4173 = vpow2.f32 %v3610_v47  ;;  %v5705_v19 = vadd.f32 %v5663_v31, %v6700_v12  ;;  %v6701_v53 = vld [vmem:[#allocation22_spill] sm:$0xff] }
 0x28e   : > { %v4156_v27 = vpop.eup %4155  ;;  %v1878_v6 = vadd.f32 %v5631_v11, %v1772_v41  ;;  %v1781_v50 = vmul.f32 %v4154_v16, %v5534_v48  ;;  %4175 = vpow2.f32 %v3612_v35  ;;  %v5711_v47 = vadd.f32 %v6701_v53, %v5645_v55  ;;  %v6702_v35 = vld [vmem:[#allocation23_spill] sm:$0xff] }
 0x28f   : > { %v4158_v42 = vpop.eup %4157  ;;  %v1904_v63 = vadd.f32 %v5634_v58, %v1774_v40  ;;  %v1783_v18 = vmul.f32 %v4156_v27, %v5560_v5  ;;  %4177 = vpow2.f32 %v3543_v45  ;;  %v5717_v38 = vadd.f32 %v5663_v31, %v6702_v35  ;;  %v6703_v5 = vld [vmem:[#allocation24_spill] sm:$0xff] }
 0x290   : > { %v4160_v33 = vpop.eup %4159  ;;  %v1866_v11 = vadd.f32 %v5636_v14, %v1781_v50  ;;  %v1782_v48 = vmul.f32 %v4158_v42, %v5564_v20  ;;  %4179 = vpow2.f32 %v3633_v44  ;;  %v5722_v45 = vadd.f32 %v6703_v5, %v5649_v59 }
 0x291   : > { %v4162_v21 = vpop.eup %4161  ;;  %v1892_v26 = vadd.f32 %v1891_v43, %v1783_v18  ;;  %v1784_v58 = vmul.f32 %v4160_v33, %v5568_v57  ;;  %4181 = vpow2.f32 %v3544_v9  ;;  %v3632_v20 = vmul.f32 -1.442695, %v5705_v19 }
 0x292   : > { %v4164_v36 = vpop.eup %4163  ;;  %v1879_v37 = vadd.f32 %v1878_v6, %v1782_v48  ;;  %v1791_v14 = vmul.f32 %v4162_v21, %v5572_v60  ;;  %4183 = vpow2.f32 %v3631_v56  ;;  %v3563_v41 = vmul.f32 -1.442695, %v5711_v47  ;;  %v6707_v21 = vld [vmem:[#allocation29_spill] sm:$0xff] }
 0x293   : > { %v4166_v44 = vpop.eup %4165  ;;  %v1905_v3 = vadd.f32 %v1904_v63, %v1784_v58  ;;  %v1793_v17 = vmul.f32 %v4164_v36, %v5584_v7  ;;  %4185 = vpow2.f32 %v3553_v39  ;;  %v3637_v43 = vmul.f32 -1.442695, %v5717_v38  ;;  %v6704_v39 = vld [vmem:[#allocation26_spill] sm:$0xff] }
 0x294   : > { %v4168_v57 = vpop.eup %4167  ;;  %v1867_v9 = vadd.f32 %v1866_v11, %v1791_v14  ;;  %v1792_v16 = vmul.f32 %v4166_v44, %v5599_v28  ;;  %4187 = vpow2.f32 %v3634_v15  ;;  %v3564_v56 = vmul.f32 -1.442695, %v5722_v45  ;;  %v6708_v44 = vld [vmem:[#allocation30_spill] sm:$0xff] }
 0x295   : > { %v4170_v40 = vpop.eup %4169  ;;  %v1893_v27 = vadd.f32 %v1892_v26, %v1793_v17  ;;  %v1794_v60 = vmul.f32 %v4168_v57, %v5605_v29  ;;  %4189 = vpow2.f32 %v3554_v2  ;;  %v5737_v12 = vadd.f32 %v5663_v31, %v6704_v39  ;;  %v6705_v29 = vld [vmem:[#allocation27_spill] sm:$0xff] }
 0x296   : > { %v4172_v6 = vpop.eup %4171  ;;  %v5732_v50 = vadd.f32 %v1879_v37, %v1792_v16  ;;  %v1801_v7 = vmul.f32 %v4170_v40, %v5610_v30  ;;  %4191 = vpow2.f32 %v3632_v20  ;;  %v5744_v2 = vadd.f32 %v6705_v29, %v5645_v55  ;;  %v6706_v30 = vld [vmem:[#allocation28_spill] sm:$0xff]  ;;  %v6709_v57 = vld [vmem:[#allocation31_spill] sm:$0xff]  ;;  %v6710_v16 = vld [vmem:[#allocation33_spill] sm:$0xff] }
 0x297   : > { %v4174_v28 = vpop.eup %4173  ;;  %v5739_v15 = vadd.f32 %v1905_v3, %v1794_v60  ;;  %v1803_v42 = vmul.f32 %v4172_v6, %v5616_v8  ;;  %4193 = vpow2.f32 %v3563_v41  ;;  %v5748_v33 = vadd.f32 %v5663_v31, %v6706_v30 }
 0x298   : > { %v4176_v63 = vpop.eup %4175  ;;  %v1868_v18 = vadd.f32 %v1867_v9, %v1801_v7  ;;  %v1562_v53 = vadd.f32 1.0, %v4174_v28  ;;  %4195 = vpow2.f32 %v3637_v43  ;;  %v5752_v8 = vadd.f32 %v6707_v21, %v5649_v59 }
 0x299   : > { %v4178_v11 = vpop.eup %4177  ;;  %v1894_v48 = vadd.f32 %v1893_v27, %v1803_v42  ;;  %v1564_v35 = vadd.f32 1.0, %v4176_v63  ;;  %4197 = vpow2.f32 %v3564_v56  ;;  %v5755_v36 = vmul.f32 -1.442695, %v5737_v12 }
 0x29a   : > { %v4180_v26 = vpop.eup %4179  ;;  %v1869_v58 = vrot.slane %v1868_v18, 4  ;;  %4199 = vrcp.f32 %v1562_v53  ;;  %v1495_v5 = vadd.f32 1.0, %v4178_v11  ;;  %v5759_v3 = vadd.f32 %v5663_v31, %v6708_v44 }
 0x29b   : > { %v4182_v37 = vpop.eup %4181  ;;  %v1895_v14 = vrot.slane %v1894_v48, 4  ;;  %4201 = vrcp.f32 %v1564_v35  ;;  %v2156_v20 = vadd.f32 1.0, %v4180_v26  ;;  %v5763_v9 = vadd.f32 %v6709_v57, %v5645_v55 }
 0x29c   : > { %v4184_v17 = vpop.eup %4183  ;;  %4203 = vrcp.f32 %v1495_v5  ;;  %v1496_v41 = vadd.f32 1.0, %v4182_v37  ;;  %v5767_v43 = vadd.f32 %v6710_v16, %v5649_v59  ;;  %v1870_v27 = vadd.f32 %v1869_v58, %v1868_v18  ;;  %v6711_v37 = vld [vmem:[#allocation34_spill] sm:$0xff]  ;;  %v6713_v16 = vld [vmem:[#allocation12_spill] sm:$0xff] }
 0x29d   : > { %v4186_v40 = vpop.eup %4185  ;;  %v1896_v60 = vadd.f32 %v1895_v14, %v1894_v48  ;;  %4205 = vrcp.f32 %v2156_v20  ;;  %v2154_v56 = vadd.f32 1.0, %v4184_v17  ;;  %v3573_v7 = vmul.f32 -1.442695, %v5744_v2  ;;  %v6712_v20 = vld [vmem:[#allocation35_spill] sm:$0xff] }
 0x29e   : > { %v4188_v6 = vpop.eup %4187  ;;  %4207 = vrcp.f32 %v1496_v41  ;;  %v1505_v31 = vadd.f32 1.0, %v4186_v40  ;;  %v3638_v39 = vmul.f32 -1.442695, %v5748_v33  ;;  %v3574_v29 = vmul.f32 -1.442695, %v5752_v8 }
 0x29f   : > { %v4190_v28 = vpop.eup %4189  ;;  %4209 = vrcp.f32 %v2154_v56  ;;  %v2157_v42 = vadd.f32 1.0, %v4188_v6  ;;  %v3636_v63 = vmul.f32 -1.442695, %v5759_v3  ;;  %v3583_v30 = vmul.f32 -1.442695, %v5763_v9 }
 0x2a0   : > { %v4192_v53 = vpop.eup %4191  ;;  %4211 = vrcp.f32 %v1505_v31  ;;  %v1506_v18 = vadd.f32 1.0, %v4190_v28  ;;  %v5775_v11 = vmul.f32 -1.442695, %v5767_v43  ;;  %v1871_v35 = vrot.slane %v1870_v27, 2  ;;  %v6714_v31 = vld [vmem:[#allocation13_spill] sm:$0xff] }
 0x2a1   : > { %v4194_v48 = vpop.eup %4193  ;;  %v1897_v21 = vrot.slane %v1896_v60, 2  ;;  %4213 = vrcp.f32 %v2157_v42  ;;  %v2155_v26 = vadd.f32 1.0, %v4192_v53  ;;  %v5779_v14 = vadd.f32 %v6711_v37, %v5645_v55  ;;  %v6715_v42 = vld [vmem:[#allocation17_spill] sm:$0xff] }
 0x2a2   : > { %v4196_v58 = vpop.eup %4195  ;;  %4215 = vrcp.f32 %v1506_v18  ;;  %v1515_v5 = vadd.f32 1.0, %v4194_v48  ;;  %v5783_v44 = vadd.f32 %v6712_v20, %v5649_v59  ;;  %v5787_v57 = vadd.f32 %v5537_v0, %v5645_v55 }
 0x2a3   : > { %v4198_v17 = vpop.eup %4197  ;;  %4217 = vrcp.f32 %v2155_v26  ;;  %v2160_v41 = vadd.f32 1.0, %v4196_v58  ;;  %v5791_v40 = vadd.f32 %v6713_v16, %v5649_v59  ;;  %v5795_v28 = vadd.f32 %v6714_v31, %v5645_v55 }
 0x2a4   : > { %v4200_v56 = vpop.eup %4199  ;;  %4219 = vrcp.f32 %v1515_v5  ;;  %v1516_v6 = vadd.f32 1.0, %v4198_v17  ;;  %v5799_v53 = vadd.f32 %v6715_v42, %v5649_v59  ;;  %v1872_v48 = vadd.f32 %v1871_v35, %v1870_v27 }
 0x2a5   : > { %v4202_v18 = vpop.eup %4201  ;;  %v5801_v26 = vadd.f32 %v1897_v21, %v1896_v60  ;;  %v1802_v0 = vmul.f32 %v4200_v56, %v5641_v1  ;;  %4221 = vrcp.f32 %v2160_v41  ;;  %v3593_v5 = vmul.f32 -1.442695, %v5779_v14 }
 0x2a6   : > { %v4204_v58 = vpop.eup %4203  ;;  %v1804_v37 = vmul.f32 %v4202_v18, %v5654_v25  ;;  %4223 = vrcp.f32 %v1516_v6  ;;  %v3594_v20 = vmul.f32 -1.442695, %v5783_v44  ;;  %v3603_v27 = vmul.f32 -1.442695, %v5787_v57 }
 0x2a7   : > { %v4206_v17 = vpop.eup %4205  ;;  %v1881_v16 = vadd.f32 %v5732_v50, %v1802_v0  ;;  %4225 = vpow2.f32 %v5755_v36  ;;  %v3604_v60 = vmul.f32 -1.442695, %v5791_v40  ;;  %v3613_v25 = vmul.f32 -1.442695, %v5795_v28 }
 0x2a8   : > { %v4208_v35 = vpop.eup %4207  ;;  %v1907_v1 = vadd.f32 %v5739_v15, %v1804_v37  ;;  %4227 = vpow2.f32 %v3573_v7  ;;  %v3614_v21 = vmul.f32 -1.442695, %v5799_v53  ;;  %v1873_v56 = vrot.slane %v1872_v48, 1 }
 0x2a9   : > { %v4210_v41 = vpop.eup %4209  ;;  %v1899_v6 = vrot.slane %v5801_v26, 1  ;;  %v1882_v31 = vrot.slane %v1881_v16, 4  ;;  %4229 = vpow2.f32 %v3638_v39  ;;  %v1735_v42 = vmul.f32 %v4204_v58, %v5658_v49 }
 0x2aa   : > { %v4212_v50 = vpop.eup %4211  ;;  %v1908_v36 = vrot.slane %v1907_v1, 4  ;;  %v2180_v18 = vmul.f32 %v4206_v17, %v5667_v46  ;;  %4231 = vpow2.f32 %v3574_v29  ;;  %v1736_v7 = vmul.f32 %v4208_v35, %v5671_v10 }
 0x2ab   : > { %v4214_v0 = vpop.eup %4213  ;;  %v1883_v15 = vadd.f32 %v1882_v31, %v1881_v16  ;;  %v1745_v37 = vmul.f32 %v4212_v50, %v5679_v54  ;;  %4233 = vpow2.f32 %v3636_v63  ;;  %v2178_v55 = vmul.f32 %v4210_v41, %v5675_v52  ;;  %v4599_v41 = vld [vmem:[%s4853_s30 + $0x64] ss:$40 sps:$4 sm:$0xff]   ;;  %v4600_v50 = vld [vmem:[%s4853_s30 + $0x18] ss:$40 sps:$4 sm:$0xff]  }
 0x2ac   : > { %v4216_v34 = vpop.eup %4215  ;;  %v1909_v59 = vadd.f32 %v1908_v36, %v1907_v1  ;;  %v2181_v39 = vmul.f32 %v4214_v0, %v5683_v13  ;;  %4235 = vpow2.f32 %v3583_v30  ;;  %v1874_v16 = vadd.f32 %v1873_v56, %v1872_v48 }
 0x2ad   : > { %v4218_v32 = vpop.eup %4217  ;;  %v1884_v24 = vrot.slane %v1883_v15, 2  ;;  %v1914_v49 = vadd.f32 %v1745_v37, %v1735_v42  ;;  %v1746_v46 = vmul.f32 %v4216_v34, %v5688_v4  ;;  %4237 = vpow2.f32 %v5775_v11  ;;  %v4602_v37 = vld [vmem:[%s4853_s30 + $0x60] ss:$40 sps:$4 sm:$0xff]  }
 0x2ae   : > { %v4220_v29 = vpop.eup %4219  ;;  %v1910_v58 = vrot.slane %v1909_v59, 2  ;;  %v5823_v10 = vpack.c.bf16 %v2181_v39, %v2180_v18  ;;  %v2179_v54 = vmul.f32 %v4218_v32, %v5705_v19  ;;  %4239 = vpow2.f32 %v3593_v5  ;;  %v4601_v18 = vld [vmem:[%s4853_s30 + $0x6c] ss:$40 sps:$4 sm:$0xff]  }
 0x2af   : > { %v5826_v63 = vpop.eup %4221  ;;  %v1885_v52 = vadd.f32 %v1884_v24, %v1883_v15  ;;  %v1927_v17 = vadd.f32 %v1746_v46, %v1736_v7  ;;  %v1755_v13 = vmul.f32 %v4220_v29, %v5711_v47  ;;  %4241 = vpow2.f32 %v3594_v20  ;;  %v4603_v29 = vld [vmem:[%s4853_s30 + $0xb4] ss:$40 sps:$4 sm:$0xff]  }
 0x2b0   : > { %v4224_v30 = vpop.eup %4223  ;;  %v1911_v35 = vadd.f32 %v1910_v58, %v1909_v59  ;;  %v5829_v34 = vpack.c.bf16 %v2179_v54, %v2178_v55  ;;  %4243 = vpow2.f32 %v3603_v27  ;;  %v1900_v24 = vadd.f32 %v1899_v6, %v5801_v26 }
 0x2b1   : > { %v4226_v4 = vpop.eup %4225  ;;  %v1886_v11 = vrot.slane %v1885_v52, 1  ;;  %v5831_v1 = vadd.f32 %v1914_v49, %v1755_v13  ;;  %v1756_v32 = vmul.f32 %v4224_v30, %v5722_v45  ;;  %4245 = vpow2.f32 %v3604_v60  ;;  %v4598_v45 = vld [vmem:[%s4853_s30 + $0x10] ss:$40 sps:$4 sm:$0xff]  }
 0x2b2   : > { %v4228_v19 = vpop.eup %4227  ;;  %v1912_v5 = vrot.slane %v1911_v35, 1  ;;  %v2158_v47 = vadd.f32 1.0, %v4226_v4  ;;  %4247 = vpow2.f32 %v3613_v25  ;;  %3639 = vmatmul.mubr.msk.bf16.vlgmr.msra.gmra.mrb[40].mxu0 %vm869_vm1, %v5829_v34  ;;  %3643 = vmatmul.mubr.msk.bf16.vlgmr.msra.gmra.mrb[56].mxu1 %vm869_vm1, %v5829_v34  ;;  %v6716_v26 = vmov 0  }
 0x2b3   : > { %v4230_v55 = vpop.eup %4229  ;;  %v1887_v59 = vadd.f32 %v1886_v11, %v1885_v52  ;;  %v5839_v48 = vadd.f32 %v1927_v17, %v1756_v32  ;;  %v1525_v20 = vadd.f32 1.0, %v4228_v19  ;;  %4249 = vpow2.f32 %v3614_v21  ;;  %2349 = vmatpush1.bf16.msra.mxu0 %v4598_v45  ;;  %2244 = vmatprep.mubr.bf16.mxu0 %v6716_v26  ;;  %v4604_v52 = vld [vmem:[%s4853_s30 + $0x68] ss:$40 sps:$4 sm:$0xff]   ;;  %v4607_v45 = vld [vmem:[%s4853_s30 + $0x104] ss:$40 sps:$4 sm:$0xff]  }
 0x2b4   : > { %v4232_v27 = vpop.eup %4231  ;;  %v1913_v60 = vadd.f32 %v1912_v5, %v1911_v35  ;;  %4251 = vrcp.f32 %v2158_v47  ;;  %v2161_v25 = vadd.f32 1.0, %v4230_v55  ;;  %2317 = vmatprep.mubr.bf16.mxu1 %v6716_v26  ;;  %2350 = vmatprep.subr.bf16.mxu0 %v4599_v41  ;;  %v6717_v11 = vcombine.low %v5575_v51, %v5579_v61  ;;  %v4605_v5 = vld [vmem:[%s4853_s30 + $0xb0] ss:$40 sps:$4 sm:$0xff]   ;;  %v4606_v47 = vld [vmem:[%s4853_s30 + $0xbc] ss:$40 sps:$4 sm:$0xff]  }
 0x2b5   : > { %v4234_v56 = vpop.eup %4233  ;;  %v1952_v6 = vcombine.low %v1874_v16, %v1887_v59  ;;  %4253 = vrcp.f32 %v1525_v20  ;;  %v1526_v31 = vadd.f32 1.0, %v4232_v27  ;;  %2422 = vmatpush1.bf16.msra.mxu1 %v4600_v50  ;;  %v1807_v59 = vld [vmem:[#allocation2] ss:$2 sm:$0xff]  ;;  %v4610_v50 = vld [vmem:[%s4853_s30 + $0x100] ss:$40 sps:$4 sm:$0xff]  }
 0x2b6   : > { %v4236_v21 = vpop.eup %4235  ;;  %v1953_v36 = vcombine.low %v1900_v24, %v1913_v60  ;;  %4255 = vrcp.f32 %v2161_v25  ;;  %v2159_v42 = vadd.f32 1.0, %v4234_v56  ;;  %2423 = vmatprep.subr.bf16.mxu1 %v4601_v18  ;;  %v1990_v32 = vrot.slane %v6717_v11, %v5450_v23  ;;  %v4608_v27 = vld [vmem:[%s4853_s30 + $0xb8] ss:$40 sps:$4 sm:$0xff]   ;;  %v4609_v25 = vld [vmem:[%s4853_s30 + $0x10c] ss:$40 sps:$4 sm:$0xff]  }
 0x2b7   : > { %v4238_v0 = vpop.eup %4237  ;;  %v1974_v15 = vrot.slane %v1952_v6, %v5450_v23  ;;  %4257 = vrcp.f32 %v1526_v31  ;;  %v1535_v7 = vadd.f32 1.0, %v4236_v21  ;;  %2351 = vmatpush1.bf16.msra.mxu0 %v4602_v37  ;;  %v4611_v18 = vld [vmem:[%s4853_s30 + $0x108] ss:$40 sps:$4 sm:$0xff]  }
 0x2b8   : > { %v4240_v39 = vpop.eup %4239  ;;  %v1981_v49 = vrot.slane %v1953_v36, %v5450_v23  ;;  %4259 = vrcp.f32 %v2159_v42  ;;  %v1536_v46 = vadd.f32 1.0, %v4238_v0  ;;  %2352 = vmatprep.subr.bf16.mxu0 %v4603_v29  ;;  %v2184_v36 = vmul.f32 %v5826_v63, %v5717_v38  ;;  %v4612_v0 = vld [vmem:[%s4853_s30 + $0x24] ss:$40 sps:$4 sm:$0xff]  }
 0x2b9   : > { %v4242_v58 = vpop.eup %4241  ;;  %4261 = vrcp.f32 %v1535_v7  ;;  %v1545_v54 = vadd.f32 1.0, %v4240_v39  ;;  %2424 = vmatpush1.bf16.msra.mxu1 %v4604_v52 }
 0x2ba   : > { %v4244_v17 = vpop.eup %4243  ;;  %v1983_v13 = vcombine.low %v1974_v15, %v1981_v49  ;;  %4263 = vrcp.f32 %v1536_v46  ;;  %v1546_v30 = vadd.f32 1.0, %v4242_v58  ;;  %3640 = vmatmul.mubr.msk.bf16.gmra.mrb[44].mxu0 %vm869_vm1, %v5823_v10  ;;  %3644 = vmatmul.mubr.msk.bf16.gmra.mrb[60].mxu1 %vm869_vm1, %v5823_v10 }
 0x2bb   : > { %v4246_v16 = vpop.eup %4245  ;;  %4265 = vrcp.f32 %v1545_v54  ;;  %v1555_v35 = vadd.f32 1.0, %v4244_v17  ;;  %2254 = vmatprep.mubr.bf16.mxu0 %v6716_v26  ;;  %2327 = vmatprep.mubr.bf16.mxu1 %v6716_v26 }
 0x2bc   : > { %v4248_v4 = vpop.eup %4247  ;;  %v1997_v19 = vrot.slane %v1983_v13, %v5450_v23  ;;  %4267 = vrcp.f32 %v1546_v30  ;;  %v1556_v24 = vadd.f32 1.0, %v4246_v16  ;;  %2353 = vmatpush1.bf16.msra.mxu0 %v4605_v5  ;;  %2425 = vmatprep.subr.bf16.mxu1 %v4606_v47 }
 0x2bd   : > { %v4250_v55 = vpop.eup %4249  ;;  %4269 = vrcp.f32 %v1555_v35  ;;  %v1565_v20 = vadd.f32 1.0, %v4248_v4  ;;  %2354 = vmatprep.subr.bf16.mxu0 %v4607_v45  ;;  %2426 = vmatpush1.bf16.msra.mxu1 %v4608_v27  ;;  %v4613_v27 = vld [vmem:[%s4853_s30 + $0x20] ss:$40 sps:$4 sm:$0xff]  }
 0x2be   : > { %v4252_v51 = vpop.eup %4251  ;;  %v1998_v61 = vcombine.low %v1990_v32, %v1997_v19  ;;  %4271 = vrcp.f32 %v1556_v24  ;;  %v1566_v60 = vadd.f32 1.0, %v4250_v55  ;;  %2427 = vmatprep.subr.bf16.mxu1 %v4609_v25  ;;  %v4615_v25 = vld [vmem:[%s4853_s30 + $0x70] ss:$40 sps:$4 sm:$0xff]  }
 0x2bf   : > { %v4254_v41 = vpop.eup %4253  ;;  %4273 = vrcp.f32 %v1565_v20  ;;  %v2182_v39 = vmul.f32 %v4252_v51, %v5737_v12 }
 0x2c0   : > { %v4256_v56 = vpop.eup %4255  ;;  %v2016_v6 = vadd.f32 %v1998_v61, %v1807_v59  ;;  %v1765_v31 = vmul.f32 %v4254_v41, %v5744_v2  ;;  %4275 = vrcp.f32 %v1566_v60  ;;  %2355 = vmatpush1.bf16.msra.mxu0 %v4610_v50  ;;  %v4614_v61 = vld [vmem:[%s4853_s30 + $0x74] ss:$40 sps:$4 sm:$0xff]   ;;  %v6718_v50 = vlaneseq }
 0x2c1   : > { %v4258_v21 = vpop.eup %4257  ;;  %v2185_v42 = vmul.f32 %v4256_v56, %v5748_v33  ;;  %2428 = vmatpush1.bf16.msra.mxu1 %v4611_v18  ;;  %2494 = vmatprep.subr.bf16.mxu0 %v4612_v0  ;;  %v4616_v56 = vld [vmem:[%s4853_s30 + $0xc4] ss:$40 sps:$4 sm:$0xff]   ;;  %v4618_v18 = vld [vmem:[%s4853_s30 + $0x114] ss:$40 sps:$4 sm:$0xff]   ;;  %v4619_v0 = vld [vmem:[%s4853_s30 + $0x110] ss:$40 sps:$4 sm:$0xff]  }
 0x2c2   : > { %v4260_v15 = vpop.eup %4259  ;;  %2018 = vst [vmem:[#allocation2] ss:$2 sm:$0xff] %v2016_v6  ;;  %v1916_v7 = vadd.f32 %v5831_v1, %v1765_v31  ;;  %v1766_v37 = vmul.f32 %v4258_v21, %v5752_v8  ;;  %v1809_v6 = vld [vmem:[#allocation2 + $0x10] ss:$2 sm:$0x3]  ;;  %vm5921_vm2 = vcmp.lt.s32.totalorder %v6718_v50, 256 }
 0x2c3   : > { %v4262_v2 = vpop.eup %4261  ;;  %v5878_v49 = vpack.c.bf16 %v2185_v42, %v2184_v36  ;;  %v2183_v46 = vmul.f32 %v4260_v15, %v5759_v3  ;;  %v6719_v21 = vmov 0  ;;  %v4617_v42 = vld [vmem:[%s4853_s30 + $0xc0] ss:$40 sps:$4 sm:$0xff]   ;;  %s376_s30 = scalar_lea.vmem %s6616_s5, %s3455_s27 }
 0x2c4   : > { %v4264_v38 = vpop.eup %4263  ;;  %v1929_v33 = vadd.f32 %v5839_v48, %v1766_v37  ;;  %v1775_v63 = vmul.f32 %v4262_v2, %v5763_v9  ;;  %v6720_v21 = vsel %vm5921_vm2, 4294967295, %v6719_v21  ;;  %v6722_v37 = vld [vmem:[#allocation4_spill] sm:$0xff] }
 0x2c5   : > { %v4266_v29 = vpop.eup %4265  ;;  %v5883_v58 = vpack.c.bf16 %v2183_v46, %v2182_v39  ;;  %v1776_v54 = vmul.f32 %v4264_v38, %v5767_v43  ;;  %6721 = vst [vmem:[#allocation16_spill] sm:$0xff] %v6720_v21  ;;  %v6724_v38 = vld [vmem:[#allocation6_spill] sm:$0xff]  ;;  %v6729_v21 = vld [vmem:[#allocation11_spill] sm:$0xff] }
 0x2c6   : > { %v4268_v1 = vpop.eup %4267  ;;  %v1917_v52 = vadd.f32 %v1916_v7, %v1775_v63  ;;  %v1785_v8 = vmul.f32 %v4266_v29, %v5779_v14  ;;  %v6725_v63 = vld [vmem:[#allocation7_spill] sm:$0xff] }
 0x2c7   : > { %v4270_v17 = vpop.eup %4269  ;;  %v1930_v12 = vadd.f32 %v1929_v33, %v1776_v54  ;;  %v1786_v13 = vmul.f32 %v4268_v1, %v5783_v44  ;;  %3641 = vmatmul.mubr.msk.bf16.gmra.mrb[48].mxu0 %vm869_vm1, %v5883_v58  ;;  %3645 = vmatmul.mubr.msk.bf16.gmra.mrb[64].mxu1 %vm869_vm1, %v5883_v58 }
 0x2c8   : > { %v4272_v3 = vpop.eup %4271  ;;  %v1918_v9 = vadd.f32 %v1917_v52, %v1785_v8  ;;  %v1795_v48 = vmul.f32 %v4270_v17, %v5787_v57  ;;  %2264 = vmatprep.mubr.bf16.mxu0 %v6716_v26  ;;  %2337 = vmatprep.mubr.bf16.mxu1 %v6716_v26 }
 0x2c9   : > { %v4274_v43 = vpop.eup %4273  ;;  %v1931_v14 = vadd.f32 %v1930_v12, %v1786_v13  ;;  %v1796_v30 = vmul.f32 %v4272_v3, %v5791_v40 }
 0x2ca   : > { %v4276_v16 = vpop.eup %4275  ;;  %v1919_v44 = vadd.f32 %v1918_v9, %v1795_v48  ;;  %v1805_v35 = vmul.f32 %v4274_v43, %v5795_v28 }
 0x2cb   : > { %v1932_v4 = vadd.f32 %v1931_v14, %v1796_v30  ;;  %v1806_v11 = vmul.f32 %v4276_v16, %v5799_v53 }
 0x2cc   : > { %v1920_v32 = vadd.f32 %v1919_v44, %v1805_v35 }
 0x2cd   : > { %v1933_v19 = vadd.f32 %v1932_v4, %v1806_v11 }
 0x2ce   : > { %v1921_v24 = vrot.slane %v1920_v32, 4 }
 0x2cf   : > { %v1934_v5 = vrot.slane %v1933_v19, 4  ;;  %3642 = vmatmul.mubr.msk.bf16.gmra.mrb[52].mxu0 %vm869_vm1, %v5878_v49  ;;  %3646 = vmatmul.mubr.msk.bf16.gmra.mrb[68].mxu1 %vm869_vm1, %v5878_v49 }
 0x2d0   : > { %v1922_v57 = vadd.f32 %v1921_v24, %v1920_v32  ;;  %2380 = vmatprep.mubr.bf16.mxu0 %v6716_v26  ;;  %2453 = vmatprep.mubr.bf16.mxu1 %v6716_v26 }
 0x2d1   : > { %v1935_v40 = vadd.f32 %v1934_v5, %v1933_v19 }
 0x2d2   : > { %v1923_v28 = vrot.slane %v1922_v57, 2 }
 0x2d3   : > { %v1936_v53 = vrot.slane %v1935_v40, 2 }
 0x2d4   : > { %v1924_v47 = vadd.f32 %v1923_v28, %v1922_v57 }
 0x2d5   : > { %v1937_v55 = vadd.f32 %v1936_v53, %v1935_v40 }
 0x2d6   : > { %v1925_v59 = vrot.slane %v1924_v47, 1 }
 0x2d7   : > { %v1938_v20 = vrot.slane %v1937_v55, 1  ;;  %3647 = vmatmul.mubr.msk.bf16.vlgmr.msra.gmra.mrb[56].mxu0 %vm869_vm1, %v5829_v34  ;;  %3651 = vmatmul.mubr.msk.bf16.vlgmr.msra.gmra.mrb[72].mxu1 %vm869_vm1, %v5829_v34 }
 0x2d8   : > { %v1926_v45 = vadd.f32 %v1925_v59, %v1924_v47  ;;  %2495 = vmatpush1.bf16.msra.mxu0 %v4613_v27  ;;  %2390 = vmatprep.mubr.bf16.mxu0 %v6716_v26 }
 0x2d9   : > { %v1939_v51 = vadd.f32 %v1938_v20, %v1937_v55  ;;  %2463 = vmatprep.mubr.bf16.mxu1 %v6716_v26  ;;  %2496 = vmatprep.subr.bf16.mxu0 %v4614_v61 }
 0x2db   : > { %v1999_v60 = vcombine.low %v1926_v45, %v1939_v51 }
 0x2dc   : > { %2497 = vmatpush1.bf16.msra.mxu0 %v4615_v25 }
 0x2dd   : > { %v2006_v41 = vrot.slane %v1999_v60, %v5450_v23  ;;  %2498 = vmatprep.subr.bf16.mxu0 %v4616_v56 }
 0x2df   : > { %v2013_v31 = vrot.slane %v2006_v41, %v5450_v23  ;;  %3648 = vmatmul.mubr.msk.bf16.gmra.mrb[60].mxu0 %vm869_vm1, %v5823_v10  ;;  %3652 = vmatmul.mubr.msk.bf16.gmra.mrb[76].mxu1 %vm869_vm1, %v5823_v10 }
 0x2e0   : > { %2400 = vmatprep.mubr.bf16.mxu0 %v6716_v26  ;;  %2473 = vmatprep.mubr.bf16.mxu1 %v6716_v26 }
 0x2e1   : > { %v2017_v36 = vadd.f32 %v2013_v31, %v1809_v6  ;;  %2499 = vmatpush1.bf16.msra.mxu0 %v4617_v42 }
 0x2e2   : > { %2500 = vmatprep.subr.bf16.mxu0 %v4618_v18 }
 0x2e3   : > { %2023 = vst.msk [vmem:[#allocation2 + $0x10] ss:$2 sm:$0x3] %vm5921_vm2, %v2017_v36 }
 0x2e5   : > { %2501 = vmatpush1.bf16.msra.mxu0 %v4619_v0 }
 0x2e7   : > { %3649 = vmatmul.mubr.msk.bf16.gmra.mrb[64].mxu0 %vm869_vm1, %v5883_v58  ;;  %3653 = vmatmul.mubr.msk.bf16.gmra.mrb[80].mxu1 %vm869_vm1, %v5883_v58 }
 0x2e8   : > { %2410 = vmatprep.mubr.bf16.mxu0 %v6716_v26  ;;  %2483 = vmatprep.mubr.bf16.mxu1 %v6716_v26 }
 0x2ef   : > { %3650 = vmatmul.mubr.msk.bf16.gmra.mrb[68].mxu0 %vm869_vm1, %v5878_v49  ;;  %3654 = vmatmul.mubr.msk.bf16.gmra.mrb[84].mxu1 %vm869_vm1, %v5878_v49 }
 0x2f0   : > { %2526 = vmatprep.mubr.bf16.mxu0 %v6716_v26 }
 0x2f7   : > { %3655 = vmatmul.mubr.msk.bf16.vlgmr.msra.gmra.mrb[72].mxu0 %vm869_vm1, %v5829_v34  ;;  %v6723_v34 = vld [vmem:[#allocation5_spill] sm:$0xff] }
 0x2f8   : > { %2536 = vmatprep.mubr.bf16.mxu0 %v6716_v26 }
 0x2ff   : > { %3656 = vmatmul.mubr.msk.bf16.gmra.mrb[76].mxu0 %vm869_vm1, %v5823_v10 }
 0x300   : > { %2546 = vmatprep.mubr.bf16.mxu0 %v6716_v26 }
 0x307   : > { %3657 = vmatmul.mubr.msk.bf16.gmra.mrb[80].mxu0 %vm869_vm1, %v5883_v58 }
 0x308   : > { %2556 = vmatprep.mubr.bf16.mxu0 %v6716_v26 }
 0x30f   : > { %3658 = vmatmul.mubr.msk.bf16.gmra.mrb[84].mxu0 %vm869_vm1, %v5878_v49 }
 0x385   : > { %v2236_v15 = vpop.f32.mrb[40].mxu0  ;;  %v2309_v7 = vpop.f32.mrb[56].mxu1 }
 0x386   : > { %v5955_v2 = vadd.f32 %v2236_v15, %v6722_v37  ;;  %v5958_v39 = vadd.f32 %v2309_v7, %v6723_v34  ;;  %v2238_v46 = vpop.f32.mrb[41].mxu0  ;;  %v2311_v10 = vpop.f32.mrb[57].mxu1 }
 0x387   : > { %v5961_v33 = vadd.f32 %v2238_v46, %v6724_v38  ;;  %v5964_v29 = vadd.f32 %v2311_v10, %v6725_v63  ;;  %v2240_v26 = vpop.f32.mrb[42].mxu0  ;;  %v2313_v58 = vpop.f32.mrb[58].mxu1 }
 0x388   : > { %v3659_v49 = vmul.f32 -1.442695, %v5955_v2  ;;  %v3661_v54 = vmul.f32 -1.442695, %v5958_v39  ;;  %v5969_v1 = vadd.f32 %v2240_v26, %v6722_v37  ;;  %v5972_v52 = vadd.f32 %v2313_v58, %v6723_v34  ;;  %v2242_v8 = vpop.f32.mrb[43].mxu0  ;;  %v2315_v17 = vpop.f32.mrb[59].mxu1 }
 0x389   : > { %v3660_v12 = vmul.f32 -1.442695, %v5961_v33  ;;  %v3662_v13 = vmul.f32 -1.442695, %v5964_v29  ;;  %v5977_v3 = vadd.f32 %v2242_v8, %v6724_v38  ;;  %v5980_v9 = vadd.f32 %v2315_v17, %v6725_v63 }
 0x38a   : > { %4277 = vpow2.f32 %v3659_v49  ;;  %v3669_v48 = vmul.f32 -1.442695, %v5969_v1  ;;  %v3671_v43 = vmul.f32 -1.442695, %v5972_v52 }
 0x38b   : > { %4279 = vpow2.f32 %v3661_v54  ;;  %v3670_v14 = vmul.f32 -1.442695, %v5977_v3  ;;  %v3672_v30 = vmul.f32 -1.442695, %v5980_v9 }
 0x38c   : > { %4281 = vpow2.f32 %v3660_v12 }
 0x38d   : > { %4283 = vpow2.f32 %v3662_v13  ;;  %v2246_v16 = vpop.f32.mrb[44].mxu0  ;;  %v2319_v44 = vpop.f32.mrb[60].mxu1 }
 0x38e   : > { %4285 = vpow2.f32 %v3669_v48  ;;  %v5987_v35 = vadd.f32 %v2246_v16, %v6722_v37  ;;  %v5990_v4 = vadd.f32 %v2319_v44, %v6723_v34  ;;  %v2248_v11 = vpop.f32.mrb[45].mxu0  ;;  %v2321_v32 = vpop.f32.mrb[61].mxu1 }
 0x38f   : > { %4287 = vpow2.f32 %v3671_v43  ;;  %v5993_v19 = vadd.f32 %v2248_v11, %v6724_v38  ;;  %v5996_v24 = vadd.f32 %v2321_v32, %v6725_v63  ;;  %v2250_v5 = vpop.f32.mrb[46].mxu0  ;;  %v2323_v57 = vpop.f32.mrb[62].mxu1 }
 0x390   : > { %4289 = vpow2.f32 %v3670_v14  ;;  %v3679_v40 = vmul.f32 -1.442695, %v5987_v35  ;;  %v3681_v28 = vmul.f32 -1.442695, %v5990_v4  ;;  %v6001_v53 = vadd.f32 %v2250_v5, %v6722_v37  ;;  %v2252_v47 = vpop.f32.mrb[47].mxu0  ;;  %v2325_v55 = vpop.f32.mrb[63].mxu1 }
 0x391   : > { %4291 = vpow2.f32 %v3672_v30  ;;  %v3680_v59 = vmul.f32 -1.442695, %v5993_v19  ;;  %v3682_v20 = vmul.f32 -1.442695, %v5996_v24  ;;  %v6007_v0 = vadd.f32 %v2323_v57, %v6723_v34 }
 0x392   : > { %4293 = vpow2.f32 %v3679_v40  ;;  %v3689_v45 = vmul.f32 -1.442695, %v6001_v53  ;;  %v6010_v15 = vadd.f32 %v2252_v47, %v6724_v38  ;;  %v6013_v43 = vadd.f32 %v2325_v55, %v6725_v63 }
 0x393   : > { %4295 = vpow2.f32 %v3681_v28  ;;  %v3691_v44 = vmul.f32 -1.442695, %v6007_v0 }
 0x394   : > { %v4278_v27 = vpop.eup %4277  ;;  %4297 = vpow2.f32 %v3680_v59  ;;  %v3690_v11 = vmul.f32 -1.442695, %v6010_v15 }
 0x395   : > { %v4280_v51 = vpop.eup %4279  ;;  %v2807_v61 = vadd.f32 1.0, %v4278_v27  ;;  %4299 = vpow2.f32 %v3682_v20 }
 0x396   : > { %v4282_v60 = vpop.eup %4281  ;;  %v2809_v25 = vadd.f32 1.0, %v4280_v51  ;;  %4301 = vpow2.f32 %v3689_v45 }
 0x397   : > { %v4284_v41 = vpop.eup %4283  ;;  %4303 = vrcp.f32 %v2807_v61  ;;  %v2808_v56 = vadd.f32 1.0, %v4282_v60 }
 0x398   : > { %v4286_v6 = vpop.eup %4285  ;;  %4305 = vrcp.f32 %v2809_v25  ;;  %v2810_v31 = vadd.f32 1.0, %v4284_v41  ;;  %v3692_v25 = vmul.f32 -1.442695, %v6013_v43 }
 0x399   : > { %v4288_v50 = vpop.eup %4287  ;;  %4307 = vrcp.f32 %v2808_v56  ;;  %v2817_v36 = vadd.f32 1.0, %v4286_v6 }
 0x39a   : > { %v4290_v42 = vpop.eup %4289  ;;  %4309 = vrcp.f32 %v2810_v31  ;;  %v2819_v18 = vadd.f32 1.0, %v4288_v50  ;;  %v2256_v7 = vpop.f32.mrb[48].mxu0 }
 0x39b   : > { %v2329_v46 = vpop.f32.mrb[64].mxu1  ;;  %v4292_v10 = vpop.eup %4291  ;;  %4311 = vrcp.f32 %v2817_v36  ;;  %v2818_v26 = vadd.f32 1.0, %v4290_v42  ;;  %v6018_v40 = vadd.f32 %v2256_v7, %v6722_v37 }
 0x39c   : > { %v2258_v58 = vpop.f32.mrb[49].mxu0  ;;  %v2331_v49 = vpop.f32.mrb[65].mxu1  ;;  %4313 = vrcp.f32 %v2819_v18  ;;  %v2820_v8 = vadd.f32 1.0, %v4292_v10  ;;  %v6021_v28 = vadd.f32 %v2329_v46, %v6723_v34 }
 0x39d   : > { %v4294_v54 = vpop.eup %4293  ;;  %v2260_v17 = vpop.f32.mrb[50].mxu0  ;;  %4315 = vrcp.f32 %v2818_v26  ;;  %v6024_v59 = vadd.f32 %v2258_v58, %v6724_v38  ;;  %v6027_v20 = vadd.f32 %v2331_v49, %v6725_v63  ;;  %v3699_v50 = vmul.f32 -1.442695, %v6018_v40 }
 0x39e   : > { %v2333_v12 = vpop.f32.mrb[66].mxu1  ;;  %v4296_v13 = vpop.eup %4295  ;;  %v2827_v48 = vadd.f32 1.0, %v4294_v54  ;;  %4317 = vrcp.f32 %v2820_v8  ;;  %v6030_v51 = vadd.f32 %v2260_v17, %v6722_v37  ;;  %v3701_v36 = vmul.f32 -1.442695, %v6021_v28 }
 0x39f   : > { %v2262_v14 = vpop.f32.mrb[51].mxu0  ;;  %v4298_v30 = vpop.eup %4297  ;;  %v2829_v16 = vadd.f32 1.0, %v4296_v13  ;;  %v6033_v61 = vadd.f32 %v2333_v12, %v6723_v34  ;;  %v3700_v46 = vmul.f32 -1.442695, %v6024_v59  ;;  %v3702_v10 = vmul.f32 -1.442695, %v6027_v20 }
 0x3a0   : > { %v2335_v32 = vpop.f32.mrb[67].mxu1  ;;  %v4300_v5 = vpop.eup %4299  ;;  %4319 = vrcp.f32 %v2827_v48  ;;  %v2828_v57 = vadd.f32 1.0, %v4298_v30  ;;  %v6037_v41 = vadd.f32 %v2262_v14, %v6724_v38  ;;  %v3709_v17 = vmul.f32 -1.442695, %v6030_v51 }
 0x3a1   : > { %v4302_v47 = vpop.eup %4301  ;;  %4321 = vrcp.f32 %v2829_v16  ;;  %v2830_v55 = vadd.f32 1.0, %v4300_v5  ;;  %v6048_v26 = vadd.f32 %v2335_v32, %v6725_v63  ;;  %v3711_v12 = vmul.f32 -1.442695, %v6033_v61 }
 0x3a2   : > { %v4304_v45 = vpop.eup %4303  ;;  %4323 = vrcp.f32 %v2828_v57  ;;  %v2837_v27 = vadd.f32 1.0, %v4302_v47  ;;  %v2266_v56 = vpop.f32.mrb[52].mxu0 }
 0x3a3   : > { %v4306_v60 = vpop.eup %4305  ;;  %4325 = vrcp.f32 %v2830_v55  ;;  %v2339_v6 = vpop.f32.mrb[68].mxu1  ;;  %v3047_v8 = vmul.f32 %v4304_v45, %v5955_v2 }
 0x3a4   : > { %v4308_v31 = vpop.eup %4307  ;;  %4327 = vrcp.f32 %v2837_v27  ;;  %v6041_v42 = vpop.f32.mrb[53].mxu0  ;;  %v3049_v30 = vmul.f32 %v4306_v60, %v5958_v39  ;;  %v6069_v5 = vadd.f32 %v2339_v6, %v6723_v34  ;;  %v3712_v6 = vmul.f32 -1.442695, %v6048_v26 }
 0x3a5   : > { %v6043_v18 = vpop.f32.mrb[69].mxu1  ;;  %v4310_v7 = vpop.eup %4309  ;;  %4329 = vpow2.f32 %v3691_v44  ;;  %v3710_v44 = vmul.f32 -1.442695, %v6037_v41  ;;  %v3048_v47 = vmul.f32 %v4308_v31, %v5961_v33 }
 0x3a6   : > { %v6050_v58 = vpop.f32.mrb[54].mxu0  ;;  %v6052_v49 = vpop.f32.mrb[70].mxu1  ;;  %4331 = vpow2.f32 %v3690_v11  ;;  %v6066_v11 = vadd.f32 %v2266_v56, %v6722_v37  ;;  %v3050_v45 = vmul.f32 %v4310_v7, %v5964_v29 }
 0x3a7   : > { %v4312_v54 = vpop.eup %4311  ;;  %v6057_v13 = vpop.f32.mrb[55].mxu0  ;;  %4333 = vpow2.f32 %v3692_v25 }
 0x3a8   : > { %v6059_v48 = vpop.f32.mrb[71].mxu1  ;;  %v4314_v14 = vpop.eup %4313  ;;  %v3057_v16 = vmul.f32 %v4312_v54, %v5969_v1  ;;  %4335 = vpow2.f32 %v3699_v50  ;;  %v3719_v29 = vmul.f32 -1.442695, %v6066_v11  ;;  %v3721_v54 = vmul.f32 -1.442695, %v6069_v5 }
 0x3a9   : > { %v4316_v32 = vpop.eup %4315  ;;  %v3059_v2 = vmul.f32 %v4314_v14, %v5972_v52  ;;  %4337 = vpow2.f32 %v3701_v36 }
 0x3aa   : > { %v4318_v57 = vpop.eup %4317  ;;  %v3131_v55 = vadd.f32 %v3057_v16, %v3047_v8  ;;  %v3058_v39 = vmul.f32 %v4316_v32, %v5977_v3  ;;  %4339 = vpow2.f32 %v3700_v46  ;;  %v6077_v50 = vpop.f32.mrb[56].mxu0 }
 0x3ab   : > { %v4320_v1 = vpop.eup %4319  ;;  %v3157_v27 = vadd.f32 %v3059_v2, %v3049_v30  ;;  %v3060_v52 = vmul.f32 %v4318_v57, %v5980_v9  ;;  %4341 = vpow2.f32 %v3702_v10  ;;  %v6079_v33 = vpop.f32.mrb[72].mxu1 }
 0x3ac   : > { %v4322_v60 = vpop.eup %4321  ;;  %v3144_v25 = vadd.f32 %v3058_v39, %v3048_v47  ;;  %v3067_v56 = vmul.f32 %v4320_v1, %v5987_v35  ;;  %4343 = vpow2.f32 %v3709_v17  ;;  %v6083_v9 = vpop.f32.mrb[57].mxu0 }
 0x3ad   : > { %v4324_v3 = vpop.eup %4323  ;;  %v3170_v31 = vadd.f32 %v3060_v52, %v3050_v45  ;;  %v3069_v36 = vmul.f32 %v4322_v60, %v5990_v4  ;;  %v6085_v7 = vpop.f32.mrb[73].mxu1  ;;  %4345 = vpow2.f32 %v3711_v12 }
 0x3ae   : > { %v4326_v46 = vpop.eup %4325  ;;  %v3132_v35 = vadd.f32 %v3131_v55, %v3067_v56  ;;  %v3068_v10 = vmul.f32 %v4324_v3, %v5993_v19  ;;  %v6089_v8 = vpop.f32.mrb[58].mxu0  ;;  %4347 = vpow2.f32 %v3710_v44 }
 0x3af   : > { %v6091_v14 = vpop.f32.mrb[74].mxu1  ;;  %v4328_v30 = vpop.eup %4327  ;;  %v6093_v4 = vadd.f32 %v3157_v27, %v3069_v36  ;;  %v3070_v17 = vmul.f32 %v4326_v46, %v5996_v24  ;;  %4349 = vpow2.f32 %v3712_v6  ;;  %v6115_v36 = vadd.f32 %v6041_v42, %v6724_v38 }
 0x3b0   : > { %v6096_v16 = vpop.f32.mrb[59].mxu0  ;;  %v6098_v32 = vpop.f32.mrb[75].mxu1  ;;  %v6100_v57 = vadd.f32 %v3144_v25, %v3068_v10  ;;  %v3077_v19 = vmul.f32 %v4328_v30, %v6001_v53  ;;  %4351 = vpow2.f32 %v3719_v29  ;;  %v6131_v42 = vadd.f32 %v6050_v58, %v6722_v37 }
 0x3b1   : > { %v4330_v2 = vpop.eup %4329  ;;  %v6103_v47 = vadd.f32 %v3170_v31, %v3070_v17  ;;  %4353 = vpow2.f32 %v3721_v54  ;;  %v6123_v54 = vadd.f32 %v6043_v18, %v6725_v63  ;;  %v6137_v18 = vadd.f32 %v6052_v49, %v6723_v34 }
 0x3b2   : > { %v4332_v12 = vpop.eup %4331  ;;  %v2839_v55 = vadd.f32 1.0, %v4330_v2  ;;  %v6105_v1 = vadd.f32 %v3132_v35, %v3077_v19  ;;  %v6107_v60 = vpop.f32.mrb[60].mxu0  ;;  %v6146_v37 = vadd.f32 %v6059_v48, %v6725_v63  ;;  %v6151_v34 = vadd.f32 %v6077_v50, %v5285_v62 }
 0x3b3   : > { %v4334_v39 = vpop.eup %4333  ;;  %v2838_v24 = vadd.f32 1.0, %v4332_v12  ;;  %v6109_v53 = vpop.f32.mrb[76].mxu1 }
 0x3b4   : > { %v4336_v44 = vpop.eup %4335  ;;  %4355 = vrcp.f32 %v2839_v55  ;;  %v2840_v45 = vadd.f32 1.0, %v4334_v39  ;;  %v6111_v6 = vpop.f32.mrb[61].mxu0 }
 0x3b5   : > { %v4338_v27 = vpop.eup %4337  ;;  %4357 = vrcp.f32 %v2838_v24  ;;  %v2847_v52 = vadd.f32 1.0, %v4336_v44  ;;  %v6117_v29 = vpop.f32.mrb[77].mxu1  ;;  %v6141_v24 = vadd.f32 %v6057_v13, %v6724_v38  ;;  %v3729_v13 = vmul.f32 -1.442695, %v6131_v42 }
 0x3b6   : > { %v4340_v25 = vpop.eup %4339  ;;  %4359 = vrcp.f32 %v2840_v45  ;;  %v2849_v56 = vadd.f32 1.0, %v4338_v27  ;;  %v6119_v46 = vpop.f32.mrb[62].mxu0  ;;  %v3720_v27 = vmul.f32 -1.442695, %v6115_v36 }
 0x3b7   : > { %v4342_v3 = vpop.eup %4341  ;;  %4361 = vrcp.f32 %v2847_v52  ;;  %v2848_v31 = vadd.f32 1.0, %v4340_v25  ;;  %v6125_v30 = vpop.f32.mrb[78].mxu1  ;;  %v3722_v25 = vmul.f32 -1.442695, %v6123_v54  ;;  %v3730_v50 = vmul.f32 -1.442695, %v6141_v24 }
 0x3b8   : > { %v4344_v35 = vpop.eup %4343  ;;  %4363 = vrcp.f32 %v2849_v56  ;;  %v2850_v10 = vadd.f32 1.0, %v4342_v3  ;;  %v6127_v17 = vpop.f32.mrb[63].mxu0  ;;  %v6156_v56 = vadd.f32 %v6079_v33, %v5288_v22  ;;  %v3732_v33 = vmul.f32 -1.442695, %v6146_v37 }
 0x3b9   : > { %v4346_v2 = vpop.eup %4345  ;;  %4365 = vrcp.f32 %v2848_v31  ;;  %v2857_v19 = vadd.f32 1.0, %v4344_v35  ;;  %v6133_v12 = vpop.f32.mrb[79].mxu1  ;;  %v3731_v35 = vmul.f32 -1.442695, %v6137_v18 }
 0x3ba   : > { %v4348_v55 = vpop.eup %4347  ;;  %4367 = vrcp.f32 %v2850_v10  ;;  %v2859_v39 = vadd.f32 1.0, %v4346_v2  ;;  %v6158_v63 = vpop.f32.mrb[64].mxu0 }
 0x3bb   : > { %v4350_v44 = vpop.eup %4349  ;;  %4369 = vrcp.f32 %v2857_v19  ;;  %v2858_v45 = vadd.f32 1.0, %v4348_v55  ;;  %v6160_v48 = vpop.f32.mrb[80].mxu1  ;;  %v6726_v55 = vld [vmem:[#allocation10_spill] sm:$0xff] }
 0x3bc   : > { %v4352_v58 = vpop.eup %4351  ;;  %4371 = vrcp.f32 %v2859_v39  ;;  %v2860_v52 = vadd.f32 1.0, %v4350_v44  ;;  %v6164_v10 = vpop.f32.mrb[65].mxu0  ;;  %v6170_v39 = vadd.f32 %v6083_v9, %v6726_v55 }
 0x3bd   : > { %v4354_v38 = vpop.eup %4353  ;;  %4373 = vrcp.f32 %v2858_v45  ;;  %v2867_v49 = vadd.f32 1.0, %v4352_v58  ;;  %v6172_v44 = vpop.f32.mrb[81].mxu1 }
 0x3be   : > { %v4356_v3 = vpop.eup %4355  ;;  %4375 = vrcp.f32 %v2860_v52  ;;  %v2869_v31 = vadd.f32 1.0, %v4354_v38  ;;  %6727 = vst [vmem:[#allocation18_spill] sm:$0xff] %v6172_v44  ;;  %v6174_v45 = vpop.f32.mrb[66].mxu0  ;;  %v3663_v38 = vmul.f32 -1.442695, %v6151_v34 }
 0x3bf   : > { %v4358_v2 = vpop.eup %4357  ;;  %v3079_v19 = vmul.f32 %v4356_v3, %v6007_v0  ;;  %4377 = vrcp.f32 %v2867_v49  ;;  %6728 = vst [vmem:[#allocation19_spill] sm:$0xff] %v6174_v45  ;;  %v6180_v0 = vadd.f32 %v6085_v7, %v6729_v21  ;;  %v6182_v49 = vpop.f32.mrb[82].mxu1  ;;  %v3665_v45 = vmul.f32 -1.442695, %v6156_v56 }
 0x3c0   : > { %v4360_v58 = vpop.eup %4359  ;;  %v3078_v52 = vmul.f32 %v4358_v2, %v6010_v15  ;;  %4379 = vrcp.f32 %v2869_v31  ;;  %6730 = vst [vmem:[#allocation8_spill] sm:$0xff] %v6182_v49  ;;  %v6184_v3 = vpop.f32.mrb[67].mxu0  ;;  %v6195_v49 = vadd.f32 %v6089_v8, %v5285_v62 }
 0x3c1   : > { %6731 = vst [vmem:[#allocation9_spill] sm:$0xff] %v6184_v3  ;;  %v4362_v9 = vpop.eup %4361  ;;  %v3159_v23 = vadd.f32 %v6093_v4, %v3079_v19  ;;  %v3080_v44 = vmul.f32 %v4360_v58, %v6013_v43  ;;  %4381 = vpow2.f32 %v3720_v27  ;;  %v6189_v15 = vpop.f32.mrb[83].mxu1  ;;  %v3664_v27 = vmul.f32 -1.442695, %v6170_v39 }
 0x3c2   : > { %v4364_v31 = vpop.eup %4363  ;;  %v3146_v2 = vadd.f32 %v6100_v57, %v3078_v52  ;;  %v3087_v7 = vmul.f32 %v4362_v9, %v6018_v40  ;;  %4383 = vpow2.f32 %v3722_v25  ;;  %v6204_v40 = vadd.f32 %v6091_v14, %v5288_v22 }
 0x3c3   : > { %v4366_v3 = vpop.eup %4365  ;;  %v3172_v4 = vadd.f32 %v6103_v47, %v3080_v44  ;;  %v3089_v43 = vmul.f32 %v4364_v31, %v6021_v28  ;;  %4385 = vpow2.f32 %v3729_v13  ;;  %v6209_v28 = vadd.f32 %v6096_v16, %v6726_v55  ;;  %v6211_v47 = vpop.f32.mrb[68].mxu0 }
 0x3c4   : > { %v4368_v19 = vpop.eup %4367  ;;  %v3134_v58 = vadd.f32 %v6105_v1, %v3087_v7  ;;  %v3088_v57 = vmul.f32 %v4366_v3, %v6024_v59  ;;  %4387 = vpow2.f32 %v3731_v35  ;;  %v6213_v13 = vpop.f32.mrb[84].mxu1  ;;  %v3666_v14 = vmul.f32 -1.442695, %v6180_v0 }
 0x3c5   : > { %v4370_v8 = vpop.eup %4369  ;;  %v3160_v25 = vadd.f32 %v3159_v23, %v3089_v43  ;;  %v3090_v52 = vmul.f32 %v4368_v19, %v6027_v20  ;;  %4389 = vpow2.f32 %v3730_v50  ;;  %v6217_v44 = vpop.f32.mrb[69].mxu0  ;;  %v3673_v3 = vmul.f32 -1.442695, %v6195_v49 }
 0x3c6   : > { %v4372_v1 = vpop.eup %4371  ;;  %v3147_v59 = vadd.f32 %v3146_v2, %v3088_v57  ;;  %v3097_v35 = vmul.f32 %v4370_v8, %v6030_v51  ;;  %4391 = vpow2.f32 %v3732_v33  ;;  %v6219_v23 = vpop.f32.mrb[85].mxu1  ;;  %v3675_v7 = vmul.f32 -1.442695, %v6204_v40 }
 0x3c7   : > { %v4374_v20 = vpop.eup %4373  ;;  %v3173_v50 = vadd.f32 %v3172_v4, %v3090_v52  ;;  %v3099_v16 = vmul.f32 %v4372_v1, %v6033_v61  ;;  %4393 = vpow2.f32 %v3663_v38  ;;  %v6223_v9 = vpop.f32.mrb[70].mxu0  ;;  %v3674_v57 = vmul.f32 -1.442695, %v6209_v28 }
 0x3c8   : > { %v6225_v31 = vpop.f32.mrb[86].mxu1  ;;  %v4376_v2 = vpop.eup %4375  ;;  %v3135_v51 = vadd.f32 %v3134_v58, %v3097_v35  ;;  %v3098_v33 = vmul.f32 %v4374_v20, %v6037_v41  ;;  %4395 = vpow2.f32 %v3665_v45 }
 0x3c9   : > { %v6229_v43 = vpop.f32.mrb[71].mxu0  ;;  %v6231_v19 = vpop.f32.mrb[87].mxu1  ;;  %v3161_v61 = vadd.f32 %v3160_v25, %v3099_v16  ;;  %v3100_v38 = vmul.f32 %v4376_v2, %v6048_v26  ;;  %4397 = vpow2.f32 %v3664_v27 }
 0x3ca   : > { %v4378_v4 = vpop.eup %4377  ;;  %v6235_v52 = vadd.f32 %v3147_v59, %v3098_v33  ;;  %4399 = vpow2.f32 %v3666_v14  ;;  %v6245_v59 = vpop.f32.mrb[72].mxu0 }
 0x3cb   : > { %v4380_v8 = vpop.eup %4379  ;;  %v3107_v58 = vmul.f32 %v4378_v4, %v6066_v11  ;;  %v6238_v45 = vadd.f32 %v3173_v50, %v3100_v38  ;;  %4401 = vpow2.f32 %v3673_v3  ;;  %v6249_v50 = vadd.f32 %v6098_v32, %v6729_v21 }
 0x3cc   : > { %v4382_v41 = vpop.eup %4381  ;;  %v3109_v1 = vmul.f32 %v4380_v8, %v6069_v5  ;;  %4403 = vpow2.f32 %v3675_v7  ;;  %v6251_v5 = vpop.f32.mrb[73].mxu0 }
 0x3cd   : > { %v4384_v35 = vpop.eup %4383  ;;  %v6241_v20 = vadd.f32 %v3135_v51, %v3107_v58  ;;  %v2868_v25 = vadd.f32 1.0, %v4382_v41  ;;  %4405 = vpow2.f32 %v3674_v57  ;;  %6732 = vst [vmem:[#allocation20_spill] sm:$0xff] %v6251_v5  ;;  %v6255_v51 = vadd.f32 %v6107_v60, %v5285_v62  ;;  %v6257_v33 = vpop.f32.mrb[74].mxu0 }
 0x3ce   : > { %v4386_v26 = vpop.eup %4385  ;;  %v6243_v27 = vadd.f32 %v3161_v61, %v3109_v1  ;;  %v2870_v16 = vadd.f32 1.0, %v4384_v35  ;;  %6733 = vst [vmem:[#allocation32_spill] sm:$0xff] %v6257_v33  ;;  %v6261_v61 = vadd.f32 %v6109_v53, %v5288_v22  ;;  %v6263_v32 = vpop.f32.mrb[75].mxu0  ;;  %v3676_v60 = vmul.f32 -1.442695, %v6249_v50 }
 0x3cf   : > { %v4388_v11 = vpop.eup %4387  ;;  %4407 = vrcp.f32 %v2868_v25  ;;  %v2877_v14 = vadd.f32 1.0, %v4386_v26  ;;  %6734 = vst [vmem:[#allocation21_spill] sm:$0xff] %v6263_v32  ;;  %v3683_v35 = vmul.f32 -1.442695, %v6255_v51  ;;  %v6269_v25 = vadd.f32 %v6111_v6, %v6726_v55 }
 0x3d0   : > { %v4390_v3 = vpop.eup %4389  ;;  %4409 = vrcp.f32 %v2870_v16  ;;  %v2879_v2 = vadd.f32 1.0, %v4388_v11  ;;  %v3685_v16 = vmul.f32 -1.442695, %v6261_v61  ;;  %v6274_v11 = vadd.f32 %v6117_v29, %v6729_v21 }
 0x3d1   : > { %v4392_v7 = vpop.eup %4391  ;;  %4411 = vrcp.f32 %v2877_v14  ;;  %v2878_v4 = vadd.f32 1.0, %v4390_v3  ;;  %v6282_v6 = vadd.f32 %v6125_v30, %v5288_v22  ;;  %v6288_v29 = vadd.f32 %v6127_v17, %v6726_v55 }
 0x3d2   : > { %v4394_v38 = vpop.eup %4393  ;;  %4413 = vrcp.f32 %v2879_v2  ;;  %v2880_v57 = vadd.f32 1.0, %v4392_v7  ;;  %v6278_v2 = vadd.f32 %v6119_v46, %v5285_v62  ;;  %v6284_v7 = vpop.f32.mrb[76].mxu0  ;;  %v3684_v30 = vmul.f32 -1.442695, %v6269_v25 }
 0x3d3   : > { %v4396_v8 = vpop.eup %4395  ;;  %4415 = vrcp.f32 %v2878_v4  ;;  %v2811_v58 = vadd.f32 1.0, %v4394_v38  ;;  %6735 = vst [vmem:[#allocation22_spill] sm:$0xff] %v6284_v7 }
 0x3d4   : > { %v4398_v41 = vpop.eup %4397  ;;  %4417 = vrcp.f32 %v2880_v57  ;;  %v2813_v1 = vadd.f32 1.0, %v4396_v8  ;;  %v6292_v57 = vadd.f32 %v6133_v12, %v6729_v21  ;;  %v6294_v8 = vpop.f32.mrb[77].mxu0  ;;  %v6306_v12 = vadd.f32 %v6160_v48, %v5288_v22 }
 0x3d5   : > { %v4400_v53 = vpop.eup %4399  ;;  %4419 = vrcp.f32 %v2811_v58  ;;  %v2812_v26 = vadd.f32 1.0, %v4398_v41  ;;  %6736 = vst [vmem:[#allocation23_spill] sm:$0xff] %v6294_v8  ;;  %v6299_v41 = vadd.f32 %v6158_v63, %v5285_v62  ;;  %v3693_v63 = vmul.f32 -1.442695, %v6278_v2 }
 0x3d6   : > { %v4402_v14 = vpop.eup %4401  ;;  %4421 = vrcp.f32 %v2813_v1  ;;  %v2814_v3 = vadd.f32 1.0, %v4400_v53  ;;  %v6301_v1 = vpop.f32.mrb[78].mxu0  ;;  %v3695_v8 = vmul.f32 -1.442695, %v6282_v6  ;;  %v3696_v7 = vmul.f32 -1.442695, %v6292_v57 }
 0x3d7   : > { %v4404_v4 = vpop.eup %4403  ;;  %4423 = vrcp.f32 %v2812_v26  ;;  %v2821_v38 = vadd.f32 1.0, %v4402_v14  ;;  %6737 = vst [vmem:[#allocation24_spill] sm:$0xff] %v6301_v1  ;;  %v3686_v26 = vmul.f32 -1.442695, %v6274_v11  ;;  %v6308_v14 = vpop.f32.mrb[79].mxu0 }
 0x3d8   : > { %v4406_v46 = vpop.eup %4405  ;;  %4425 = vrcp.f32 %v2814_v3  ;;  %v2823_v58 = vadd.f32 1.0, %v4404_v4  ;;  %6738 = vst [vmem:[#allocation26_spill] sm:$0xff] %v6308_v14 }
 0x3d9   : > { %v4408_v53 = vpop.eup %4407  ;;  %4427 = vrcp.f32 %v2821_v38  ;;  %v2822_v17 = vadd.f32 1.0, %v4406_v46  ;;  %v3694_v46 = vmul.f32 -1.442695, %v6288_v29 }
 0x3da   : > { %v4410_v3 = vpop.eup %4409  ;;  %v3108_v4 = vmul.f32 %v4408_v53, %v6115_v36  ;;  %4429 = vrcp.f32 %v2823_v58  ;;  %v3703_v36 = vmul.f32 -1.442695, %v6299_v41 }
 0x3db   : > { %v4412_v1 = vpop.eup %4411  ;;  %v3110_v38 = vmul.f32 %v4410_v3, %v6123_v54  ;;  %4431 = vrcp.f32 %v2822_v17  ;;  %v6322_v54 = vmul.f32 -1.442695, %v6306_v12 }
 0x3dc   : > { %v4414_v48 = vpop.eup %4413  ;;  %v3149_v32 = vadd.f32 %v6235_v52, %v3108_v4  ;;  %v3117_v14 = vmul.f32 %v4412_v1, %v6131_v42  ;;  %4433 = vpow2.f32 %v3676_v60  ;;  %v6328_v42 = vadd.f32 %v6164_v10, %v6726_v55  ;;  %v6330_v52 = vpop.f32.mrb[80].mxu0  ;;  %v6741_v10 = vld [vmem:[#allocation19_spill] sm:$0xff] }
 0x3dd   : > { %v4416_v58 = vpop.eup %4415  ;;  %v3175_v53 = vadd.f32 %v6238_v45, %v3110_v38  ;;  %v3119_v33 = vmul.f32 %v4414_v48, %v6137_v18  ;;  %4435 = vpow2.f32 %v3683_v35  ;;  %v6739_v35 = vld [vmem:[#allocation18_spill] sm:$0xff]  ;;  %v6342_v4 = vadd.f32 %v6741_v10, %v5285_v62 }
 0x3de   : > { %v4418_v17 = vpop.eup %4417  ;;  %v3137_v3 = vadd.f32 %v6241_v20, %v3117_v14  ;;  %v3118_v5 = vmul.f32 %v4416_v58, %v6141_v24  ;;  %4437 = vpow2.f32 %v3685_v16  ;;  %v6336_v1 = vadd.f32 %v6739_v35, %v6729_v21  ;;  %v6338_v20 = vpop.f32.mrb[81].mxu0 }
 0x3df   : > { %v4420_v60 = vpop.eup %4419  ;;  %v3163_v45 = vadd.f32 %v6243_v27, %v3119_v33  ;;  %v3120_v18 = vmul.f32 %v4418_v17, %v6146_v37  ;;  %4439 = vpow2.f32 %v3684_v30  ;;  %6740 = vst [vmem:[#allocation27_spill] sm:$0xff] %v6338_v20  ;;  %v6344_v38 = vpop.f32.mrb[82].mxu0 }
 0x3e0   : > { %v4422_v24 = vpop.eup %4421  ;;  %v3138_v16 = vrot.slane %v3137_v3, 4  ;;  %v3150_v14 = vadd.f32 %v3149_v32, %v3118_v5  ;;  %4441 = vpow2.f32 %v3686_v26  ;;  %6742 = vst [vmem:[#allocation28_spill] sm:$0xff] %v6344_v38  ;;  %v3051_v30 = vmul.f32 %v4420_v60, %v6151_v34  ;;  %v6347_v48 = vpop.f32.mrb[83].mxu0 }
 0x3e1   : > { %v4424_v27 = vpop.eup %4423  ;;  %v3164_v33 = vrot.slane %v3163_v45, 4  ;;  %v3176_v37 = vadd.f32 %v3175_v53, %v3120_v18  ;;  %4443 = vpow2.f32 %v3693_v63  ;;  %6743 = vst [vmem:[#allocation29_spill] sm:$0xff] %v6347_v48  ;;  %v3053_v5 = vmul.f32 %v4422_v24, %v6156_v56 }
 0x3e2   : > { %v6349_v58 = vpop.eup %4425  ;;  %v3139_v17 = vadd.f32 %v3138_v16, %v3137_v3  ;;  %v3151_v35 = vrot.slane %v3150_v14, 4  ;;  %4445 = vpow2.f32 %v3695_v8  ;;  %v3052_v38 = vmul.f32 %v4424_v27, %v6170_v39 }
 0x3e3   : > { %v4428_v32 = vpop.eup %4427  ;;  %v3165_v26 = vadd.f32 %v3164_v33, %v3163_v45  ;;  %v3177_v10 = vrot.slane %v3176_v37, 4  ;;  %4447 = vpow2.f32 %v3694_v46  ;;  %v6358_v46 = vpop.f32.mrb[84].mxu0 }
 0x3e4   : > { %v4430_v20 = vpop.eup %4429  ;;  %v3140_v53 = vrot.slane %v3139_v17, 2  ;;  %v3152_v18 = vadd.f32 %v3151_v35, %v3150_v14  ;;  %v3061_v34 = vmul.f32 %v4428_v32, %v6195_v49  ;;  %4449 = vpow2.f32 %v3696_v7  ;;  %v6362_v33 = vpop.f32.mrb[85].mxu0 }
 0x3e5   : > { %v4432_v63 = vpop.eup %4431  ;;  %v3166_v60 = vrot.slane %v3165_v26, 2  ;;  %v3178_v48 = vadd.f32 %v3177_v10, %v3176_v37  ;;  %v3063_v3 = vmul.f32 %v4430_v20, %v6204_v40  ;;  %4451 = vpow2.f32 %v3703_v36 }
 0x3e6   : > { %v4434_v56 = vpop.eup %4433  ;;  %v3141_v8 = vadd.f32 %v3140_v53, %v3139_v17  ;;  %v3153_v24 = vrot.slane %v3152_v18, 2  ;;  %v6355_v45 = vadd.f32 %v3061_v34, %v3051_v30  ;;  %v3062_v39 = vmul.f32 %v4432_v63, %v6209_v28  ;;  %v6366_v30 = vpop.f32.mrb[86].mxu0 }
 0x3e7   : > { %v4436_v16 = vpop.eup %4435  ;;  %v3167_v14 = vadd.f32 %v3166_v60, %v3165_v26  ;;  %v3179_v27 = vrot.slane %v3178_v48, 2  ;;  %v6360_v49 = vadd.f32 %v3063_v3, %v3053_v5  ;;  %v2824_v7 = vadd.f32 1.0, %v4434_v56  ;;  %v6368_v26 = vpop.f32.mrb[87].mxu0 }
 0x3e8   : > { %v4438_v37 = vpop.eup %4437  ;;  %v3142_v40 = vrot.slane %v3141_v8, 1  ;;  %v3154_v36 = vadd.f32 %v3153_v24, %v3152_v18  ;;  %v6364_v20 = vadd.f32 %v3062_v39, %v3052_v38  ;;  %v2831_v17 = vadd.f32 1.0, %v4436_v16 }
 0x3e9   : > { %v4440_v35 = vpop.eup %4439  ;;  %v3168_v28 = vrot.slane %v3167_v14, 1  ;;  %v3180_v32 = vadd.f32 %v3179_v27, %v3178_v48  ;;  %4453 = vrcp.f32 %v2824_v7  ;;  %v2833_v10 = vadd.f32 1.0, %v4438_v37  ;;  %v6744_v48 = vld [vmem:[#allocation8_spill] sm:$0xff]  ;;  %v6745_v37 = vld [vmem:[#allocation9_spill] sm:$0xff] }
 0x3ea   : > { %v4442_v5 = vpop.eup %4441  ;;  %v3143_v53 = vadd.f32 %v3142_v40, %v3141_v8  ;;  %v3155_v34 = vrot.slane %v3154_v36, 1  ;;  %4455 = vrcp.f32 %v2831_v17  ;;  %v2832_v63 = vadd.f32 1.0, %v4440_v35 }
 0x3eb   : > { %v4444_v60 = vpop.eup %4443  ;;  %v3169_v3 = vadd.f32 %v3168_v28, %v3167_v14  ;;  %v3181_v18 = vrot.slane %v3180_v32, 1  ;;  %4457 = vrcp.f32 %v2833_v10  ;;  %v2834_v38 = vadd.f32 1.0, %v4442_v5 }
 0x3ec   : > { %v4446_v56 = vpop.eup %4445  ;;  %v3156_v24 = vadd.f32 %v3155_v34, %v3154_v36  ;;  %4459 = vrcp.f32 %v2832_v63  ;;  %v2841_v39 = vadd.f32 1.0, %v4444_v60  ;;  %v6372_v16 = vadd.f32 %v6744_v48, %v5288_v22  ;;  %v6746_v34 = vld [vmem:[#allocation25_spill] sm:$0xff] }
 0x3ed   : > { %v4448_v27 = vpop.eup %4447  ;;  %v3182_v7 = vadd.f32 %v3181_v18, %v3180_v32  ;;  %4461 = vrcp.f32 %v2834_v38  ;;  %v2843_v8 = vadd.f32 1.0, %v4446_v56  ;;  %v6376_v40 = vadd.f32 %v6745_v37, %v6726_v55 }
 0x3ee   : > { %v4450_v14 = vpop.eup %4449  ;;  %v3271_v17 = vcombine.low %v3143_v53, %v3156_v24  ;;  %4463 = vrcp.f32 %v2841_v39  ;;  %v2842_v35 = vadd.f32 1.0, %v4448_v27  ;;  %v6380_v36 = vadd.f32 %v6189_v15, %v6729_v21 }
 0x3ef   : > { %v4452_v28 = vpop.eup %4451  ;;  %v3272_v10 = vcombine.low %v3169_v3, %v3182_v7  ;;  %4465 = vrcp.f32 %v2843_v8  ;;  %v2844_v5 = vadd.f32 1.0, %v4450_v14  ;;  %v6384_v32 = vadd.f32 %v6211_v47, %v5285_v62 }
 0x3f0   : > { %v6387_v63 = vrot.slane %v3271_v17, %v6746_v34  ;;  %4467 = vrcp.f32 %v2842_v35  ;;  %v2851_v60 = vadd.f32 1.0, %v4452_v28  ;;  %v3704_v53 = vmul.f32 -1.442695, %v6328_v42 }
 0x3f1   : > { %v6391_v18 = vrot.slane %v3272_v10, %v6746_v34  ;;  %4469 = vrcp.f32 %v2844_v5  ;;  %v3706_v15 = vmul.f32 -1.442695, %v6336_v1  ;;  %v6396_v3 = vadd.f32 %v6213_v13, %v5288_v22 }
 0x3f2   : > { %4471 = vrcp.f32 %v2851_v60  ;;  %v3713_v47 = vmul.f32 -1.442695, %v6342_v4  ;;  %v3715_v38 = vmul.f32 -1.442695, %v6372_v16  ;;  %v3714_v56 = vmul.f32 -1.442695, %v6376_v40 }
 0x3f3   : > { %v4454_v24 = vpop.eup %4453  ;;  %v3303_v39 = vcombine.low %v6387_v63, %v6391_v18  ;;  %4473 = vpow2.f32 %v6322_v54  ;;  %v3716_v48 = vmul.f32 -1.442695, %v6380_v36  ;;  %v3723_v27 = vmul.f32 -1.442695, %v6384_v32 }
 0x3f4   : > { %v4456_v7 = vpop.eup %4455  ;;  %v3054_v13 = vmul.f32 %v6349_v58, %v6180_v0  ;;  %v3064_v8 = vmul.f32 %v4454_v24, %v6249_v50  ;;  %4475 = vpow2.f32 %v3704_v53  ;;  %v6411_v37 = vadd.f32 %v6217_v44, %v6726_v55 }
 0x3f5   : > { %v4458_v14 = vpop.eup %4457  ;;  %v3071_v17 = vmul.f32 %v4456_v7, %v6255_v51  ;;  %4477 = vpow2.f32 %v3706_v15  ;;  %v3725_v54 = vmul.f32 -1.442695, %v6396_v3  ;;  %v6417_v35 = vadd.f32 %v6219_v23, %v6729_v21 }
 0x3f6   : > { %v4460_v28 = vpop.eup %4459  ;;  %v3222_v10 = vadd.f32 %v3064_v8, %v3054_v13  ;;  %v3073_v0 = vmul.f32 %v4458_v14, %v6261_v61  ;;  %4479 = vpow2.f32 %v3713_v47  ;;  %v6422_v50 = vadd.f32 %v6223_v9, %v5285_v62 }
 0x3f7   : > { %v4462_v44 = vpop.eup %4461  ;;  %v3184_v58 = vadd.f32 %v6355_v45, %v3071_v17  ;;  %v3072_v51 = vmul.f32 %v4460_v28, %v6269_v25  ;;  %4481 = vpow2.f32 %v3715_v38  ;;  %v6428_v5 = vadd.f32 %v6225_v31, %v5288_v22 }
 0x3f8   : > { %v4464_v23 = vpop.eup %4463  ;;  %v3210_v60 = vadd.f32 %v6360_v49, %v3073_v0  ;;  %v3074_v61 = vmul.f32 %v4462_v44, %v6274_v11  ;;  %4483 = vpow2.f32 %v3714_v56  ;;  %v3724_v53 = vmul.f32 -1.442695, %v6411_v37 }
 0x3f9   : > { %v4466_v62 = vpop.eup %4465  ;;  %v3197_v9 = vadd.f32 %v6364_v20, %v3072_v51  ;;  %v3081_v45 = vmul.f32 %v4464_v23, %v6278_v2  ;;  %4485 = vpow2.f32 %v3716_v48  ;;  %v3726_v25 = vmul.f32 -1.442695, %v6417_v35 }
 0x3fa   : > { %v4468_v15 = vpop.eup %4467  ;;  %v3223_v47 = vadd.f32 %v3222_v10, %v3074_v61  ;;  %v3083_v22 = vmul.f32 %v4466_v62, %v6282_v6  ;;  %4487 = vpow2.f32 %v3723_v27  ;;  %v3733_v31 = vmul.f32 -1.442695, %v6422_v50 }
 0x3fb   : > { %v4470_v49 = vpop.eup %4469  ;;  %v3185_v11 = vadd.f32 %v3184_v58, %v3081_v45  ;;  %v3082_v38 = vmul.f32 %v4468_v15, %v6288_v29  ;;  %4489 = vpow2.f32 %v3725_v54  ;;  %v3735_v56 = vmul.f32 -1.442695, %v6428_v5  ;;  %v6747_v45 = vld [vmem:[#allocation14_spill] sm:$0xff]  ;;  %v6748_v15 = vld [vmem:[#allocation15_spill] sm:$0xff] }
 0x3fc   : > { %v4472_v20 = vpop.eup %4471  ;;  %v6440_v24 = vadd.f32 %v3210_v60, %v3083_v22  ;;  %v3084_v2 = vmul.f32 %v4470_v49, %v6292_v57  ;;  %4491 = vpow2.f32 %v3724_v53 }
 0x3fd   : > { %v4474_v48 = vpop.eup %4473  ;;  %v6443_v7 = vadd.f32 %v3197_v9, %v3082_v38  ;;  %v3091_v6 = vmul.f32 %v4472_v20, %v6299_v41  ;;  %4493 = vpow2.f32 %v3726_v25  ;;  %v6452_v41 = vadd.f32 %v6229_v43, %v6726_v55 }
 0x3fe   : > { %v4476_v27 = vpop.eup %4475  ;;  %v6446_v13 = vadd.f32 %v3223_v47, %v3084_v2  ;;  %v2853_v8 = vadd.f32 1.0, %v4474_v48  ;;  %4495 = vpow2.f32 %v3733_v31  ;;  %v6457_v9 = vadd.f32 %v6231_v19, %v6729_v21  ;;  %v6749_v47 = vld [vmem:[#allocation20_spill] sm:$0xff]  ;;  %v6751_v21 = vld [vmem:[#allocation21_spill] sm:$0xff]  ;;  %v6753_v48 = vld [vmem:[#allocation23_spill] sm:$0xff] }
 0x3ff   : > { %v4478_v29 = vpop.eup %4477  ;;  %v6448_v14 = vadd.f32 %v3185_v11, %v3091_v6  ;;  %v2852_v17 = vadd.f32 1.0, %v4476_v27  ;;  %4497 = vpow2.f32 %v3735_v56  ;;  %v3734_v62 = vmul.f32 -1.442695, %v6452_v41  ;;  %v6750_v11 = vld [vmem:[#allocation32_spill] sm:$0xff] }
 0x400   : > { %v4480_v54 = vpop.eup %4479  ;;  %4499 = vrcp.f32 %v2853_v8  ;;  %v2854_v57 = vadd.f32 1.0, %v4478_v29  ;;  %v6461_v25 = vadd.f32 %v6245_v59, %v6747_v45  ;;  %v6465_v22 = vadd.f32 %v6749_v47, %v6748_v15  ;;  %v6752_v59 = vld [vmem:[#allocation22_spill] sm:$0xff] }
 0x401   : > { %v4482_v28 = vpop.eup %4481  ;;  %4501 = vrcp.f32 %v2852_v17  ;;  %v2861_v10 = vadd.f32 1.0, %v4480_v54  ;;  %v6469_v38 = vadd.f32 %v6750_v11, %v6747_v45  ;;  %v6473_v19 = vadd.f32 %v6751_v21, %v6748_v15  ;;  %v6754_v17 = vld [vmem:[#allocation24_spill] sm:$0xff] }
 0x402   : > { %v4484_v0 = vpop.eup %4483  ;;  %4503 = vrcp.f32 %v2854_v57  ;;  %v2863_v44 = vadd.f32 1.0, %v4482_v28  ;;  %v6477_v2 = vadd.f32 %v6752_v59, %v6747_v45  ;;  %v6481_v6 = vadd.f32 %v6753_v48, %v6748_v15  ;;  %v6756_v48 = vld [vmem:[#allocation27_spill] sm:$0xff] }
 0x403   : > { %v4486_v58 = vpop.eup %4485  ;;  %4505 = vrcp.f32 %v2861_v10  ;;  %v2862_v51 = vadd.f32 1.0, %v4484_v0  ;;  %v3736_v29 = vmul.f32 -1.442695, %v6457_v9  ;;  %v6486_v54 = vadd.f32 %v6754_v17, %v6747_v45 }
 0x404   : > { %v4488_v23 = vpop.eup %4487  ;;  %4507 = vrcp.f32 %v2863_v44  ;;  %v2864_v60 = vadd.f32 1.0, %v4486_v58  ;;  %v3667_v10 = vmul.f32 -1.442695, %v6461_v25  ;;  %v3668_v0 = vmul.f32 -1.442695, %v6465_v22 }
 0x405   : > { %v4490_v61 = vpop.eup %4489  ;;  %4509 = vrcp.f32 %v2862_v51  ;;  %v2871_v53 = vadd.f32 1.0, %v4488_v23  ;;  %v3677_v51 = vmul.f32 -1.442695, %v6469_v38  ;;  %v3678_v23 = vmul.f32 -1.442695, %v6473_v19 }
 0x406   : > { %v4492_v55 = vpop.eup %4491  ;;  %4511 = vrcp.f32 %v2864_v60  ;;  %v2873_v43 = vadd.f32 1.0, %v4490_v61 }
 0x407   : > { %v4494_v31 = vpop.eup %4493  ;;  %4513 = vrcp.f32 %v2871_v53  ;;  %v2872_v49 = vadd.f32 1.0, %v4492_v55  ;;  %v3687_v53 = vmul.f32 -1.442695, %v6477_v2  ;;  %v3688_v55 = vmul.f32 -1.442695, %v6481_v6 }
 0x408   : > { %v4496_v56 = vpop.eup %4495  ;;  %4515 = vrcp.f32 %v2873_v43  ;;  %v2874_v20 = vadd.f32 1.0, %v4494_v31 }
 0x409   : > { %v4498_v27 = vpop.eup %4497  ;;  %4517 = vrcp.f32 %v2872_v49  ;;  %v2881_v8 = vadd.f32 1.0, %v4496_v56 }
 0x40a   : > { %v4500_v57 = vpop.eup %4499  ;;  %4519 = vrcp.f32 %v2874_v20  ;;  %v2883_v28 = vadd.f32 1.0, %v4498_v27  ;;  %v6515_v27 = vadd.f32 %v6756_v48, %v6748_v15 }
 0x40b   : > { %v4502_v44 = vpop.eup %4501  ;;  %v3093_v58 = vmul.f32 %v4500_v57, %v6306_v12  ;;  %4521 = vrcp.f32 %v2881_v8  ;;  %v3697_v12 = vmul.f32 -1.442695, %v6486_v54 }
 0x40c   : > { %v4504_v60 = vpop.eup %4503  ;;  %v3092_v61 = vmul.f32 %v4502_v44, %v6328_v42  ;;  %4523 = vrcp.f32 %v2883_v28  ;;  %v6755_v42 = vld [vmem:[#allocation26_spill] sm:$0xff] }
 0x40d   : > { %v4506_v43 = vpop.eup %4505  ;;  %v3212_v47 = vadd.f32 %v6440_v24, %v3093_v58  ;;  %v3094_v31 = vmul.f32 %v4504_v60, %v6336_v1  ;;  %4525 = vpow2.f32 %v3734_v62  ;;  %v6503_v56 = vadd.f32 %v6755_v42, %v6748_v15 }
 0x40e   : > { %v4508_v49 = vpop.eup %4507  ;;  %v3199_v11 = vadd.f32 %v6443_v7, %v3092_v61  ;;  %v3101_v21 = vmul.f32 %v4506_v43, %v6342_v4  ;;  %4527 = vpow2.f32 %v3736_v29  ;;  %v6509_v1 = vadd.f32 %v6330_v52, %v6747_v45 }
 0x40f   : > { %v4510_v20 = vpop.eup %4509  ;;  %v3225_v59 = vadd.f32 %v6446_v13, %v3094_v31  ;;  %v3103_v24 = vmul.f32 %v4508_v49, %v6372_v16  ;;  %4529 = vpow2.f32 %v3667_v10  ;;  %v6757_v16 = vld [vmem:[#allocation28_spill] sm:$0xff]  ;;  %v3708_v60 = vmul.f32 -1.442695, %v6515_v27 }
 0x410   : > { %v4512_v62 = vpop.eup %4511  ;;  %v3187_v7 = vadd.f32 %v6448_v14, %v3101_v21  ;;  %v3102_v4 = vmul.f32 %v4510_v20, %v6376_v40  ;;  %4531 = vpow2.f32 %v3668_v0  ;;  %v6520_v17 = vadd.f32 %v6757_v16, %v6747_v45  ;;  %v6758_v16 = vld [vmem:[#allocation29_spill] sm:$0xff] }
 0x411   : > { %v4514_v8 = vpop.eup %4513  ;;  %v3213_v29 = vadd.f32 %v3212_v47, %v3103_v24  ;;  %v3104_v13 = vmul.f32 %v4512_v62, %v6380_v36  ;;  %4533 = vpow2.f32 %v3677_v51  ;;  %v3698_v40 = vmul.f32 -1.442695, %v6503_v56 }
 0x412   : > { %v4516_v52 = vpop.eup %4515  ;;  %v3200_v57 = vadd.f32 %v3199_v11, %v3102_v4  ;;  %v3111_v14 = vmul.f32 %v4514_v8, %v6384_v32  ;;  %4535 = vpow2.f32 %v3678_v23  ;;  %v3707_v44 = vmul.f32 -1.442695, %v6509_v1 }
 0x413   : > { %v4518_v28 = vpop.eup %4517  ;;  %v3226_v10 = vadd.f32 %v3225_v59, %v3104_v13  ;;  %v3113_v0 = vmul.f32 %v4516_v52, %v6396_v3  ;;  %4537 = vpow2.f32 %v3687_v53  ;;  %v3717_v23 = vmul.f32 -1.442695, %v6520_v17 }
 0x414   : > { %v4520_v36 = vpop.eup %4519  ;;  %v3188_v58 = vadd.f32 %v3187_v7, %v3111_v14  ;;  %v3112_v51 = vmul.f32 %v4518_v28, %v6411_v37  ;;  %4539 = vpow2.f32 %v3688_v55  ;;  %v6538_v52 = vadd.f32 %v6758_v16, %v6748_v15 }
 0x415   : > { %v4522_v61 = vpop.eup %4521  ;;  %v3214_v43 = vadd.f32 %v3213_v29, %v3113_v0  ;;  %v3114_v32 = vmul.f32 %v4520_v36, %v6417_v35  ;;  %4541 = vpow2.f32 %v3697_v12 }
 0x416   : > { %v4524_v47 = vpop.eup %4523  ;;  %v6530_v31 = vadd.f32 %v3200_v57, %v3112_v51  ;;  %v3121_v3 = vmul.f32 %v4522_v61, %v6422_v50  ;;  %4543 = vpow2.f32 %v3698_v40  ;;  %v6542_v40 = vadd.f32 %v6358_v46, %v6747_v45 }
 0x417   : > { %v4526_v53 = vpop.eup %4525  ;;  %v6533_v49 = vadd.f32 %v3226_v10, %v3114_v32  ;;  %v3123_v37 = vmul.f32 %v4524_v47, %v6428_v5  ;;  %4545 = vpow2.f32 %v3707_v44  ;;  %v6546_v51 = vadd.f32 %v6362_v33, %v6748_v15 }
 0x418   : > { %v4528_v55 = vpop.eup %4527  ;;  %v3189_v11 = vadd.f32 %v3188_v58, %v3121_v3  ;;  %v2882_v21 = vadd.f32 1.0, %v4526_v53  ;;  %4547 = vpow2.f32 %v3708_v60  ;;  %v6551_v46 = vadd.f32 %v6366_v30, %v6747_v45 }
 0x419   : > { %v4530_v35 = vpop.eup %4529  ;;  %v3215_v12 = vadd.f32 %v3214_v43, %v3123_v37  ;;  %v2884_v42 = vadd.f32 1.0, %v4528_v55  ;;  %4549 = vpow2.f32 %v3717_v23  ;;  %v3718_v43 = vmul.f32 -1.442695, %v6538_v52 }
 0x41a   : > { %v4532_v20 = vpop.eup %4531  ;;  %4551 = vrcp.f32 %v2882_v21  ;;  %v2815_v59 = vadd.f32 1.0, %v4530_v35  ;;  %v3190_v7 = vrot.slane %v3189_v11, 4  ;;  %v3727_v47 = vmul.f32 -1.442695, %v6542_v40 }
 0x41b   : > { %v4534_v24 = vpop.eup %4533  ;;  %4553 = vrcp.f32 %v2884_v42  ;;  %v2816_v50 = vadd.f32 1.0, %v4532_v20  ;;  %v3216_v4 = vrot.slane %v3215_v12, 4  ;;  %v6556_v3 = vadd.f32 %v6368_v26, %v6748_v15 }
 0x41c   : > { %v4536_v62 = vpop.eup %4535  ;;  %4555 = vrcp.f32 %v2815_v59  ;;  %v2825_v5 = vadd.f32 1.0, %v4534_v24  ;;  %v3191_v10 = vadd.f32 %v3190_v7, %v3189_v11  ;;  %v3728_v30 = vmul.f32 -1.442695, %v6546_v51 }
 0x41d   : > { %v4538_v48 = vpop.eup %4537  ;;  %4557 = vrcp.f32 %v2816_v50  ;;  %v2826_v8 = vadd.f32 1.0, %v4536_v62  ;;  %v3217_v0 = vadd.f32 %v3216_v4, %v3215_v12  ;;  %v3737_v12 = vmul.f32 -1.442695, %v6551_v46 }
 0x41e   : > { %v4540_v29 = vpop.eup %4539  ;;  %4559 = vrcp.f32 %v2825_v5  ;;  %v2835_v13 = vadd.f32 1.0, %v4538_v48  ;;  %v3192_v53 = vrot.slane %v3191_v10, 2  ;;  %v3738_v15 = vmul.f32 -1.442695, %v6556_v3 }
 0x41f   : > { %v4542_v57 = vpop.eup %4541  ;;  %4561 = vrcp.f32 %v2826_v8  ;;  %v2836_v14 = vadd.f32 1.0, %v4540_v29  ;;  %v3218_v37 = vrot.slane %v3217_v0, 2 }
 0x420   : > { %v4544_v28 = vpop.eup %4543  ;;  %4563 = vrcp.f32 %v2835_v13  ;;  %v2845_v44 = vadd.f32 1.0, %v4542_v57  ;;  %v3193_v59 = vadd.f32 %v3192_v53, %v3191_v10 }
 0x421   : > { %v4546_v36 = vpop.eup %4545  ;;  %4565 = vrcp.f32 %v2836_v14  ;;  %v2846_v58 = vadd.f32 1.0, %v4544_v28  ;;  %v3219_v24 = vadd.f32 %v3218_v37, %v3217_v0 }
 0x422   : > { %v4548_v60 = vpop.eup %4547  ;;  %4567 = vrcp.f32 %v2845_v44  ;;  %v2855_v61 = vadd.f32 1.0, %v4546_v36  ;;  %v3194_v28 = vrot.slane %v3193_v59, 1 }
 0x423   : > { %v4550_v32 = vpop.eup %4549  ;;  %4569 = vrcp.f32 %v2846_v58  ;;  %v2856_v23 = vadd.f32 1.0, %v4548_v60 }
 0x424   : > { %v4552_v33 = vpop.eup %4551  ;;  %4571 = vrcp.f32 %v2855_v61  ;;  %v2865_v55 = vadd.f32 1.0, %v4550_v32  ;;  %v3195_v37 = vadd.f32 %v3194_v28, %v3193_v59 }
 0x425   : > { %v4554_v11 = vpop.eup %4553  ;;  %v3122_v21 = vmul.f32 %v4552_v33, %v6452_v41  ;;  %4573 = vrcp.f32 %v2856_v23 }
 0x426   : > { %v4556_v45 = vpop.eup %4555  ;;  %v3124_v35 = vmul.f32 %v4554_v11, %v6457_v9  ;;  %4575 = vrcp.f32 %v2865_v55 }
 0x427   : > { %v4558_v42 = vpop.eup %4557  ;;  %v3202_v26 = vadd.f32 %v6530_v31, %v3122_v21  ;;  %4577 = vpow2.f32 %v3718_v43  ;;  %v3055_v7 = vmul.f32 %v4556_v45, %v6461_v25 }
 0x428   : > { %v4560_v20 = vpop.eup %4559  ;;  %v3228_v41 = vadd.f32 %v6533_v49, %v3124_v35  ;;  %4579 = vpow2.f32 %v3727_v47  ;;  %v3056_v31 = vmul.f32 %v4558_v42, %v6465_v22 }
 0x429   : > { %v4562_v50 = vpop.eup %4561  ;;  %v3203_v62 = vrot.slane %v3202_v26, 4  ;;  %v3065_v9 = vmul.f32 %v4560_v20, %v6469_v38  ;;  %4581 = vpow2.f32 %v3728_v30 }
 0x42a   : > { %v4564_v4 = vpop.eup %4563  ;;  %v3229_v5 = vrot.slane %v3228_v41, 4  ;;  %v3066_v48 = vmul.f32 %v4562_v50, %v6473_v19  ;;  %4583 = vpow2.f32 %v3737_v12  ;;  %v3220_v19 = vrot.slane %v3219_v24, 1 }
 0x42b   : > { %v4566_v8 = vpop.eup %4565  ;;  %v3204_v29 = vadd.f32 %v3203_v62, %v3202_v26  ;;  %v3235_v13 = vadd.f32 %v3065_v9, %v3055_v7  ;;  %v3075_v49 = vmul.f32 %v4564_v4, %v6477_v2  ;;  %4585 = vpow2.f32 %v3738_v15 }
 0x42c   : > { %v4568_v16 = vpop.eup %4567  ;;  %v3230_v57 = vadd.f32 %v3229_v5, %v3228_v41  ;;  %v3248_v14 = vadd.f32 %v3066_v48, %v3056_v31  ;;  %v3076_v25 = vmul.f32 %v4566_v8, %v6481_v6  ;;  %v3221_v30 = vadd.f32 %v3220_v19, %v3219_v24  ;;  %v3128_v31 = vld [vmem:[#allocation2 + $0x1] ss:$2 sm:$0xff] }
 0x42d   : > { %v4570_v38 = vpop.eup %4569  ;;  %v3205_v10 = vrot.slane %v3204_v29, 2  ;;  %v3236_v0 = vadd.f32 %v3235_v13, %v3075_v49  ;;  %v3085_v22 = vmul.f32 %v4568_v16, %v6486_v54  ;;  %v3311_v4 = vrot.slane %v3303_v39, %v6746_v34 }
 0x42e   : > { %v4572_v44 = vpop.eup %4571  ;;  %v3231_v36 = vrot.slane %v3230_v57, 2  ;;  %v3249_v58 = vadd.f32 %v3248_v14, %v3076_v25  ;;  %v3086_v60 = vmul.f32 %v4570_v38, %v6503_v56 }
 0x42f   : > { %v4574_v61 = vpop.eup %4573  ;;  %v3206_v2 = vadd.f32 %v3205_v10, %v3204_v29  ;;  %v3237_v43 = vadd.f32 %v3236_v0, %v3085_v22  ;;  %v3095_v32 = vmul.f32 %v4572_v44, %v6509_v1 }
 0x430   : > { %v4576_v23 = vpop.eup %4575  ;;  %v3232_v47 = vadd.f32 %v3231_v36, %v3230_v57  ;;  %v3250_v6 = vadd.f32 %v3249_v58, %v3086_v60  ;;  %v3096_v33 = vmul.f32 %v4574_v61, %v6515_v27 }
 0x431   : > { %v4578_v53 = vpop.eup %4577  ;;  %v3207_v55 = vrot.slane %v3206_v2, 1  ;;  %v3238_v54 = vadd.f32 %v3237_v43, %v3095_v32  ;;  %v3105_v11 = vmul.f32 %v4576_v23, %v6520_v17 }
 0x432   : > { %v4580_v21 = vpop.eup %4579  ;;  %v3233_v45 = vrot.slane %v3232_v47, 1  ;;  %v3251_v56 = vadd.f32 %v3250_v6, %v3096_v33  ;;  %v2866_v35 = vadd.f32 1.0, %v4578_v53  ;;  %v3130_v53 = vld [vmem:[#allocation2 + $0x11] ss:$2 sm:$0x3] }
 0x433   : > { %v4582_v12 = vpop.eup %4581  ;;  %v3208_v42 = vadd.f32 %v3207_v55, %v3206_v2  ;;  %v3239_v26 = vadd.f32 %v3238_v54, %v3105_v11  ;;  %v2875_v1 = vadd.f32 1.0, %v4580_v21 }
 0x434   : > { %v4584_v15 = vpop.eup %4583  ;;  %v3234_v20 = vadd.f32 %v3233_v45, %v3232_v47  ;;  %4587 = vrcp.f32 %v2866_v35  ;;  %v2876_v41 = vadd.f32 1.0, %v4582_v12 }
 0x435   : > { %v4586_v27 = vpop.eup %4585  ;;  %v3273_v50 = vcombine.low %v3195_v37, %v3208_v42  ;;  %4589 = vrcp.f32 %v2875_v1  ;;  %v2885_v59 = vadd.f32 1.0, %v4584_v15 }
 0x436   : > { %v3274_v62 = vcombine.low %v3221_v30, %v3234_v20  ;;  %4591 = vrcp.f32 %v2876_v41  ;;  %v2886_v17 = vadd.f32 1.0, %v4586_v27 }
 0x437   : > { %v3295_v24 = vrot.slane %v3273_v50, %v6746_v34  ;;  %4593 = vrcp.f32 %v2885_v59 }
 0x438   : > { %v3302_v7 = vrot.slane %v3274_v62, %v6746_v34  ;;  %4595 = vrcp.f32 %v2886_v17 }
 0x43a   : > { %v3304_v9 = vcombine.low %v3295_v24, %v3302_v7 }
 0x43c   : > { %v3318_v5 = vrot.slane %v3304_v9, %v6746_v34 }
 0x43e   : > { %v4588_v48 = vpop.eup %4587  ;;  %v3319_v8 = vcombine.low %v3311_v4, %v3318_v5 }
 0x43f   : > { %v4590_v29 = vpop.eup %4589  ;;  %v3106_v13 = vmul.f32 %v4588_v48, %v6538_v52 }
 0x440   : > { %v4592_v49 = vpop.eup %4591  ;;  %v3337_v16 = vadd.f32 %v3319_v8, %v3128_v31  ;;  %v3115_v57 = vmul.f32 %v4590_v29, %v6542_v40 }
 0x441   : > { %v4594_v14 = vpop.eup %4593  ;;  %v3252_v25 = vadd.f32 %v3251_v56, %v3106_v13  ;;  %v3116_v38 = vmul.f32 %v4592_v49, %v6546_v51 }
 0x442   : > { %v4596_v28 = vpop.eup %4595  ;;  %3339 = vst [vmem:[#allocation2 + $0x1] ss:$2 sm:$0xff] %v3337_v16  ;;  %v3240_v63 = vadd.f32 %v3239_v26, %v3115_v57  ;;  %v3125_v18 = vmul.f32 %v4594_v14, %v6551_v46 }
 0x443   : > { %v3253_v39 = vadd.f32 %v3252_v25, %v3116_v38  ;;  %v3126_v10 = vmul.f32 %v4596_v28, %v6556_v3 }
 0x444   : > { %v3241_v0 = vadd.f32 %v3240_v63, %v3125_v18 }
 0x445   : > { %v3254_v22 = vadd.f32 %v3253_v39, %v3126_v10 }
 0x446   : > { %v3242_v52 = vrot.slane %v3241_v0, 4 }
 0x447   : > { %v3255_v44 = vrot.slane %v3254_v22, 4 }
 0x448   : > { %v3243_v19 = vadd.f32 %v3242_v52, %v3241_v0 }
 0x449   : > { %v3344_v36 = vld [vmem:[#allocation2] sm:$0xff]  ;;  %v3345_v40 = vld [vmem:[#allocation2 + $0x8] sm:$0xff]  ;;  %v3256_v51 = vadd.f32 %v3255_v44, %v3254_v22 }
 0x44a   : > { %v3347_v58 = vmul.f32 0.015625, %v3344_v36  ;;  %v3348_v60 = vmul.f32 0.015625, %v3345_v40  ;;  %v3244_v61 = vrot.slane %v3243_v19, 2 }
 0x44b   : > { %v3257_v46 = vrot.slane %v3256_v51, 2 }
 0x44c   : > { %v3245_v2 = vadd.f32 %v3244_v61, %v3243_v19  ;;  %3350 = vst [vmem:[%s376_s30] sm:$0xff] %v3347_v58  ;;  %3351 = vst [vmem:[%s376_s30 + $0x8] sm:$0xff] %v3348_v60 }
 0x44d   : > { %v3258_v3 = vadd.f32 %v3257_v46, %v3256_v51 }
 0x44e   : > { %v3246_v43 = vrot.slane %v3245_v2, 1 }
 0x44f   : > { %v3259_v32 = vrot.slane %v3258_v3, 1 }
 0x450   : > { %v3247_v23 = vadd.f32 %v3246_v43, %v3245_v2 }
 0x451   : > { %v3260_v47 = vadd.f32 %v3259_v32, %v3258_v3 }
 0x453   : > { %v3320_v6 = vcombine.low %v3247_v23, %v3260_v47 }
 0x455   : > { %v3327_v33 = vrot.slane %v3320_v6, %v6746_v34 }
 0x457   : > { %v3334_v37 = vrot.slane %v3327_v33, %v6746_v34 }
 0x459   : > { %v3338_v55 = vadd.f32 %v3334_v37, %v3130_v53 }
 0x45b   : > { %3340 = vst.msk [vmem:[#allocation2 + $0x11] ss:$2 sm:$0x3] %vm5921_vm2, %v3338_v55 }
 0x462   : > { %v3346_v11 = vld [vmem:[#allocation2 + $0x10] sm:$0xf] }
 0x463   : > { %v3349_v21 = vmul.f32 0.015625, %v3346_v11 }
 0x465   : > { %3352 = vst [vmem:[%s376_s30 + $0x10] sm:$0xf] %v3349_v21 }
 0x466 PF: > { %s15_s22 = sadd.s32 1, %s4658_s22   ;;  %s6760_s18 = smov %s4646_s19 }
 0x467   : > { %p12_p10 = scmp.ge.s32.totalorder %s15_s22, 4   ;;  %s6761_s19 = smov %s4728_s26 }
 0x468   : > { %s6762_s20 = smov %s4654_s21  ;;  %s6763_s21 = smov %s6765_s23 }
 0x469   :  { %14 = sbr.rel (!%p12_p10) target bundleno = 3 (0x3), region = 116 }

// kernel: efficientnet_b7_forward.3
= control target key start
LH: loop header
LB: loop body
LE: loop exit
PB: predicated region body
PF: predicated region fallthrough
CT: control target
= control target key end

     0   :  { %vm48_vm0 = vcmask 64512   ;;  %v2874_v0 = vmov 0.0   ;;  %vm2875_vm1 = vmmov 0   ;;  %v2876_v7 = vmov 0.0|0.0   ;;  %s3587_s2 = inlined_call_operand.vmem [shape: f32[8,64], index: 2, kind: input, shape index: {}]   ;;  %s3588_s1 = inlined_call_operand.vmem [shape: f32[2,8], index: 1, kind: input, shape index: {}]   ;;  %s3589_s4 = inlined_call_operand.vmem [shape: f32[64,32], index: 4, kind: input, shape index: {}]   ;;  %s3590_s7 = inlined_call_operand.vmem [shape: f32[32,64], index: 7, kind: input, shape index: {}]   ;;  %s3591_s3 = inlined_call_operand.vmem [shape: f32[1,64], index: 3, kind: input, shape index: {}]   ;;  %s3592_s6 = inlined_call_operand.vmem [shape: bf16[2560,64], index: 6, kind: input, shape index: {}]   ;;  %s3593_s0 = inlined_call_operand.vmem [shape: f32[2,2560], index: 0, kind: input, shape index: {}]   ;;  %s3594_s5 = inlined_call_operand.vmem [shape: f32[1,32], index: 5, kind: input, shape index: {}]   ;;  %s3595_s9 = inlined_call_operand.vmem [shape: f32[64,128], index: 9, kind: input, shape index: {}]   ;;  %s3596_s8 = inlined_call_operand.vmem [shape: f32[1,64], index: 8, kind: input, shape index: {}]   ;;  %s3597_s10 = inlined_call_operand.vmem [shape: f32[1,128], index: 10, kind: input, shape index: {}]   ;;  %s3598_s11 = inlined_call_operand.vmem [shape: f32[2,128], index: 11, kind: output, shape index: {}]  }
   0x1   :  { %2621 = vmatprep.subr.mxu1 %v2874_v0  ;;  %v40_v1 = vld [vmem:[%s3587_s2] sm:$0xff]  ;;  %2623 = vmatprep.mubr.msk.f32.mxu1 %vm2875_vm1, %v2874_v0  ;;  %v124_v4 = vld [vmem:[%s3589_s4 + $0x8] sm:$0xff]  ;;  %v125_v5 = vld [vmem:[%s3589_s4 + $0x10] sm:$0xff]  ;;  %vm138_vm2 = vcmask 523264   ;;  %v227_v40 = vlaneseq  ;;  %v2877_v43 = vmov 1983009808  }
   0x2   :  { %v39_v2 = vld [vmem:[%s3588_s1] sm:$0x3]  ;;  %2622 = vmatpush3.msra.mxu1 %v40_v1  ;;  %v126_v6 = vld [vmem:[%s3589_s4 + $0x18] sm:$0xff]  ;;  %2687 = vmatprep.subr.bf16.mxu0 %v2876_v7  ;;  %v128_v11 = vld [vmem:[%s3589_s4 + $0x28] sm:$0xff]  ;;  %v225_v44 = vunpack.c.l.s4 %v2877_v43  ;;  %vm672_vm3 = vcmask 261120  }
   0x3   :  { %v123_v3 = vld [vmem:[%s3589_s4] sm:$0xff]  ;;  %2624 = vmatmul.mubr.msk.f32.vlgmr.msra.gmra.mrb[0].mxu1 %vm48_vm0, %v39_v2  ;;  %2675 = vmatprep.subr.bf16.mxu1 %v2876_v7  ;;  %v2679_v9 = vpack.c.bf16 %v126_v6, %v125_v5  ;;  %v129_v13 = vld [vmem:[%s3589_s4 + $0x30] sm:$0xff]  ;;  %v130_v14 = vld [vmem:[%s3589_s4 + $0x38] sm:$0xff]  ;;  %v228_v45 = vshrl.u32 %v227_v40, 7 }
   0x4   :  { %v2676_v8 = vpack.c.bf16 %v124_v4, %v123_v3  ;;  %2642 = vmatprep.mubr.msk.f32.mxu1 %vm2875_vm1, %v2874_v0  ;;  %2653 = vmatprep.mubr.msk.f32.mxu0 %vm2875_vm1, %v2874_v0  ;;  %v127_v10 = vld [vmem:[%s3589_s4 + $0x20] sm:$0xff]  ;;  %v2685_v15 = vpack.c.bf16 %v130_v14, %v129_v13  ;;  %v669_v17 = vld [vmem:[%s3590_s7 + $0x8] sm:$0xff]  ;;  %v670_v24 = vld [vmem:[%s3590_s7 + $0x10] sm:$0xff]  ;;  %v226_v46 = vunpack.c.0.s8 %v225_v44 }
   0x5   :  { %v2682_v12 = vpack.c.bf16 %v128_v11, %v127_v10  ;;  %v668_v16 = vld [vmem:[%s3590_s7] sm:$0xff]  ;;  %v671_v25 = vld [vmem:[%s3590_s7 + $0x18] sm:$0xff]  ;;  %v2713_v30 = vld [vmem:[%s3592_s6 + $0xc8] sm:$0xff]  }
   0x6   :  { %2677 = vmatpush3.bf16.msra.mxu1 %v2676_v8  ;;  %v2688_v18 = vpack.c.bf16 %v669_v17, %v668_v16  ;;  %v2208_v19 = vld [vmem:[%s3591_s3] ss:$0 sm:$0xff]  ;;  %v2691_v26 = vpack.c.bf16 %v671_v25, %v670_v24  ;;  %v2715_v31 = vld [vmem:[%s3592_s6 + $0x88] sm:$0xff]   ;;  %v2717_v32 = vld [vmem:[%s3592_s6 + $0xd0] sm:$0xff]   ;;  %v3048_v49 = vsub.s32 %v226_v46, %v228_v45 }
   0x7   :  { %2678 = vmatprep.subr.bf16.mxu1 %v2876_v7  ;;  %v2709_v27 = vld [vmem:[%s3592_s6 + $0xc0] sm:$0xff]   ;;  %v2719_v33 = vld [vmem:[%s3592_s6 + $0x90] sm:$0xff]   ;;  %v2721_v34 = vld [vmem:[%s3592_s6 + $0xd8] sm:$0xff]  }
   0x8   :  { %2689 = vmatpush3.bf16.msra.mxu0 %v2688_v18  ;;  %v2710_v28 = vld [vmem:[%s3592_s6 + $0x40] sm:$0xff]   ;;  %v2723_v35 = vld [vmem:[%s3592_s6 + $0x98] sm:$0xff]   ;;  %v2729_v38 = vld [vmem:[%s3592_s6 + $0xe8] sm:$0xff]  }
   0x9   :  { %2690 = vmatprep.subr.bf16.mxu0 %v2876_v7  ;;  %v2711_v29 = vld [vmem:[%s3592_s6 + $0x80] sm:$0xff]   ;;  %v2731_v39 = vld [vmem:[%s3592_s6 + $0xa8] sm:$0xff]   ;;  %v2733_v41 = vld [vmem:[%s3592_s6 + $0xf0] sm:$0xff]  }
   0xa   :  { %2680 = vmatpush3.bf16.msra.mxu1 %v2679_v9  ;;  %v2725_v36 = vld [vmem:[%s3592_s6 + $0xe0] sm:$0xff]   ;;  %v2735_v42 = vld [vmem:[%s3592_s6 + $0xb0] sm:$0xff]   ;;  %v2737_v47 = vld [vmem:[%s3592_s6 + $0xf8] sm:$0xff]  }
   0xb   :  { %2681 = vmatprep.subr.bf16.mxu1 %v2876_v7  ;;  %v2727_v37 = vld [vmem:[%s3592_s6 + $0xa0] sm:$0xff]   ;;  %v2739_v48 = vld [vmem:[%s3592_s6 + $0xb8] sm:$0xff]   ;;  %v2746_v58 = vld [vmem:[%s3592_s6 + $0x1c8] sm:$0xff]  }
   0xc   :  { %2692 = vmatpush3.bf16.msra.mxu0 %v2691_v26  ;;  %v3053_v50 = vld [vmem:[%s3593_s0] sm:$0xff]  ;;  %v2748_v59 = vld [vmem:[%s3592_s6 + $0x188] sm:$0xff]   ;;  %v2750_v60 = vld [vmem:[%s3592_s6 + $0x1d0] sm:$0xff]  }
   0xd   :  { %2392 = vmatprep.subr.bf16.mxu0 %v2710_v28  ;;  %v223_v51 = vcombine.high %v3053_v50, %v3053_v50  ;;  %v2742_v52 = vld [vmem:[%s3592_s6 + $0x1c0] sm:$0xff]   ;;  %v2752_v61 = vld [vmem:[%s3592_s6 + $0x190] sm:$0xff]   ;;  %v2754_v62 = vld [vmem:[%s3592_s6 + $0x1d8] sm:$0xff]  }
   0xe   :  { %2683 = vmatpush3.bf16.msra.mxu1 %v2682_v12  ;;  %v2744_v57 = vld [vmem:[%s3592_s6 + $0x180] sm:$0xff]   ;;  %v2756_v63 = vld [vmem:[%s3592_s6 + $0x198] sm:$0xff]   ;;  %v2762_v3 = vld [vmem:[%s3592_s6 + $0x1e8] sm:$0xff]  }
   0xf   :  { %2684 = vmatprep.subr.bf16.mxu1 %v2876_v7  ;;  %v237_v53 = vrot.slane %v223_v51, %v3048_v49  ;;  %v2758_v1 = vld [vmem:[%s3592_s6 + $0x1e0] sm:$0xff]   ;;  %v2764_v4 = vld [vmem:[%s3592_s6 + $0x1a8] sm:$0xff]   ;;  %v2766_v5 = vld [vmem:[%s3592_s6 + $0x1f0] sm:$0xff]   ;;  %v3205_v51 = vrot.slane %v3053_v50, %v3048_v49 }
  0x10   :  { %v2760_v2 = vld [vmem:[%s3592_s6 + $0x1a0] sm:$0xff]   ;;  %v2768_v6 = vld [vmem:[%s3592_s6 + $0x1b0] sm:$0xff]   ;;  %v2770_v8 = vld [vmem:[%s3592_s6 + $0x1f8] sm:$0xff]  }
  0x11   :  { %v239_v54 = vcombine.high %v237_v53, %v237_v53  ;;  %v330_v55 = vpack.c.bf16 %v237_v53, %v237_v53  ;;  %v3106_v9 = vld [vmem:[%s3593_s0 + $0x8] sm:$0xff]  ;;  %v2772_v11 = vld [vmem:[%s3592_s6 + $0x1b8] sm:$0xff]   ;;  %v2775_v13 = vld [vmem:[%s3592_s6 + $0x2c0] sm:$0xff]  }
  0x12   :  { %2686 = vmatpush3.bf16.msra.mxu1 %v2685_v15  ;;  %v240_v10 = vcombine.high %v3106_v9, %v3106_v9  ;;  %v2777_v17 = vld [vmem:[%s3592_s6 + $0x280] sm:$0xff]   ;;  %v2779_v18 = vld [vmem:[%s3592_s6 + $0x2c8] sm:$0xff]   ;;  %v2799_v28 = vld [vmem:[%s3592_s6 + $0x2f0] sm:$0xff]  }
  0x13   :  { %2414 = vmatprep.subr.bf16.mxu1 %v2709_v27  ;;  %v331_v56 = vpack.c.bf16 %v239_v54, %v239_v54  ;;  %v2791_v24 = vld [vmem:[%s3592_s6 + $0x2e0] sm:$0xff]   ;;  %v2795_v26 = vld [vmem:[%s3592_s6 + $0x2e8] sm:$0xff]   ;;  %v2818_v43 = vld [vmem:[%s3592_s6 + $0x390] sm:$0xff]  }
  0x14   :  { %v254_v12 = vrot.slane %v240_v10, %v3048_v49  ;;  %v2793_v25 = vld [vmem:[%s3592_s6 + $0x2a0] sm:$0xff]   ;;  %v2797_v27 = vld [vmem:[%s3592_s6 + $0x2a8] sm:$0xff]   ;;  %v2820_v44 = vld [vmem:[%s3592_s6 + $0x3d8] sm:$0xff]  }
  0x15   :  { %v2812_v40 = vld [vmem:[%s3592_s6 + $0x3c8] sm:$0xff]   ;;  %v2822_v45 = vld [vmem:[%s3592_s6 + $0x398] sm:$0xff]   ;;  %v2824_v46 = vld [vmem:[%s3592_s6 + $0x3e0] sm:$0xff]  }
  0x16   :  { %v256_v14 = vcombine.high %v254_v12, %v254_v12  ;;  %v334_v15 = vpack.c.bf16 %v254_v12, %v254_v12  ;;  %v2832_v53 = vld [vmem:[%s3592_s6 + $0x3f0] sm:$0xff]   ;;  %v2210_v54 = vld [vmem:[%s3594_s5] ss:$0 sm:$0xff] }
  0x17   :  { %v2712_v50 = vld [vmem:[%s3592_s6] sm:$0xff]  }
  0x18   :  { %v335_v16 = vpack.c.bf16 %v256_v14, %v256_v14  ;;  %v2843_v14 = vld [vmem:[%s3592_s6 + $0x480] sm:$0xff]  }
  0xd6   :  { %v118_v20 = vpop.f32.mrb[0].mxu1 }
  0xd7   :  { %v119_v21 = vadd.f32 %v2208_v19, %v118_v20  ;;  %v2625_v22 = vpop.f32.mrb[1].mxu1  ;;  %v2781_v19 = vld [vmem:[%s3592_s6 + $0x288] sm:$0xff]   ;;  %v2783_v20 = vld [vmem:[%s3592_s6 + $0x2d0] sm:$0xff]  }
  0xd8   :  { %v2787_v22 = vld [vmem:[%s3592_s6 + $0x2d8] sm:$0xff]  }
  0xd9   :  { %v122_v23 = vmax.f32 %v119_v21, 0.0  ;;  %v2785_v21 = vld [vmem:[%s3592_s6 + $0x290] sm:$0xff]  }
  0xdb   :  { %2643 = vmatmul.mubr.msk.f32.vlgmr.msra.gmra.mrb[2].mxu1 %vm138_vm2, %v122_v23  ;;  %v2789_v23 = vld [vmem:[%s3592_s6 + $0x298] sm:$0xff]  }
  0xdc   :  { %2415 = vmatpush3.bf16.msra.mxu1 %v2711_v29  ;;  %1778 = vmatprep.mubr.bf16.mxu1 %v331_v56  ;;  %v2801_v29 = vld [vmem:[%s3592_s6 + $0x2b0] sm:$0xff]  }
  0xdd   :  { %2416 = vmatprep.subr.bf16.mxu1 %v2713_v30  ;;  %v2803_v30 = vld [vmem:[%s3592_s6 + $0x2f8] sm:$0xff]  }
  0xe0   :  { %2417 = vmatpush3.bf16.msra.mxu1 %v2715_v31  ;;  %v3162_v31 = vld [vmem:[%s3593_s0 + $0x10] sm:$0xff] }
  0xe1   :  { %2418 = vmatprep.subr.bf16.mxu1 %v2717_v32  ;;  %v257_v32 = vcombine.high %v3162_v31, %v3162_v31 }
  0xe4   :  { %2419 = vmatpush3.bf16.msra.mxu1 %v2719_v33  ;;  %v2805_v33 = vld [vmem:[%s3592_s6 + $0x2b8] sm:$0xff]  }
  0xe5   :  { %2420 = vmatprep.subr.bf16.mxu1 %v2721_v34  ;;  %v271_v34 = vrot.slane %v257_v32, %v3048_v49  ;;  %v3306_v32 = vrot.slane %v3106_v9, %v3048_v49  ;;  %v2863_v9 = vld [vmem:[%s3592_s6 + $0x4a8] sm:$0xff]  }
  0xe8   :  { %2421 = vmatpush3.bf16.msra.mxu1 %v2723_v35  ;;  %v2808_v35 = vld [vmem:[%s3592_s6 + $0x3c0] sm:$0xff]  }
  0xe9   :  { %2422 = vmatprep.subr.bf16.mxu1 %v2725_v36  ;;  %v273_v36 = vcombine.high %v271_v34, %v271_v34 }
  0xec   :  { %2423 = vmatpush3.bf16.msra.mxu1 %v2727_v37  ;;  %v338_v37 = vpack.c.bf16 %v271_v34, %v271_v34  ;;  %v2738_v34 = vld [vmem:[%s3592_s6 + $0x78] sm:$0xff]  }
  0xed   :  { %2424 = vmatprep.subr.bf16.mxu1 %v2729_v38  ;;  %v339_v38 = vpack.c.bf16 %v273_v36, %v273_v36  ;;  %v255_v36 = vcombine.high %v3306_v32, %v3306_v32 }
  0xf0   :  { %2425 = vmatpush3.bf16.msra.mxu1 %v2731_v39  ;;  %v2810_v39 = vld [vmem:[%s3592_s6 + $0x380] sm:$0xff]  }
  0xf1   :  { %2426 = vmatprep.subr.bf16.mxu1 %v2733_v41  ;;  %v2814_v41 = vld [vmem:[%s3592_s6 + $0x388] sm:$0xff]  }
  0xf4   :  { %2427 = vmatpush3.bf16.msra.mxu1 %v2735_v42  ;;  %v2816_v42 = vld [vmem:[%s3592_s6 + $0x3d0] sm:$0xff]  }
  0xf5   :  { %2428 = vmatprep.subr.bf16.mxu1 %v2737_v47  ;;  %v2826_v47 = vld [vmem:[%s3592_s6 + $0x3a0] sm:$0xff]  }
  0xf8   :  { %2429 = vmatpush3.bf16.msra.mxu1 %v2739_v48  ;;  %v2828_v48 = vld [vmem:[%s3592_s6 + $0x3e8] sm:$0xff]  }
  0xf9   :  { %2458 = vmatprep.subr.bf16.mxu1 %v2742_v52  ;;  %v2830_v52 = vld [vmem:[%s3592_s6 + $0x3a8] sm:$0xff]  }
  0xfb   :  { %1779 = vmatmul.mubr.bf16.vlgmr.msra.gmra.mrb[4].mxu1 %v330_v55  ;;  %v238_v55 = vcombine.high %v3205_v51, %v3205_v51 }
  0xfc   :  { %2459 = vmatpush3.bf16.msra.mxu1 %v2744_v57  ;;  %1858 = vmatprep.mubr.bf16.mxu1 %v335_v16  ;;  %v2834_v57 = vld [vmem:[%s3592_s6 + $0x3b0] sm:$0xff]   ;;  %v2722_v16 = vld [vmem:[%s3592_s6 + $0x58] sm:$0xff]  }
  0xfd   :  { %2460 = vmatprep.subr.bf16.mxu1 %v2746_v58 }
 0x100   :  { %2461 = vmatpush3.bf16.msra.mxu1 %v2748_v59 }
 0x101   :  { %2462 = vmatprep.subr.bf16.mxu1 %v2750_v60  ;;  %v2836_v60 = vld [vmem:[%s3592_s6 + $0x3f8] sm:$0xff]  }
 0x104   :  { %2463 = vmatpush3.bf16.msra.mxu1 %v2752_v61  ;;  %v329_v61 = vpack.c.bf16 %v238_v55, %v238_v55 }
 0x105   :  { %2464 = vmatprep.subr.bf16.mxu1 %v2754_v62  ;;  %v3230_v62 = vld [vmem:[%s3593_s0 + $0x18] sm:$0xff] }
 0x108   :  { %2465 = vmatpush3.bf16.msra.mxu1 %v2756_v63 }
 0x109   :  { %2466 = vmatprep.subr.bf16.mxu1 %v2758_v1  ;;  %v2714_v1 = vld [vmem:[%s3592_s6 + $0x48] sm:$0xff]  }
 0x10c   :  { %2467 = vmatpush3.bf16.msra.mxu1 %v2760_v2  ;;  %v274_v2 = vcombine.high %v3230_v62, %v3230_v62 }
 0x10d   :  { %2468 = vmatprep.subr.bf16.mxu1 %v2762_v3  ;;  %v2838_v3 = vld [vmem:[%s3592_s6 + $0x3b8] sm:$0xff]  }
 0x110   :  { %2469 = vmatpush3.bf16.msra.mxu1 %v2764_v4  ;;  %v288_v4 = vrot.slane %v274_v2, %v3048_v49  ;;  %v264_v2 = vrot.slane %v3162_v31, %v3048_v49  ;;  %v2778_v31 = vld [vmem:[%s3592_s6 + $0x200] sm:$0xff]  }
 0x111   :  { %2470 = vmatprep.subr.bf16.mxu1 %v2766_v5  ;;  %v2841_v5 = vld [vmem:[%s3592_s6 + $0x4c0] sm:$0xff]  }
 0x112   :  { %v290_v10 = vcombine.high %v288_v4, %v288_v4  ;;  %v342_v12 = vpack.c.bf16 %v288_v4, %v288_v4  ;;  %v2773_v4 = vld [vmem:[%s3592_s6 + $0x138] sm:$0xff]  }
 0x114   :  { %2471 = vmatpush3.bf16.msra.mxu1 %v2768_v6  ;;  %v2716_v6 = vld [vmem:[%s3592_s6 + $0x8] sm:$0xff]  }
 0x115   :  { %2472 = vmatprep.subr.bf16.mxu1 %v2770_v8  ;;  %v2718_v8 = vld [vmem:[%s3592_s6 + $0x50] sm:$0xff]  }
 0x118   :  { %2473 = vmatpush3.bf16.msra.mxu1 %v2772_v11  ;;  %v2720_v11 = vld [vmem:[%s3592_s6 + $0x10] sm:$0xff]  }
 0x119   :  { %2502 = vmatprep.subr.bf16.mxu1 %v2775_v13  ;;  %v343_v13 = vpack.c.bf16 %v290_v10, %v290_v10 }
 0x11b   :  { %1859 = vmatmul.mubr.bf16.vlgmr.msra.gmra.mrb[8].mxu1 %v334_v15  ;;  %v2845_v15 = vld [vmem:[%s3592_s6 + $0x4c8] sm:$0xff]  }
 0x11c   :  { %2503 = vmatpush3.bf16.msra.mxu1 %v2777_v17  ;;  %1938 = vmatprep.mubr.bf16.mxu1 %v339_v38  ;;  %v2724_v17 = vld [vmem:[%s3592_s6 + $0x18] sm:$0xff]   ;;  %v2743_v38 = vld [vmem:[%s3592_s6 + $0x140] sm:$0xff]  }
 0x11d   :  { %2504 = vmatprep.subr.bf16.mxu1 %v2779_v18  ;;  %v2847_v18 = vld [vmem:[%s3592_s6 + $0x488] sm:$0xff]  }
 0x120   :  { %2505 = vmatpush3.bf16.msra.mxu1 %v2781_v19  ;;  %v2849_v19 = vld [vmem:[%s3592_s6 + $0x4d0] sm:$0xff]  }
 0x121   :  { %2506 = vmatprep.subr.bf16.mxu1 %v2783_v20  ;;  %v2726_v20 = vld [vmem:[%s3592_s6 + $0x60] sm:$0xff]  }
 0x124   :  { %2507 = vmatpush3.bf16.msra.mxu1 %v2785_v21  ;;  %v2728_v21 = vld [vmem:[%s3592_s6 + $0x20] sm:$0xff]  }
 0x125   :  { %2508 = vmatprep.subr.bf16.mxu1 %v2787_v22  ;;  %v2851_v22 = vld [vmem:[%s3592_s6 + $0x490] sm:$0xff]  }
 0x128   :  { %2509 = vmatpush3.bf16.msra.mxu1 %v2789_v23  ;;  %v2853_v23 = vld [vmem:[%s3592_s6 + $0x4d8] sm:$0xff]  }
 0x129   :  { %2510 = vmatprep.subr.bf16.mxu1 %v2791_v24  ;;  %v2730_v24 = vld [vmem:[%s3592_s6 + $0x68] sm:$0xff]  }
 0x12c   :  { %2511 = vmatpush3.bf16.msra.mxu1 %v2793_v25  ;;  %v2732_v25 = vld [vmem:[%s3592_s6 + $0x28] sm:$0xff]  }
 0x12d   :  { %2512 = vmatprep.subr.bf16.mxu1 %v2795_v26  ;;  %v2855_v26 = vld [vmem:[%s3592_s6 + $0x498] sm:$0xff]  }
 0x130   :  { %2513 = vmatpush3.bf16.msra.mxu1 %v2797_v27  ;;  %v2857_v27 = vld [vmem:[%s3592_s6 + $0x4e0] sm:$0xff]  }
 0x131   :  { %2514 = vmatprep.subr.bf16.mxu1 %v2799_v28  ;;  %v2734_v28 = vld [vmem:[%s3592_s6 + $0x70] sm:$0xff]  }
 0x134   :  { %2515 = vmatpush3.bf16.msra.mxu1 %v2801_v29  ;;  %v2736_v29 = vld [vmem:[%s3592_s6 + $0x30] sm:$0xff]  }
 0x135   :  { %2516 = vmatprep.subr.bf16.mxu1 %v2803_v30  ;;  %v2859_v30 = vld [vmem:[%s3592_s6 + $0x4a0] sm:$0xff]  }
 0x138   :  { %2517 = vmatpush3.bf16.msra.mxu1 %v2805_v33  ;;  %v2861_v33 = vld [vmem:[%s3592_s6 + $0x4e8] sm:$0xff]  }
 0x139   :  { %2546 = vmatprep.subr.bf16.mxu1 %v2808_v35  ;;  %v2740_v35 = vld [vmem:[%s3592_s6 + $0x38] sm:$0xff]  }
 0x13b   :  { %1939 = vmatmul.mubr.bf16.vlgmr.msra.gmra.mrb[12].mxu1 %v338_v37  ;;  %v2865_v37 = vld [vmem:[%s3592_s6 + $0x4f0] sm:$0xff]  }
 0x13c   :  { %2547 = vmatpush3.bf16.msra.mxu1 %v2810_v39  ;;  %2018 = vmatprep.mubr.bf16.mxu1 %v343_v13  ;;  %v328_v39 = vpack.c.bf16 %v3205_v51, %v3205_v51  ;;  %v2749_v51 = vld [vmem:[%s3592_s6 + $0x108] sm:$0xff]   ;;  %v2784_v13 = vld [vmem:[%s3592_s6 + $0x250] sm:$0xff]  }
 0x13d   :  { %2548 = vmatprep.subr.bf16.mxu1 %v2812_v40  ;;  %v2867_v40 = vld [vmem:[%s3592_s6 + $0x4b0] sm:$0xff]  }
 0x140   :  { %2549 = vmatpush3.bf16.msra.mxu1 %v2814_v41  ;;  %v2745_v41 = vld [vmem:[%s3592_s6 + $0x100] sm:$0xff]  }
 0x141   :  { %2550 = vmatprep.subr.bf16.mxu1 %v2816_v42  ;;  %v333_v42 = vpack.c.bf16 %v255_v36, %v255_v36  ;;  %v2825_v36 = vld [vmem:[%s3592_s6 + $0x360] sm:$0xff]  }
 0x144   :  { %2551 = vmatpush3.bf16.msra.mxu1 %v2818_v43  ;;  %v3339_v43 = vld [vmem:[%s3593_s0 + $0x20] sm:$0xff] }
 0x145   :  { %2552 = vmatprep.subr.bf16.mxu1 %v2820_v44  ;;  %v2747_v44 = vld [vmem:[%s3592_s6 + $0x148] sm:$0xff]  }
 0x148   :  { %2553 = vmatpush3.bf16.msra.mxu1 %v2822_v45  ;;  %v2869_v45 = vld [vmem:[%s3592_s6 + $0x4f8] sm:$0xff]  }
 0x149   :  { %2554 = vmatprep.subr.bf16.mxu1 %v2824_v46  ;;  %v291_v46 = vcombine.high %v3339_v43, %v3339_v43 }
 0x14c   :  { %2555 = vmatpush3.bf16.msra.mxu1 %v2826_v47  ;;  %v2871_v47 = vld [vmem:[%s3592_s6 + $0x4b8] sm:$0xff]  }
 0x14d   :  { %2556 = vmatprep.subr.bf16.mxu1 %v2828_v48  ;;  %v305_v48 = vrot.slane %v291_v46, %v3048_v49 }
 0x150   :  { %2557 = vmatpush3.bf16.msra.mxu1 %v2830_v52  ;;  %v2751_v52 = vld [vmem:[%s3592_s6 + $0x150] sm:$0xff]  }
 0x151   :  { %2558 = vmatprep.subr.bf16.mxu1 %v2832_v53  ;;  %v307_v53 = vcombine.high %v305_v48, %v305_v48 }
 0x153   :  { %v347_v55 = vpack.c.bf16 %v307_v53, %v307_v53 }
 0x154   :  { %2559 = vmatpush3.bf16.msra.mxu1 %v2834_v57  ;;  %v2757_v57 = vld [vmem:[%s3592_s6 + $0x118] sm:$0xff]  }
 0x155   :  { %2560 = vmatprep.subr.bf16.mxu1 %v2836_v60  ;;  %v2763_v60 = vld [vmem:[%s3592_s6 + $0x168] sm:$0xff]  }
 0x158   :  { %2561 = vmatpush3.bf16.msra.mxu1 %v2838_v3  ;;  %v2771_v3 = vld [vmem:[%s3592_s6 + $0x178] sm:$0xff]  }
 0x159   :  { %2590 = vmatprep.subr.bf16.mxu1 %v2841_v5  ;;  %v272_v5 = vcombine.high %v264_v2, %v264_v2 }
 0x15b   :  { %2019 = vmatmul.mubr.bf16.vlgmr.msra.gmra.mrb[16].mxu1 %v342_v12  ;;  %v337_v10 = vpack.c.bf16 %v272_v5, %v272_v5  ;;  %v2782_v12 = vld [vmem:[%s3592_s6 + $0x208] sm:$0xff]   ;;  %v2870_v5 = vld [vmem:[%s3592_s6 + $0x478] sm:$0xff]  }
 0x15c   :  { %2591 = vmatpush3.bf16.msra.mxu1 %v2843_v14  ;;  %2098 = vmatprep.mubr.bf16.mxu1 %v347_v55  ;;  %v2786_v14 = vld [vmem:[%s3592_s6 + $0x210] sm:$0xff]  }
 0x15d   :  { %2592 = vmatprep.subr.bf16.mxu1 %v2845_v15  ;;  %v2788_v15 = vld [vmem:[%s3592_s6 + $0x258] sm:$0xff]  }
 0x160   :  { %2593 = vmatpush3.bf16.msra.mxu1 %v2847_v18  ;;  %v2794_v18 = vld [vmem:[%s3592_s6 + $0x220] sm:$0xff]  }
 0x161   :  { %2594 = vmatprep.subr.bf16.mxu1 %v2849_v19  ;;  %v2796_v19 = vld [vmem:[%s3592_s6 + $0x268] sm:$0xff]  }
 0x164   :  { %2595 = vmatpush3.bf16.msra.mxu1 %v2851_v22  ;;  %v2802_v22 = vld [vmem:[%s3592_s6 + $0x230] sm:$0xff]  }
 0x165   :  { %2596 = vmatprep.subr.bf16.mxu1 %v2853_v23  ;;  %v281_v23 = vrot.slane %v3230_v62, %v3048_v49  ;;  %v2811_v62 = vld [vmem:[%s3592_s6 + $0x300] sm:$0xff]  }
 0x168   :  { %2597 = vmatpush3.bf16.msra.mxu1 %v2855_v26  ;;  %v289_v26 = vcombine.high %v281_v23, %v281_v23 }
 0x169   :  { %2598 = vmatprep.subr.bf16.mxu1 %v2857_v27  ;;  %v2809_v27 = vld [vmem:[%s3592_s6 + $0x340] sm:$0xff]  }
 0x16c   :  { %2599 = vmatpush3.bf16.msra.mxu1 %v2859_v30  ;;  %v2813_v30 = vld [vmem:[%s3592_s6 + $0x348] sm:$0xff]  }
 0x16d   :  { %2600 = vmatprep.subr.bf16.mxu1 %v2861_v33  ;;  %v2817_v33 = vld [vmem:[%s3592_s6 + $0x350] sm:$0xff]  }
 0x170   :  { %2601 = vmatpush3.bf16.msra.mxu1 %v2863_v9  ;;  %v2823_v9 = vld [vmem:[%s3592_s6 + $0x318] sm:$0xff]  }
 0x171   :  { %2602 = vmatprep.subr.bf16.mxu1 %v2865_v37  ;;  %v2827_v37 = vld [vmem:[%s3592_s6 + $0x320] sm:$0xff]  }
 0x174   :  { %2603 = vmatpush3.bf16.msra.mxu1 %v2867_v40  ;;  %v2833_v40 = vld [vmem:[%s3592_s6 + $0x370] sm:$0xff]  }
 0x175   :  { %2604 = vmatprep.subr.bf16.mxu1 %v2869_v45  ;;  %v2839_v45 = vld [vmem:[%s3592_s6 + $0x338] sm:$0xff]  }
 0x178   :  { %2605 = vmatpush3.bf16.msra.mxu1 %v2871_v47 }
 0x1ae   :  { %v208_v56 = vpop.f32.mrb[2].mxu1 }
 0x1af   :  { %v209_v58 = vadd.f32 %v2210_v54, %v208_v56  ;;  %v2644_v59 = vpop.f32.mrb[3].mxu1  ;;  %v346_v54 = vpack.c.bf16 %v305_v48, %v305_v48  ;;  %v2753_v56 = vld [vmem:[%s3592_s6 + $0x110] sm:$0xff]   ;;  %v2842_v48 = vld [vmem:[%s3592_s6 + $0x440] sm:$0xff]  }
 0x1b0   :  { %v2761_v59 = vld [vmem:[%s3592_s6 + $0x120] sm:$0xff]  }
 0x1b1   :  { %v212_v63 = vmax.f32 %v209_v58, 0.0  ;;  %2099 = vmatmul.mubr.bf16.vlgmr.msra.gmra.mrb[20].mxu1 %v346_v54  ;;  %v2759_v58 = vld [vmem:[%s3592_s6 + $0x160] sm:$0xff]  }
 0x1b2   :  { %v2844_v54 = vld [vmem:[%s3592_s6 + $0x400] sm:$0xff]  }
 0x1b3   :  { %2654 = vmatmul.mubr.msk.f32.vlgmr.msra.gmra.mrb[0].mxu0 %vm672_vm3, %v212_v63  ;;  %v2767_v63 = vld [vmem:[%s3592_s6 + $0x170] sm:$0xff]  }
 0x1b4   :  { %2393 = vmatpush3.bf16.msra.mxu0 %v2712_v50  ;;  %1738 = vmatprep.mubr.bf16.mxu0 %v329_v61  ;;  %v2755_v50 = vld [vmem:[%s3592_s6 + $0x158] sm:$0xff]   ;;  %v2765_v61 = vld [vmem:[%s3592_s6 + $0x128] sm:$0xff]  }
 0x1b5   :  { %2394 = vmatprep.subr.bf16.mxu0 %v2714_v1  ;;  %v2769_v1 = vld [vmem:[%s3592_s6 + $0x130] sm:$0xff]  }
 0x1b8   :  { %2395 = vmatpush3.bf16.msra.mxu0 %v2716_v6  ;;  %v2776_v6 = vld [vmem:[%s3592_s6 + $0x240] sm:$0xff]  }
 0x1b9   :  { %2396 = vmatprep.subr.bf16.mxu0 %v2718_v8  ;;  %v332_v8 = vpack.c.bf16 %v3306_v32, %v3306_v32  ;;  %v2815_v32 = vld [vmem:[%s3592_s6 + $0x308] sm:$0xff]  }
 0x1bc   :  { %2397 = vmatpush3.bf16.msra.mxu0 %v2720_v11  ;;  %v2780_v11 = vld [vmem:[%s3592_s6 + $0x248] sm:$0xff]  }
 0x1bd   :  { %2398 = vmatprep.subr.bf16.mxu0 %v2722_v16  ;;  %v2790_v16 = vld [vmem:[%s3592_s6 + $0x218] sm:$0xff]  }
 0x1c0   :  { %2399 = vmatpush3.bf16.msra.mxu0 %v2724_v17  ;;  %v2792_v17 = vld [vmem:[%s3592_s6 + $0x260] sm:$0xff]  }
 0x1c1   :  { %2400 = vmatprep.subr.bf16.mxu0 %v2726_v20  ;;  %v2798_v20 = vld [vmem:[%s3592_s6 + $0x228] sm:$0xff]  }
 0x1c4   :  { %2401 = vmatpush3.bf16.msra.mxu0 %v2728_v21  ;;  %v2800_v21 = vld [vmem:[%s3592_s6 + $0x270] sm:$0xff]  }
 0x1c5   :  { %2402 = vmatprep.subr.bf16.mxu0 %v2730_v24  ;;  %v2804_v24 = vld [vmem:[%s3592_s6 + $0x278] sm:$0xff]  }
 0x1c8   :  { %2403 = vmatpush3.bf16.msra.mxu0 %v2732_v25  ;;  %v2806_v25 = vld [vmem:[%s3592_s6 + $0x238] sm:$0xff]  }
 0x1c9   :  { %2404 = vmatprep.subr.bf16.mxu0 %v2734_v28  ;;  %v336_v28 = vpack.c.bf16 %v264_v2, %v264_v2  ;;  %v2864_v2 = vld [vmem:[%s3592_s6 + $0x428] sm:$0xff]  }
 0x1cc   :  { %2405 = vmatpush3.bf16.msra.mxu0 %v2736_v29  ;;  %v341_v29 = vpack.c.bf16 %v289_v26, %v289_v26 }
 0x1cd   :  { %2406 = vmatprep.subr.bf16.mxu0 %v2738_v34  ;;  %v2819_v34 = vld [vmem:[%s3592_s6 + $0x310] sm:$0xff]  }
 0x1ce   :  { %v2430_v47 = vpop.f32.mrb[4].mxu1 }
 0x1d0   :  { %2407 = vmatpush3.bf16.msra.mxu0 %v2740_v35  ;;  %v2821_v35 = vld [vmem:[%s3592_s6 + $0x358] sm:$0xff]  }
 0x1d1   :  { %2436 = vmatprep.subr.bf16.mxu0 %v2743_v38  ;;  %v2829_v38 = vld [vmem:[%s3592_s6 + $0x368] sm:$0xff]  }
 0x1d3   :  { %1739 = vmatmul.mubr.bf16.vlgmr.msra.gmra.mrb[4].mxu0 %v328_v39  ;;  %v2831_v39 = vld [vmem:[%s3592_s6 + $0x328] sm:$0xff]  }
 0x1d4   :  { %2437 = vmatpush3.bf16.msra.mxu0 %v2745_v41  ;;  %1818 = vmatprep.mubr.bf16.mxu0 %v333_v42  ;;  %v2835_v41 = vld [vmem:[%s3592_s6 + $0x330] sm:$0xff]   ;;  %v298_v42 = vrot.slane %v3339_v43, %v3048_v49  ;;  %v340_v43 = vpack.c.bf16 %v281_v23, %v281_v23  ;;  %v2116_v23 = vld [vmem:[%s3595_s9 + $0x8] sm:$0xff] }
 0x1d5   :  { %2438 = vmatprep.subr.bf16.mxu0 %v2747_v44  ;;  %v2837_v44 = vld [vmem:[%s3592_s6 + $0x378] sm:$0xff]  }
 0x1d6   :  { %v306_v46 = vcombine.high %v298_v42, %v298_v42 }
 0x1d8   :  { %2439 = vmatpush3.bf16.msra.mxu0 %v2749_v51  ;;  %v2431_v51 = vpop.f32.mrb[5].mxu1  ;;  %v345_v55 = vpack.c.bf16 %v306_v46, %v306_v46 }
 0x1d9   :  { %2440 = vmatprep.subr.bf16.mxu0 %v2751_v52  ;;  %v3499_v52 = vadd.f32 %v2431_v51, %v2430_v47  ;;  %v2433_v49 = vpop.f32.mrb[6].mxu1 }
 0x1da   :  { %v2434_v53 = vpop.f32.mrb[7].mxu1 }
 0x1dc   :  { %2441 = vmatpush3.bf16.msra.mxu0 %v2753_v56  ;;  %v2846_v56 = vld [vmem:[%s3592_s6 + $0x448] sm:$0xff]  }
 0x1dd   :  { %2442 = vmatprep.subr.bf16.mxu0 %v2755_v50  ;;  %v2848_v50 = vld [vmem:[%s3592_s6 + $0x408] sm:$0xff]  }
 0x1e0   :  { %2443 = vmatpush3.bf16.msra.mxu0 %v2757_v57  ;;  %v2850_v57 = vld [vmem:[%s3592_s6 + $0x450] sm:$0xff]  }
 0x1e1   :  { %2444 = vmatprep.subr.bf16.mxu0 %v2759_v58  ;;  %v2852_v58 = vld [vmem:[%s3592_s6 + $0x410] sm:$0xff]  }
 0x1e4   :  { %2445 = vmatpush3.bf16.msra.mxu0 %v2761_v59  ;;  %v2854_v59 = vld [vmem:[%s3592_s6 + $0x458] sm:$0xff]  }
 0x1e5   :  { %2446 = vmatprep.subr.bf16.mxu0 %v2763_v60  ;;  %v2856_v60 = vld [vmem:[%s3592_s6 + $0x418] sm:$0xff]  }
 0x1e8   :  { %2447 = vmatpush3.bf16.msra.mxu0 %v2765_v61  ;;  %v2858_v61 = vld [vmem:[%s3592_s6 + $0x460] sm:$0xff]  }
 0x1e9   :  { %2448 = vmatprep.subr.bf16.mxu0 %v2767_v63  ;;  %v2860_v63 = vld [vmem:[%s3592_s6 + $0x420] sm:$0xff]  }
 0x1ec   :  { %2449 = vmatpush3.bf16.msra.mxu0 %v2769_v1  ;;  %v2862_v1 = vld [vmem:[%s3592_s6 + $0x468] sm:$0xff]  }
 0x1ed   :  { %2450 = vmatprep.subr.bf16.mxu0 %v2771_v3  ;;  %v2866_v3 = vld [vmem:[%s3592_s6 + $0x470] sm:$0xff]  }
 0x1f0   :  { %2451 = vmatpush3.bf16.msra.mxu0 %v2773_v4  ;;  %v2868_v4 = vld [vmem:[%s3592_s6 + $0x430] sm:$0xff]  }
 0x1f1   :  { %2480 = vmatprep.subr.bf16.mxu0 %v2776_v6  ;;  %v2872_v6 = vld [vmem:[%s3592_s6 + $0x438] sm:$0xff]  }
 0x1f3   :  { %1819 = vmatmul.mubr.bf16.vlgmr.msra.gmra.mrb[8].mxu0 %v332_v8  ;;  %v2474_v8 = vpop.f32.mrb[8].mxu1 }
 0x1f4   :  { %2481 = vmatpush3.bf16.msra.mxu0 %v2778_v31  ;;  %1898 = vmatprep.mubr.bf16.mxu0 %v337_v10  ;;  %v2475_v31 = vpop.f32.mrb[9].mxu1 }
 0x1f5   :  { %2482 = vmatprep.subr.bf16.mxu0 %v2780_v11  ;;  %v2476_v10 = vadd.f32 %v2475_v31, %v2474_v8  ;;  %v2477_v11 = vpop.f32.mrb[10].mxu1 }
 0x1f8   :  { %2483 = vmatpush3.bf16.msra.mxu0 %v2782_v12  ;;  %v344_v12 = vpack.c.bf16 %v298_v42, %v298_v42 }
 0x1f9   :  { %2484 = vmatprep.subr.bf16.mxu0 %v2784_v13  ;;  %v2478_v13 = vpop.f32.mrb[11].mxu1 }
 0x1fa   :  { %v2373_v13 = vld [vmem:[%s3596_s8] ss:$0 sm:$0xff] }
 0x1fc   :  { %2485 = vmatpush3.bf16.msra.mxu0 %v2786_v14 }
 0x1fd   :  { %2486 = vmatprep.subr.bf16.mxu0 %v2788_v15 }
 0x200   :  { %2487 = vmatpush3.bf16.msra.mxu0 %v2790_v16 }
 0x201   :  { %2488 = vmatprep.subr.bf16.mxu0 %v2792_v17 }
 0x204   :  { %2489 = vmatpush3.bf16.msra.mxu0 %v2794_v18 }
 0x205   :  { %2490 = vmatprep.subr.bf16.mxu0 %v2796_v19 }
 0x208   :  { %2491 = vmatpush3.bf16.msra.mxu0 %v2798_v20 }
 0x209   :  { %2492 = vmatprep.subr.bf16.mxu0 %v2800_v21 }
 0x20c   :  { %2493 = vmatpush3.bf16.msra.mxu0 %v2802_v22  ;;  %v2115_v22 = vld [vmem:[%s3595_s9] sm:$0xff] }
 0x20d   :  { %2494 = vmatprep.subr.bf16.mxu0 %v2804_v24 }
 0x20e   :  { %v2518_v14 = vpop.f32.mrb[12].mxu1 }
 0x20f   :  { %v2519_v15 = vpop.f32.mrb[13].mxu1 }
 0x210   :  { %2495 = vmatpush3.bf16.msra.mxu0 %v2806_v25  ;;  %v2520_v16 = vadd.f32 %v2519_v15, %v2518_v14  ;;  %v2521_v17 = vpop.f32.mrb[14].mxu1  ;;  %v2694_v25 = vpack.c.bf16 %v2116_v23, %v2115_v22 }
 0x211   :  { %2524 = vmatprep.subr.bf16.mxu0 %v2809_v27  ;;  %v2522_v18 = vpop.f32.mrb[15].mxu1  ;;  %v2374_v17 = vld [vmem:[%s3597_s10] ss:$0 sm:$0xff] }
 0x213   :  { %1899 = vmatmul.mubr.bf16.vlgmr.msra.gmra.mrb[12].mxu0 %v336_v28  ;;  %v2117_v28 = vld [vmem:[%s3595_s9 + $0x10] sm:$0xff] }
 0x214   :  { %2525 = vmatpush3.bf16.msra.mxu0 %v2811_v62  ;;  %1978 = vmatprep.mubr.bf16.mxu0 %v341_v29  ;;  %v2118_v62 = vld [vmem:[%s3595_s9 + $0x18] sm:$0xff] }
 0x215   :  { %2526 = vmatprep.subr.bf16.mxu0 %v2813_v30  ;;  %v2697_v29 = vpack.c.bf16 %v2118_v62, %v2117_v28 }
 0x218   :  { %2527 = vmatpush3.bf16.msra.mxu0 %v2815_v32 }
 0x219   :  { %2528 = vmatprep.subr.bf16.mxu0 %v2817_v33 }
 0x21c   :  { %2529 = vmatpush3.bf16.msra.mxu0 %v2819_v34 }
 0x21d   :  { %2530 = vmatprep.subr.bf16.mxu0 %v2821_v35  ;;  %v2119_v35 = vld [vmem:[%s3595_s9 + $0x20] sm:$0xff] }
 0x220   :  { %2531 = vmatpush3.bf16.msra.mxu0 %v2823_v9  ;;  %v2120_v9 = vld [vmem:[%s3595_s9 + $0x28] sm:$0xff] }
 0x221   :  { %2532 = vmatprep.subr.bf16.mxu0 %v2825_v36 }
 0x224   :  { %2533 = vmatpush3.bf16.msra.mxu0 %v2827_v37  ;;  %v2700_v37 = vpack.c.bf16 %v2120_v9, %v2119_v35 }
 0x225   :  { %2534 = vmatprep.subr.bf16.mxu0 %v2829_v38 }
 0x228   :  { %2535 = vmatpush3.bf16.msra.mxu0 %v2831_v39 }
 0x229   :  { %2536 = vmatprep.subr.bf16.mxu0 %v2833_v40  ;;  %v2121_v40 = vld [vmem:[%s3595_s9 + $0x30] sm:$0xff] }
 0x22c   :  { %2537 = vmatpush3.bf16.msra.mxu0 %v2835_v41  ;;  %v2122_v41 = vld [vmem:[%s3595_s9 + $0x38] sm:$0xff] }
 0x22d   :  { %2538 = vmatprep.subr.bf16.mxu0 %v2837_v44  ;;  %v2703_v44 = vpack.c.bf16 %v2122_v41, %v2121_v40 }
 0x22e   :  { %v2562_v21 = vpop.f32.mrb[16].mxu1 }
 0x22f   :  { %v2563_v24 = vpop.f32.mrb[17].mxu1 }
 0x230   :  { %2539 = vmatpush3.bf16.msra.mxu0 %v2839_v45  ;;  %v2564_v26 = vadd.f32 %v2563_v24, %v2562_v21 }
 0x231   :  { %2568 = vmatprep.subr.bf16.mxu0 %v2842_v48 }
 0x233   :  { %1979 = vmatmul.mubr.bf16.vlgmr.msra.gmra.mrb[16].mxu0 %v340_v43 }
 0x234   :  { %2569 = vmatpush3.bf16.msra.mxu0 %v2844_v54  ;;  %2058 = vmatprep.mubr.bf16.mxu0 %v345_v55 }
 0x235   :  { %2570 = vmatprep.subr.bf16.mxu0 %v2846_v56 }
 0x238   :  { %2571 = vmatpush3.bf16.msra.mxu0 %v2848_v50 }
 0x239   :  { %2572 = vmatprep.subr.bf16.mxu0 %v2850_v57 }
 0x23c   :  { %2573 = vmatpush3.bf16.msra.mxu0 %v2852_v58 }
 0x23d   :  { %2574 = vmatprep.subr.bf16.mxu0 %v2854_v59 }
 0x240   :  { %2575 = vmatpush3.bf16.msra.mxu0 %v2856_v60 }
 0x241   :  { %2576 = vmatprep.subr.bf16.mxu0 %v2858_v61 }
 0x244   :  { %2577 = vmatpush3.bf16.msra.mxu0 %v2860_v63 }
 0x245   :  { %2578 = vmatprep.subr.bf16.mxu0 %v2862_v1 }
 0x248   :  { %2579 = vmatpush3.bf16.msra.mxu0 %v2864_v2 }
 0x249   :  { %2580 = vmatprep.subr.bf16.mxu0 %v2866_v3 }
 0x24c   :  { %2581 = vmatpush3.bf16.msra.mxu0 %v2868_v4 }
 0x24d   :  { %2582 = vmatprep.subr.bf16.mxu0 %v2870_v5 }
 0x250   :  { %2583 = vmatpush3.bf16.msra.mxu0 %v2872_v6 }
 0x251   :  { %2693 = vmatprep.subr.bf16.mxu0 %v2876_v7 }
 0x253   :  { %2059 = vmatmul.mubr.bf16.vlgmr.msra.gmra.mrb[20].mxu0 %v344_v12 }
 0x254   :  { %2672 = vmatprep.mubr.msk.f32.mxu0 %vm2875_vm1, %v2874_v0  ;;  %v2565_v0 = vpop.f32.mrb[18].mxu1  ;;  %2695 = vmatpush3.bf16.msra.mxu0 %v2694_v25 }
 0x255   :  { %v2566_v27 = vpop.f32.mrb[19].mxu1  ;;  %2696 = vmatprep.subr.bf16.mxu0 %v2876_v7 }
 0x258   :  { %2698 = vmatpush3.bf16.msra.mxu0 %v2697_v29 }
 0x259   :  { %2699 = vmatprep.subr.bf16.mxu0 %v2876_v7 }
 0x25c   :  { %2701 = vmatpush3.bf16.msra.mxu0 %v2700_v37 }
 0x25d   :  { %2702 = vmatprep.subr.bf16.mxu0 %v2876_v7 }
 0x260   :  { %2704 = vmatpush3.bf16.msra.mxu0 %v2703_v44 }
 0x284   :  { %v2606_v42 = vpop.f32.mrb[20].mxu1 }
 0x285   :  { %v2607_v45 = vpop.f32.mrb[21].mxu1 }
 0x286   :  { %v742_v19 = vpop.f32.mrb[0].mxu0  ;;  %v2608_v46 = vadd.f32 %v2607_v45, %v2606_v42  ;;  %v2609_v47 = vpop.f32.mrb[22].mxu1 }
 0x287   :  { %v2655_v20 = vpop.f32.mrb[1].mxu0  ;;  %v2610_v48 = vpop.f32.mrb[23].mxu1 }
 0x2a6   :  { %v2408_v30 = vpop.f32.mrb[4].mxu0 }
 0x2a7   :  { %v2409_v32 = vpop.f32.mrb[5].mxu0 }
 0x2a8   :  { %v2410_v33 = vadd.f32 %v2409_v32, %v2408_v30  ;;  %v2411_v34 = vpop.f32.mrb[6].mxu0 }
 0x2a9   :  { %v2412_v36 = vpop.f32.mrb[7].mxu0 }
 0x2aa   :  { %v1741_v38 = vadd.f32 %v2410_v33, %v742_v19 }
 0x2ac   :  { %v1781_v39 = vadd.f32 %v3499_v52, %v1741_v38 }
 0x2c6   :  { %v2452_v51 = vpop.f32.mrb[8].mxu0 }
 0x2c7   :  { %v2453_v49 = vpop.f32.mrb[9].mxu0 }
 0x2c8   :  { %v2454_v52 = vadd.f32 %v2453_v49, %v2452_v51  ;;  %v2455_v43 = vpop.f32.mrb[10].mxu0 }
 0x2c9   :  { %v2456_v7 = vpop.f32.mrb[11].mxu0 }
 0x2ca   :  { %v1821_v53 = vadd.f32 %v2454_v52, %v1781_v39 }
 0x2cc   :  { %v1861_v54 = vadd.f32 %v2476_v10, %v1821_v53 }
 0x2e6   :  { %v2496_v55 = vpop.f32.mrb[12].mxu0 }
 0x2e7   :  { %v2497_v56 = vpop.f32.mrb[13].mxu0 }
 0x2e8   :  { %v2498_v50 = vadd.f32 %v2497_v56, %v2496_v55  ;;  %v2499_v57 = vpop.f32.mrb[14].mxu0 }
 0x2e9   :  { %v2500_v58 = vpop.f32.mrb[15].mxu0 }
 0x2ea   :  { %v1901_v59 = vadd.f32 %v2498_v50, %v1861_v54 }
 0x2ec   :  { %v1941_v60 = vadd.f32 %v2520_v16, %v1901_v59 }
 0x306   :  { %v2540_v61 = vpop.f32.mrb[16].mxu0 }
 0x307   :  { %v2541_v63 = vpop.f32.mrb[17].mxu0 }
 0x308   :  { %v2542_v1 = vadd.f32 %v2541_v63, %v2540_v61  ;;  %v2543_v2 = vpop.f32.mrb[18].mxu0 }
 0x309   :  { %v2544_v3 = vpop.f32.mrb[19].mxu0 }
 0x30a   :  { %v1981_v4 = vadd.f32 %v2542_v1, %v1941_v60 }
 0x30c   :  { %v2021_v5 = vadd.f32 %v2564_v26, %v1981_v4 }
 0x326   :  { %v2584_v6 = vpop.f32.mrb[20].mxu0 }
 0x327   :  { %v2585_v8 = vpop.f32.mrb[21].mxu0 }
 0x328   :  { %v2586_v31 = vadd.f32 %v2585_v8, %v2584_v6  ;;  %v2587_v11 = vpop.f32.mrb[22].mxu0 }
 0x329   :  { %v2588_v12 = vpop.f32.mrb[23].mxu0 }
 0x32a   :  { %v2061_v10 = vadd.f32 %v2586_v31, %v2021_v5 }
 0x32c   :  { %v2101_v14 = vadd.f32 %v2608_v46, %v2061_v10 }
 0x32e   :  { %v2113_v15 = vadd.f32 %v2373_v13, %v2101_v14 }
 0x330   :  { %v2114_v16 = vmax.f32 %v2113_v15, 0.0 }
 0x332   :  { %2673 = vmatmul.mubr.msk.f32.vlgmr.msra.gmra.mrb[2].mxu0 %vm138_vm2, %v2114_v16 }
 0x405   :  { %v2199_v18 = vpop.f32.mrb[2].mxu0 }
 0x406   :  { %v2200_v19 = vadd.f32 %v2374_v17, %v2199_v18  ;;  %v2674_v20 = vpop.f32.mrb[3].mxu0 }
 0x408   :  { %2203 = vst [vmem:[%s3598_s11] sm:$0x3] %v2200_v19 }

</bundles_post_ra>
